<compile_context>
chip_gen: v6e
topology: v6e:2x2x1
jax: 0.10.0
libtpu: 0.0.40
codegen_flags: <defaults>
</compile_context>

<pallas_src>
import functools
import numpy as np
import jax
import jax.numpy as jnp
from jax.experimental import pallas as pl
from jax.experimental.pallas import tpu as pltpu

# ---- model constants (match the PyTorch module's fixed layer sizes) --------
IN_CH = 3
VIT_PATCH = 14          # DINOv2 patch size
VIT_HIDDEN = 1024       # DINOv2-large hidden size (1408 = 1024 + 3*128)
DN_PATCH = 8            # stand-in DenseNet stem stride
DN_FEAT = 188           # DenseNet(growth=16, blocks=(6,6,6,6)) feature chans
MS_CH = 128             # per-scale reduced channels
TARGET = 20             # target_dim
FUSE_OUT = 768
SCALES = ('3x3', '5x5', '7x7')


# --------------------------- interpolation helpers ---------------------------
def _bilinear_matrix(in_size, out_size):
    """PyTorch bilinear (align_corners=False) interpolation matrix (out, in).
    Rows sum to exactly 1 (so constants are preserved by the resize)."""
    scale = in_size / out_size
    i = np.arange(out_size, dtype=np.float64)
    src = np.clip((i + 0.5) * scale - 0.5, 0.0, None)
    i0 = np.minimum(np.floor(src).astype(np.int64), in_size - 1)
    i1 = np.minimum(i0 + 1, in_size - 1)
    w1 = src - i0
    w0 = 1.0 - w1
    mat = np.zeros((out_size, in_size), dtype=np.float32)
    mat[np.arange(out_size), i0] += w0
    mat[np.arange(out_size), i1] += w1
    return mat


@functools.lru_cache(maxsize=None)
def _kron_resize_matrix(in_h, in_w, out_h, out_w):
    """R such that resize(x)[p] = sum_q R[p, q] * x[q] with row-major flattened
    spatial indices (p = hi*out_w + wi, q = hj*in_w + wj)."""
    return np.kron(_bilinear_matrix(in_h, out_h),
                   _bilinear_matrix(in_w, out_w)).astype(np.float32)


def _patchify(x, p):
    """Non-overlapping patch extraction: NHWC -> (B, num_patches, p*p*C)."""
    B, H, W, C = x.shape
    x = x.reshape(B, H // p, p, W // p, p, C).transpose(0, 1, 3, 2, 4, 5)
    return x.reshape(B, (H // p) * (W // p), p * p * C)


# ------------------------------- Pallas kernel -------------------------------
def _fused_forward_kernel(pv_ref, pd_ref, wv_ref, wd_ref, bd_ref, wm_ref,
                          r_ref, bf_ref, o_ref):
    """Whole CombinedSSLModel forward for one batch element.

    pv: (1, 16, 588) bf16   ViT patches          wv: (588, 768) bf16
    pd: (1, 49, 192) bf16   DenseNet patches     wd: (192, 564) bf16
    bd: (1, 564)     f32    stem bias (pre-ReLU) wm: (564, 768) bf16
    r : (400, 65)    f32    [kron(4->20) | kron(7->20)] resize matrix
    bf: (1, 768)     f32    folded final bias    o:  (1, 400, 768) f32
    """
    # ViT half of the fusion conv, applied at 4x4 resolution (commuted past
    # the resize; the folded bias is constant per-pixel -> moved into bf).
    v = jnp.dot(pv_ref[0], wv_ref[...], preferred_element_type=jnp.float32)   # (16, 768)

    # Multi-scale trunk: fused 3-branch stem -> ReLU -> folded
    # (block-diag reduce @ reduce_channels @ fusion[ms]) matmul.  The 564-wide
    # intermediate never leaves VMEM.
    h = jnp.dot(pd_ref[0], wd_ref[...], preferred_element_type=jnp.float32)   # (49, 564)
    h = jnp.maximum(h + bd_ref[...], 0.0).astype(jnp.bfloat16)
    ms = jnp.dot(h, wm_ref[...], preferred_element_type=jnp.float32)          # (49, 768)

    # Both bilinear upsamples to 20x20 in a single matmul (channel axis on the
    # lanes): [R_vit | R_ms] @ [v; ms], then the single folded output bias.
    vm = jnp.concatenate([v, ms], axis=0)                                     # (65, 768)
    out = jnp.dot(r_ref[...], vm, preferred_element_type=jnp.float32)         # (400, 768)
    o_ref[0] = (out + bf_ref[...]).astype(o_ref.dtype)


# --------------------------- parameter folding -------------------------------
def prepare_fused_params(params):
    """Fold all linear chains of CombinedSSLModel into 3 weights + 2 biases.
    Folding is exact (done in f32); weights are then cast to bf16 for the MXU."""
    wf = params['fusion_w'].astype(jnp.float32)        # (1408, 768)
    wf_vit, wf_ms = wf[:VIT_HIDDEN], wf[VIT_HIDDEN:]

    # ViT patch-embed folded with the ViT slice of the fusion conv.
    wv = params['vit_w'] @ wf_vit                       # (588, 768)
    bv = params['vit_b'] @ wf_vit                       # (768,)

    # The three dense stems read identical patches -> concat weights column-wise.
    wd = jnp.concatenate([params[f'dense{n}_w'] for n in SCALES], axis=1)   # (192, 564)
    bd = jnp.concatenate([params[f'dense{n}_b'] for n in SCALES])           # (564,)

    # block-diag(reduce convs) @ reduce_channels @ fusion[ms slice].
    wr = jnp.zeros((3 * DN_FEAT, 3 * MS_CH), jnp.float32)
    for i, n in enumerate(SCALES):
        wr = wr.at[i * DN_FEAT:(i + 1) * DN_FEAT,
                   i * MS_CH:(i + 1) * MS_CH].set(params[f'reduce{n}_w'])
    br = jnp.concatenate([params[f'reduce{n}_b'] for n in SCALES])          # (384,)
    wm = wr @ params['reduce_channels_w'] @ wf_ms                           # (564, 768)
    bm = (br @ params['reduce_channels_w'] + params['reduce_channels_b']) @ wf_ms

    # Bilinear rows sum to 1, so every post-ReLU bias commutes past the resize
    # and collapses into one output bias.
    b_final = bv + bm + params['fusion_b']

    return {
        'wv': wv.astype(jnp.bfloat16),
        'wd': wd.astype(jnp.bfloat16),
        'bd': bd.reshape(1, -1).astype(jnp.float32),
        'wm': wm.astype(jnp.bfloat16),
        'bf': b_final.reshape(1, -1).astype(jnp.float32),
    }


# ------------------------------ forward pass ---------------------------------
def combined_ssl_forward(x_nchw, fused):
    B = x_nchw.shape[0]
    x = jnp.transpose(x_nchw, (0, 2, 3, 1))                       # NCHW -> NHWC
    pv = _patchify(x, VIT_PATCH).astype(jnp.bfloat16)             # (B, 16, 588)
    pd = _patchify(x, DN_PATCH).astype(jnp.bfloat16)              # (B, 49, 192)
    nv, kv = pv.shape[1], pv.shape[2]
    nd, kd = pd.shape[1], pd.shape[2]

    # Mirrors torch: spatial_dim = int(sqrt(num_patches)) with the CLS token
    # counted (the CLS token itself is sliced off, so it is skipped entirely).
    sv = int(np.sqrt(nv + 1))
    sd = int(np.sqrt(nd))
    rv = _kron_resize_matrix(sv, sv, TARGET, TARGET)               # (400, 16)
    rm = _kron_resize_matrix(sd, sd, TARGET, TARGET)               # (400, 49)
    r = jnp.asarray(np.concatenate([rv, rm], axis=1))              # (400, 65)

    out = pl.pallas_call(
        _fused_forward_kernel,
        out_shape=jax.ShapeDtypeStruct((B, TARGET * TARGET, FUSE_OUT), jnp.float32),
        grid=(B,),
        in_specs=[
            pl.BlockSpec((1, nv, kv), lambda b: (b, 0, 0)),        # ViT patches
            pl.BlockSpec((1, nd, kd), lambda b: (b, 0, 0)),        # DenseNet patches
            pl.BlockSpec(fused['wv'].shape, lambda b: (0, 0)),     # resident weights
            pl.BlockSpec(fused['wd'].shape, lambda b: (0, 0)),
            pl.BlockSpec(fused['bd'].shape, lambda b: (0, 0)),
            pl.BlockSpec(fused['wm'].shape, lambda b: (0, 0)),
            pl.BlockSpec(r.shape, lambda b: (0, 0)),
            pl.BlockSpec(fused['bf'].shape, lambda b: (0, 0)),
        ],
        out_specs=pl.BlockSpec((1, TARGET * TARGET, FUSE_OUT), lambda b: (b, 0, 0)),
        compiler_params=pltpu.CompilerParams(
            dimension_semantics=("parallel",),          # 2 programs -> both v7x TCs
            vmem_limit_bytes=32 * 1024 * 1024),         # headroom above v5e default
    )(pv, pd, fused['wv'], fused['wd'], fused['bd'], fused['wm'], r, fused['bf'])

    out = out.reshape(B, TARGET, TARGET, FUSE_OUT)
    return jnp.transpose(out, (0, 3, 1, 2))                        # NHWC -> NCHW


# ------------------------ pure-jnp unfolded reference -------------------------
def _reference_forward(x_nchw, params):
    """f32 reference in the ORIGINAL op order (per-branch convs, concat,
    reduce_channels, resizes, fusion conv) to validate the folding algebra."""
    x = jnp.transpose(x_nchw, (0, 2, 3, 1))

    def resize(y):
        B, H, W, C = y.shape
        wh = jnp.asarray(_bilinear_matrix(H, TARGET))
        ww = jnp.asarray(_bilinear_matrix(W, TARGET))
        return jnp.einsum('ph,qw,bhwc->bpqc', wh, ww, y)

    pv = _patchify(x, VIT_PATCH)
    B, nv, _ = pv.shape
    vit = pv @ params['vit_w'] + params['vit_b']
    sv = int(np.sqrt(nv + 1))
    vit = resize(vit.reshape(B, sv, sv, VIT_HIDDEN))

    pd = _patchify(x, DN_PATCH)
    sd = int(np.sqrt(pd.shape[1]))
    branches = []
    for n in SCALES:
        f = jnp.maximum(pd @ params[f'dense{n}_w'] + params[f'dense{n}_b'], 0.0)
        branches.append(f @ params[f'reduce{n}_w'] + params[f'reduce{n}_b'])
    ms = jnp.concatenate(branches, axis=-1)
    ms = ms @ params['reduce_channels_w'] + params['reduce_channels_b']
    ms = resize(ms.reshape(B, sd, sd, 3 * MS_CH))

    comb = jnp.concatenate([vit, ms], axis=-1)
    fused = comb @ params['fusion_w'] + params['fusion_b']
    return jnp.transpose(fused, (0, 3, 1, 2))


# --------------------------- deterministic params ----------------------------
def init_params(key):
    # TODO(synk): the pretrained facebook/dinov2-large transformer encoder and
    # the full DenseNet(growth 16, blocks (6,6,6,6)) feature stacks are not
    # reproduced; stand-ins are a patch-embed matmul (CLS dropped, as the torch
    # forward slices it off) and a strided patch conv + ReLU giving the same
    # 188-channel interface.
    ks = jax.random.split(key, 16)

    def nrm(k, shape, scale=0.02):
        return scale * jax.random.normal(k, shape, jnp.float32)

    params = {
        'vit_w': nrm(ks[0], (VIT_PATCH * VIT_PATCH * IN_CH, VIT_HIDDEN)),
        'vit_b': nrm(ks[1], (VIT_HIDDEN,)),
        'fusion_w': nrm(ks[3], (VIT_HIDDEN + 3 * MS_CH, FUSE_OUT)),
        'fusion_b': nrm(ks[4], (FUSE_OUT,)),
        'reduce_channels_w': nrm(ks[5], (3 * MS_CH, 3 * MS_CH)),
        'reduce_channels_b': nrm(ks[6], (3 * MS_CH,)),
    }
    for idx, name in enumerate(SCALES):
        k1, k2, k3, k4 = jax.random.split(ks[7 + idx], 4)
        params[f'dense{name}_w'] = nrm(k1, (DN_PATCH * DN_PATCH * IN_CH, DN_FEAT))
        params[f'dense{name}_b'] = nrm(k2, (DN_FEAT,))
        params[f'reduce{name}_w'] = nrm(k3, (DN_FEAT, MS_CH))
        params[f'reduce{name}_b'] = nrm(k4, (MS_CH,))
    return params


if __name__ == "__main__":
    # 56x56 input -> 4x4 ViT patch grid (+CLS) and 7x7 DenseNet feature grid.
    x = jax.random.normal(jax.random.PRNGKey(0), (2, IN_CH, 56, 56), jnp.float32)
    params = init_params(jax.random.PRNGKey(1))
    fused_params = prepare_fused_params(params)

    forward = jax.jit(combined_ssl_forward)
    out = jax.block_until_ready(forward(x, fused_params))

    assert out.shape == (2, FUSE_OUT, TARGET, TARGET), out.shape
    assert bool(jnp.isfinite(out).all())

    # Validate the fused/folded kernel against the unfolded f32 reference
    # (loose tolerance: activations/weights go through bf16 on the MXU).
    ref = _reference_forward(x, params)
    err = float(jnp.max(jnp.abs(out - ref)))
    assert err < 5e-2, f"max abs err vs reference: {err}"

    print("KERNEL_OK")
</pallas_src>

<mosaic_0001>
module attributes {stable_mosaic.version = 11 : i64} {
  func.func @_fused_forward_kernel(%arg0: i32, %arg1: memref<1x16x588xbf16, #tpu.memory_space<vmem>>, %arg2: memref<1x49x192xbf16, #tpu.memory_space<vmem>>, %arg3: memref<588x768xbf16, #tpu.memory_space<vmem>>, %arg4: memref<192x564xbf16, #tpu.memory_space<vmem>>, %arg5: memref<1x564xf32, #tpu.memory_space<vmem>>, %arg6: memref<564x768xbf16, #tpu.memory_space<vmem>>, %arg7: memref<400x65xf32, #tpu.memory_space<vmem>>, %arg8: memref<1x768xf32, #tpu.memory_space<vmem>>, %arg9: memref<1x400x768xf32, #tpu.memory_space<vmem>>) attributes {dimension_semantics = [#tpu.dimension_semantics<parallel>], iteration_bounds = array<i64: 2>, scalar_prefetch = 0 : i64, scratch_operands = 0 : i64, tpu.core_type = #tpu.core_type<tc>, window_params = [{transform_indices = @transform_0, window_bounds = array<i64: 1, 16, 588>}, {transform_indices = @transform_1, window_bounds = array<i64: 1, 49, 192>}, {pipeline_mode = #tpu.pipeline_mode<synchronous>, transform_indices = @transform_2, window_bounds = array<i64: 588, 768>}, {pipeline_mode = #tpu.pipeline_mode<synchronous>, transform_indices = @transform_3, window_bounds = array<i64: 192, 564>}, {pipeline_mode = #tpu.pipeline_mode<synchronous>, transform_indices = @transform_4, window_bounds = array<i64: 1, 564>}, {pipeline_mode = #tpu.pipeline_mode<synchronous>, transform_indices = @transform_5, window_bounds = array<i64: 564, 768>}, {pipeline_mode = #tpu.pipeline_mode<synchronous>, transform_indices = @transform_6, window_bounds = array<i64: 400, 65>}, {pipeline_mode = #tpu.pipeline_mode<synchronous>, transform_indices = @transform_7, window_bounds = array<i64: 1, 768>}, {transform_indices = @transform_8, window_bounds = array<i64: 1, 400, 768>}]} {
    %c0 = arith.constant 0 : index
    %c0_0 = arith.constant 0 : index
    %c0_1 = arith.constant 0 : index
    %0 = vector.load %arg1[%c0, %c0_0, %c0_1] : memref<1x16x588xbf16, #tpu.memory_space<vmem>>, vector<1x16x588xbf16>
    %1 = vector.shape_cast %0 : vector<1x16x588xbf16> to vector<16x588xbf16>
    %c0_2 = arith.constant 0 : index
    %c0_3 = arith.constant 0 : index
    %2 = vector.load %arg3[%c0_2, %c0_3] : memref<588x768xbf16, #tpu.memory_space<vmem>>, vector<588x768xbf16>
    %cst = arith.constant dense<0.000000e+00> : vector<16x768xf32>
    %3 = tpu.matmul %1, %2, %cst {dimension_numbers = #tpu.dot_dimension_numbers<[1], [0], [0], [1], [0, 0, 1, 1], [], []>} : vector<16x588xbf16>, vector<588x768xbf16>, vector<16x768xf32> -> vector<16x768xf32>
    %c0_4 = arith.constant 0 : index
    %c0_5 = arith.constant 0 : index
    %c0_6 = arith.constant 0 : index
    %4 = vector.load %arg2[%c0_4, %c0_5, %c0_6] : memref<1x49x192xbf16, #tpu.memory_space<vmem>>, vector<1x49x192xbf16>
    %5 = vector.shape_cast %4 : vector<1x49x192xbf16> to vector<49x192xbf16>
    %c0_7 = arith.constant 0 : index
    %c0_8 = arith.constant 0 : index
    %6 = vector.load %arg4[%c0_7, %c0_8] : memref<192x564xbf16, #tpu.memory_space<vmem>>, vector<192x564xbf16>
    %cst_9 = arith.constant dense<0.000000e+00> : vector<49x564xf32>
    %7 = tpu.matmul %5, %6, %cst_9 {dimension_numbers = #tpu.dot_dimension_numbers<[1], [0], [0], [1], [0, 0, 1, 1], [], []>} : vector<49x192xbf16>, vector<192x564xbf16>, vector<49x564xf32> -> vector<49x564xf32>
    %c0_10 = arith.constant 0 : index
    %c0_11 = arith.constant 0 : index
    %8 = vector.load %arg5[%c0_10, %c0_11] : memref<1x564xf32, #tpu.memory_space<vmem>>, vector<1x564xf32>
    %9 = vector.broadcast %8 : vector<1x564xf32> to vector<49x564xf32>
    %10 = arith.addf %7, %9 : vector<49x564xf32>
    %cst_12 = arith.constant 0.000000e+00 : f32
    %11 = vector.broadcast %cst_12 : f32 to vector<49x564xf32>
    %12 = arith.maximumf %10, %11 : vector<49x564xf32>
    %13 = arith.truncf %12 : vector<49x564xf32> to vector<49x564xbf16>
    %c0_13 = arith.constant 0 : index
    %c0_14 = arith.constant 0 : index
    %14 = vector.load %arg6[%c0_13, %c0_14] : memref<564x768xbf16, #tpu.memory_space<vmem>>, vector<564x768xbf16>
    %cst_15 = arith.constant dense<0.000000e+00> : vector<49x768xf32>
    %15 = tpu.matmul %13, %14, %cst_15 {dimension_numbers = #tpu.dot_dimension_numbers<[1], [0], [0], [1], [0, 0, 1, 1], [], []>} : vector<49x564xbf16>, vector<564x768xbf16>, vector<49x768xf32> -> vector<49x768xf32>
    %16 = tpu.concatenate %3, %15 in 0 : vector<16x768xf32>, vector<49x768xf32> -> vector<65x768xf32>
    %c0_16 = arith.constant 0 : index
    %c0_17 = arith.constant 0 : index
    %17 = vector.load %arg7[%c0_16, %c0_17] : memref<400x65xf32, #tpu.memory_space<vmem>>, vector<400x65xf32>
    %cst_18 = arith.constant dense<0.000000e+00> : vector<400x768xf32>
    %18 = tpu.matmul %17, %16, %cst_18 {dimension_numbers = #tpu.dot_dimension_numbers<[1], [0], [0], [1], [0, 0, 1, 1], [], []>} : vector<400x65xf32>, vector<65x768xf32>, vector<400x768xf32> -> vector<400x768xf32>
    %c0_19 = arith.constant 0 : index
    %c0_20 = arith.constant 0 : index
    %19 = vector.load %arg8[%c0_19, %c0_20] : memref<1x768xf32, #tpu.memory_space<vmem>>, vector<1x768xf32>
    %20 = vector.broadcast %19 : vector<1x768xf32> to vector<400x768xf32>
    %21 = arith.addf %18, %20 : vector<400x768xf32>
    %c0_21 = arith.constant 0 : index
    %c0_22 = arith.constant 0 : index
    %c0_23 = arith.constant 0 : index
    %22 = vector.load %arg9[%c0_21, %c0_22, %c0_23] : memref<1x400x768xf32, #tpu.memory_space<vmem>>, vector<1x400x768xf32>
    %23 = vector.shape_cast %22 : vector<1x400x768xf32> to vector<400x768xf32>
    %24 = vector.shape_cast %21 : vector<400x768xf32> to vector<1x400x768xf32>
    tpu.vector_store %arg9[%c0_21, %c0_22, %c0_23], %24 {strides = array<i32>} : memref<1x400x768xf32, #tpu.memory_space<vmem>>, vector<1x400x768xf32>,
    return
  }
  func.func @transform_0(%arg0: i32) -> (i32, i32, i32) {
    %c0_i32 = arith.constant 0 : i32
    %c0_i32_0 = arith.constant 0 : i32
    %c0_i32_1 = arith.constant 0 : i32
    return %arg0, %c0_i32, %c0_i32_0 : i32, i32, i32
  }
  func.func @transform_1(%arg0: i32) -> (i32, i32, i32) {
    %c0_i32 = arith.constant 0 : i32
    %c0_i32_0 = arith.constant 0 : i32
    %c0_i32_1 = arith.constant 0 : i32
    return %arg0, %c0_i32, %c0_i32_0 : i32, i32, i32
  }
  func.func @transform_2(%arg0: i32) -> (i32, i32) {
    %c0_i32 = arith.constant 0 : i32
    %c0_i32_0 = arith.constant 0 : i32
    %c0_i32_1 = arith.constant 0 : i32
    return %c0_i32, %c0_i32_0 : i32, i32
  }
  func.func @transform_3(%arg0: i32) -> (i32, i32) {
    %c0_i32 = arith.constant 0 : i32
    %c0_i32_0 = arith.constant 0 : i32
    %c0_i32_1 = arith.constant 0 : i32
    return %c0_i32, %c0_i32_0 : i32, i32
  }
  func.func @transform_4(%arg0: i32) -> (i32, i32) {
    %c0_i32 = arith.constant 0 : i32
    %c0_i32_0 = arith.constant 0 : i32
    %c0_i32_1 = arith.constant 0 : i32
    return %c0_i32, %c0_i32_0 : i32, i32
  }
  func.func @transform_5(%arg0: i32) -> (i32, i32) {
    %c0_i32 = arith.constant 0 : i32
    %c0_i32_0 = arith.constant 0 : i32
    %c0_i32_1 = arith.constant 0 : i32
    return %c0_i32, %c0_i32_0 : i32, i32
  }
  func.func @transform_6(%arg0: i32) -> (i32, i32) {
    %c0_i32 = arith.constant 0 : i32
    %c0_i32_0 = arith.constant 0 : i32
    %c0_i32_1 = arith.constant 0 : i32
    return %c0_i32, %c0_i32_0 : i32, i32
  }
  func.func @transform_7(%arg0: i32) -> (i32, i32) {
    %c0_i32 = arith.constant 0 : i32
    %c0_i32_0 = arith.constant 0 : i32
    %c0_i32_1 = arith.constant 0 : i32
    return %c0_i32, %c0_i32_0 : i32, i32
  }
  func.func @transform_8(%arg0: i32) -> (i32, i32, i32) {
    %c0_i32 = arith.constant 0 : i32
    %c0_i32_0 = arith.constant 0 : i32
    %c0_i32_1 = arith.constant 0 : i32
    return %arg0, %c0_i32, %c0_i32_0 : i32, i32, i32
  }
}

</mosaic_0001>

<bundles_post_ra>
// kernel: combined_ssl_forward.1
= control target key start
LH: loop header
LB: loop body
LE: loop exit
PB: predicated region body
PF: predicated region fallthrough
CT: control target
= control target key end

     0   :  { %s8064_s27 = smov 0   ;;  %s11557_s0 = inlined_call_operand.vmem [shape: bf16[2,16,588], index: 0, kind: input, shape index: {}]   ;;  %s11558_s1 = inlined_call_operand.vmem [shape: bf16[2,49,192], index: 1, kind: input, shape index: {}]   ;;  %s11559_s2 = inlined_call_operand.vmem [shape: bf16[588,768], index: 2, kind: input, shape index: {}]   ;;  %s11560_s3 = inlined_call_operand.vmem [shape: bf16[192,564], index: 3, kind: input, shape index: {}]   ;;  %s11561_s4 = inlined_call_operand.vmem [shape: f32[1,564], index: 4, kind: input, shape index: {}]   ;;  %s11562_s5 = inlined_call_operand.vmem [shape: bf16[564,768], index: 5, kind: input, shape index: {}]   ;;  %s11563_s6 = inlined_call_operand.vmem [shape: f32[400,65], index: 6, kind: input, shape index: {}]   ;;  %s11564_s7 = inlined_call_operand.vmem [shape: f32[1,768], index: 7, kind: input, shape index: {}]   ;;  %s11565_s8 = inlined_call_operand.vmem [shape: f32[2,400,768], index: 8, kind: output, shape index: {}]  }
   0x1 LB: > { %s6482_s28 = sadd.s32 4294967295, %s8015_s27   ;;  %p6486_p0 = scmp.ge.s32.totalorder %s8015_s27, 1  ;;  %s8015_s27 = sphi %s8064_s27, %s18_s27  }
   0x2   : > { %p272_p1 = scmp.lt.s32.totalorder %s8015_s27, 3 }
   0x4   : > { %p273_p2 = pnand %p6486_p0, %p272_p1 }
   0x6   : > { %276 = sbr.rel (%p273_p2) target bundleno = 1317 (0x525), region = 52 }
   0xb   : > { %v7223_v0 = vld [vmem:[%s11559_s2 + $0x154] ss:$24 sps:$4 sm:$0xff]   ;;  %v7227_v2 = vld [vmem:[%s11559_s2 + $0x150] ss:$24 sps:$4 sm:$0xff]   ;;  %v7229_v4 = vld [vmem:[%s11559_s2 + $0x124] ss:$24 sps:$4 sm:$0xff]  }
   0xc   : > { %v7225_v1 = vld [vmem:[%s11559_s2 + $0x454] ss:$24 sps:$4 sm:$0xff]   ;;  %1707 = vmatprep.subr.bf16.mxu0 %v7223_v0  ;;  %v7228_v3 = vld [vmem:[%s11559_s2 + $0x450] ss:$24 sps:$4 sm:$0xff]   ;;  %v7231_v5 = vld [vmem:[%s11559_s2 + $0x424] ss:$24 sps:$4 sm:$0xff]  }
   0xd   : > { %1750 = vmatprep.subr.bf16.mxu1 %v7225_v1  ;;  %1708 = vmatpush1.bf16.msra.mxu0 %v7227_v2  ;;  %v7233_v6 = vld [vmem:[%s11559_s2 + $0x120] ss:$24 sps:$4 sm:$0xff]   ;;  %v7235_v8 = vld [vmem:[%s11559_s2 + $0xf4] ss:$24 sps:$4 sm:$0xff]   ;;  %v7239_v10 = vld [vmem:[%s11559_s2 + $0xf0] ss:$24 sps:$4 sm:$0xff]  }
   0xe   : > { %1751 = vmatpush1.bf16.msra.mxu1 %v7228_v3  ;;  %1709 = vmatprep.subr.bf16.mxu0 %v7229_v4  ;;  %v7234_v7 = vld [vmem:[%s11559_s2 + $0x420] ss:$24 sps:$4 sm:$0xff]   ;;  %v7237_v9 = vld [vmem:[%s11559_s2 + $0x3f4] ss:$24 sps:$4 sm:$0xff]   ;;  %v7240_v11 = vld [vmem:[%s11559_s2 + $0x3f0] ss:$24 sps:$4 sm:$0xff]  }
   0xf   : > { %1752 = vmatprep.subr.bf16.mxu1 %v7231_v5  ;;  %v7241_v12 = vld [vmem:[%s11559_s2 + $0xc4] ss:$24 sps:$4 sm:$0xff]   ;;  %v7245_v14 = vld [vmem:[%s11559_s2 + $0xc0] ss:$24 sps:$4 sm:$0xff]   ;;  %v7247_v16 = vld [vmem:[%s11559_s2 + $0x94] ss:$24 sps:$4 sm:$0xff]  }
  0x10   : > { %v7243_v13 = vld [vmem:[%s11559_s2 + $0x3c4] ss:$24 sps:$4 sm:$0xff]   ;;  %v7246_v15 = vld [vmem:[%s11559_s2 + $0x3c0] ss:$24 sps:$4 sm:$0xff]   ;;  %v7249_v17 = vld [vmem:[%s11559_s2 + $0x394] ss:$24 sps:$4 sm:$0xff]  }
  0x11   : > { %1710 = vmatpush1.bf16.msra.mxu0 %v7233_v6  ;;  %v7251_v18 = vld [vmem:[%s11559_s2 + $0x90] ss:$24 sps:$4 sm:$0xff]   ;;  %v7253_v20 = vld [vmem:[%s11559_s2 + $0x64] ss:$24 sps:$4 sm:$0xff]   ;;  %v7257_v22 = vld [vmem:[%s11559_s2 + $0x60] ss:$24 sps:$4 sm:$0xff]  }
  0x12   : > { %1753 = vmatpush1.bf16.msra.mxu1 %v7234_v7  ;;  %1711 = vmatprep.subr.bf16.mxu0 %v7235_v8  ;;  %v7252_v19 = vld [vmem:[%s11559_s2 + $0x390] ss:$24 sps:$4 sm:$0xff]   ;;  %v7255_v21 = vld [vmem:[%s11559_s2 + $0x364] ss:$24 sps:$4 sm:$0xff]   ;;  %v7258_v23 = vld [vmem:[%s11559_s2 + $0x360] ss:$24 sps:$4 sm:$0xff]  }
  0x13   : > { %1754 = vmatprep.subr.bf16.mxu1 %v7237_v9  ;;  %v7259_v24 = vld [vmem:[%s11559_s2 + $0x34] ss:$24 sps:$4 sm:$0xff]   ;;  %v7263_v26 = vld [vmem:[%s11559_s2 + $0x30] ss:$24 sps:$4 sm:$0xff]   ;;  %v7265_v28 = vld [vmem:[%s11559_s2 + $0x4] ss:$24 sps:$4 sm:$0xff]  }
  0x14   : > { %v7261_v25 = vld [vmem:[%s11559_s2 + $0x334] ss:$24 sps:$4 sm:$0xff]   ;;  %v7264_v27 = vld [vmem:[%s11559_s2 + $0x330] ss:$24 sps:$4 sm:$0xff]   ;;  %v7267_v29 = vld [vmem:[%s11559_s2 + $0x304] ss:$24 sps:$4 sm:$0xff]  }
  0x15   : > { %1712 = vmatpush1.bf16.msra.mxu0 %v7239_v10  ;;  %v7269_v30 = vld [vmem:[%s11559_s2] ss:$24 sps:$4 sm:$0xff]   ;;  %v7271_v32 = vld [vmem:[%s11559_s2 + $0x2d4] ss:$24 sps:$4 sm:$0xff]   ;;  %p311_p3 = scmp.lt.s32.totalorder %s6482_s28, 1  ;;  %vm1688_vm0 = vcmask 1045504  }
  0x16   : > { %1755 = vmatpush1.bf16.msra.mxu1 %v7240_v11  ;;  %1713 = vmatprep.subr.bf16.mxu0 %v7241_v12  ;;  %v7270_v31 = vld [vmem:[%s11559_s2 + $0x300] ss:$24 sps:$4 sm:$0xff]   ;;  %v7273_v33 = vld [vmem:[%s11559_s2 + $0x5d4] ss:$24 sps:$4 sm:$0xff]   ;;  %v7275_v34 = vld [vmem:[%s11559_s2 + $0x2d0] ss:$24 sps:$4 sm:$0xff]  }
  0x17   : > { %1756 = vmatprep.subr.bf16.mxu1 %v7243_v13  ;;  %v7276_v35 = vld [vmem:[%s11559_s2 + $0x5d0] ss:$24 sps:$4 sm:$0xff]   ;;  %v7277_v36 = vld [vmem:[%s11559_s2 + $0x2a4] ss:$24 sps:$4 sm:$0xff]   ;;  %s11722_s28 = smov (!%p311_p3, %s6482_s28), 1  ;;  %vm1684_vm1 = vcmask 621568  }
  0x18   : > { %v7279_v37 = vld [vmem:[%s11559_s2 + $0x5a4] ss:$24 sps:$4 sm:$0xff]   ;;  %v7281_v38 = vld [vmem:[%s11559_s2 + $0x2a0] ss:$24 sps:$4 sm:$0xff]   ;;  %v7283_v40 = vld [vmem:[%s11559_s2 + $0x274] ss:$24 sps:$4 sm:$0xff]  }
  0x19   : > { %1714 = vmatpush1.bf16.msra.mxu0 %v7245_v14  ;;  %v7282_v39 = vld [vmem:[%s11559_s2 + $0x5a0] ss:$24 sps:$4 sm:$0xff]   ;;  %s7210_s9 = smul.u32 40, %s11722_s28  ;;  %v7285_v41 = vld [vmem:[%s11559_s2 + $0x574] ss:$24 sps:$4 sm:$0xff]   ;;  %vm2545_vm2 = vcmask 523264  }
  0x1a   : > { %1757 = vmatpush1.bf16.msra.mxu1 %v7246_v15  ;;  %1715 = vmatprep.subr.bf16.mxu0 %v7247_v16  ;;  %v7287_v42 = vld [vmem:[%s11559_s2 + $0x270] ss:$24 sps:$4 sm:$0xff]   ;;  %v7289_v44 = vld [vmem:[%s11559_s2 + $0x244] ss:$24 sps:$4 sm:$0xff]   ;;  %v7293_v46 = vld [vmem:[%s11559_s2 + $0x240] ss:$24 sps:$4 sm:$0xff]  }
  0x1b   : > { %1758 = vmatprep.subr.bf16.mxu1 %v7249_v17  ;;  %v7288_v43 = vld [vmem:[%s11559_s2 + $0x570] ss:$24 sps:$4 sm:$0xff]   ;;  %s8217_s20 = scalar_lea.vmem %s11557_s0, %s7210_s9  ;;  %v7291_v45 = vld [vmem:[%s11559_s2 + $0x544] ss:$24 sps:$4 sm:$0xff]   ;;  %v7294_v47 = vld [vmem:[%s11559_s2 + $0x540] ss:$24 sps:$4 sm:$0xff]  }
  0x1c   : > { %v8229_v48 = vld [vmem:[%s8217_s20 + $0x4] ss:$20 sps:$4 sm:$0xff]   ;;  %v7295_v49 = vld [vmem:[%s11559_s2 + $0x214] ss:$24 sps:$4 sm:$0xff]   ;;  %v7299_v52 = vld [vmem:[%s11559_s2 + $0x210] ss:$24 sps:$4 sm:$0xff]  }
  0x1d   : > { %1716 = vmatpush1.bf16.msra.mxu0 %v7251_v18  ;;  %v8235_v50 = vld [vmem:[%s8217_s20 + $0xc] ss:$20 sps:$4 sm:$0xff]   ;;  %1739 = vmatprep.mubr.bf16.mxu0 %v8229_v48  ;;  %v7300_v53 = vld [vmem:[%s11559_s2 + $0x510] ss:$24 sps:$4 sm:$0xff]   ;;  %v7301_v54 = vld [vmem:[%s11559_s2 + $0x1e4] ss:$24 sps:$4 sm:$0xff]  }
  0x1e   : > { %1759 = vmatpush1.bf16.msra.mxu1 %v7252_v19  ;;  %1717 = vmatprep.subr.bf16.mxu0 %v7253_v20  ;;  %v7297_v51 = vld [vmem:[%s11559_s2 + $0x514] ss:$24 sps:$4 sm:$0xff]   ;;  %v7303_v55 = vld [vmem:[%s11559_s2 + $0x4e4] ss:$24 sps:$4 sm:$0xff]   ;;  %v7305_v56 = vld [vmem:[%s11559_s2 + $0x1e0] ss:$24 sps:$4 sm:$0xff]  }
  0x1f   : > { %1760 = vmatprep.subr.bf16.mxu1 %v7255_v21  ;;  %1782 = vmatprep.mubr.bf16.mxu1 %v8235_v50  ;;  %v7306_v57 = vld [vmem:[%s11559_s2 + $0x4e0] ss:$24 sps:$4 sm:$0xff]   ;;  %v7307_v58 = vld [vmem:[%s11559_s2 + $0x1b4] ss:$24 sps:$4 sm:$0xff]   ;;  %v7311_v60 = vld [vmem:[%s11559_s2 + $0x1b0] ss:$24 sps:$4 sm:$0xff]  }
  0x20   : > { %v7309_v59 = vld [vmem:[%s11559_s2 + $0x4b4] ss:$24 sps:$4 sm:$0xff]   ;;  %v7312_v61 = vld [vmem:[%s11559_s2 + $0x4b0] ss:$24 sps:$4 sm:$0xff]   ;;  %v7313_v62 = vld [vmem:[%s11559_s2 + $0x184] ss:$24 sps:$4 sm:$0xff]  }
  0x21   : > { %1718 = vmatpush1.bf16.msra.mxu0 %v7257_v22  ;;  %v7315_v63 = vld [vmem:[%s11559_s2 + $0x484] ss:$24 sps:$4 sm:$0xff]   ;;  %v7317_v0 = vld [vmem:[%s11559_s2 + $0x180] ss:$24 sps:$4 sm:$0xff]   ;;  %v7333_v8 = vld [vmem:[%s11559_s2 + $0x694] ss:$24 sps:$4 sm:$0xff]  }
  0x22   : > { %1761 = vmatpush1.bf16.msra.mxu1 %v7258_v23  ;;  %1719 = vmatprep.subr.bf16.mxu0 %v7259_v24  ;;  %v7318_v1 = vld [vmem:[%s11559_s2 + $0x480] ss:$24 sps:$4 sm:$0xff]   ;;  %v7325_v2 = vld [vmem:[%s11559_s2 + $0x6c4] ss:$24 sps:$4 sm:$0x3f]   ;;  %v8017_v15 = vmov 0  }
  0x23   : > { %1762 = vmatprep.subr.bf16.mxu1 %v7261_v25  ;;  %v7329_v3 = vld [vmem:[%s11559_s2 + $0x15c] ss:$24 sps:$4 sm:$0xff]   ;;  %v7330_v4 = vld [vmem:[%s11559_s2 + $0x6c0] ss:$24 sps:$4 sm:$0x3f]   ;;  %s7211_s18 = smul.u32 56, %s11722_s28 }
  0x24   : > { %v8294_v5 = vld [vmem:[%s8217_s20] ss:$20 sps:$4 sm:$0xff]   ;;  %v8297_v6 = vld [vmem:[%s8217_s20 + $0x8] ss:$20 sps:$4 sm:$0xff]   ;;  %v7327_v7 = vld [vmem:[%s11559_s2 + $0x158] ss:$24 sps:$4 sm:$0xff]  }
  0x25   : > { %1720 = vmatpush1.bf16.msra.mxu0 %v7263_v26  ;;  %v1690_v9 = vsel %vm1688_vm0, %v7330_v4, 0  ;;  %v7336_v10 = vld [vmem:[%s11559_s2 + $0x12c] ss:$24 sps:$4 sm:$0xff]   ;;  %v7331_v11 = vld [vmem:[%s11559_s2 + $0x690] ss:$24 sps:$4 sm:$0xff]   ;;  %s8666_s10 = scalar_lea.vmem %s11558_s1, %s7211_s18  ;;  %vm4110_vm3 = vcmask 1041408  }
  0x26   : > { %1763 = vmatpush1.bf16.msra.mxu1 %v7264_v27  ;;  %1721 = vmatprep.subr.bf16.mxu0 %v7265_v28  ;;  %v7334_v12 = vld [vmem:[%s11559_s2 + $0x128] ss:$24 sps:$4 sm:$0xff]   ;;  %v7339_v13 = vld [vmem:[%s11559_s2 + $0x664] ss:$24 sps:$4 sm:$0xff]   ;;  %v7340_v17 = vld [vmem:[%s11559_s2 + $0xf8] ss:$24 sps:$4 sm:$0xff]  }
  0x27   : > { %1764 = vmatprep.subr.bf16.mxu1 %v7267_v29  ;;  %v7342_v14 = vld [vmem:[%s11559_s2 + $0xfc] ss:$24 sps:$4 sm:$0xff]   ;;  %v7337_v16 = vld [vmem:[%s11559_s2 + $0x660] ss:$24 sps:$4 sm:$0xff]   ;;  %v7348_v19 = vld [vmem:[%s11559_s2 + $0xcc] ss:$24 sps:$4 sm:$0xff]  }
  0x28   : > { %v7345_v18 = vld [vmem:[%s11559_s2 + $0x634] ss:$24 sps:$4 sm:$0xff]   ;;  %v7343_v20 = vld [vmem:[%s11559_s2 + $0x630] ss:$24 sps:$4 sm:$0xff]   ;;  %v7351_v22 = vld [vmem:[%s11559_s2 + $0x604] ss:$24 sps:$4 sm:$0xff]  }
  0x29   : > { %1722 = vmatpush1.bf16.msra.mxu0 %v7269_v30  ;;  %v7346_v21 = vld [vmem:[%s11559_s2 + $0xc8] ss:$24 sps:$4 sm:$0xff]   ;;  %v7354_v23 = vld [vmem:[%s11559_s2 + $0x9c] ss:$24 sps:$4 sm:$0xff]   ;;  %v7352_v25 = vld [vmem:[%s11559_s2 + $0x98] ss:$24 sps:$4 sm:$0xff]  }
  0x2a   : > { %1765 = vmatpush1.bf16.msra.mxu1 %v7270_v31  ;;  %1723 = vmatprep.subr.bf16.mxu0 %v7271_v32  ;;  %v7349_v24 = vld [vmem:[%s11559_s2 + $0x600] ss:$24 sps:$4 sm:$0xff]   ;;  %v7358_v26 = vld [vmem:[%s11559_s2 + $0x6c] ss:$24 sps:$4 sm:$0xff]   ;;  %v7361_v27 = vld [vmem:[%s11559_s2 + $0x45c] ss:$24 sps:$4 sm:$0xff]  }
  0x2b   : > { %1766 = vmatprep.subr.bf16.mxu1 %v7273_v33  ;;  %v8363_v28 = vld [vmem:[%s8217_s20 + $0x10] ss:$20 sps:$4 sm:$0xff]   ;;  %v7356_v29 = vld [vmem:[%s11559_s2 + $0x68] ss:$24 sps:$4 sm:$0xff]   ;;  %v7364_v31 = vld [vmem:[%s11559_s2 + $0x3c] ss:$24 sps:$4 sm:$0xff]  }
  0x2c   : > { %v7359_v30 = vld [vmem:[%s11559_s2 + $0x458] ss:$24 sps:$4 sm:$0xff]   ;;  %v7367_v32 = vld [vmem:[%s11559_s2 + $0x42c] ss:$24 sps:$4 sm:$0xff]   ;;  %v7413_v4 = vld [vmem:[%s11559_s2 + $0x5a8] ss:$24 sps:$4 sm:$0xff]  }
  0x2d   : > { %1724 = vmatpush2.bf16.msra.mxu0 %v7275_v34  ;;  %v7362_v33 = vld [vmem:[%s11559_s2 + $0x38] ss:$24 sps:$4 sm:$0xff]   ;;  %v7365_v34 = vld [vmem:[%s11559_s2 + $0x428] ss:$24 sps:$4 sm:$0xff]   ;;  %vm4097_vm4 = vcmask 424960   ;;  %vm5001_vm5 = vcmask 1040384  }
  0x2e   : > { %1767 = vmatpush2.bf16.msra.mxu1 %v7276_v35  ;;  %1725 = vmatprep.subr.bf16.mxu0 %v7277_v36  ;;  %v7370_v35 = vld [vmem:[%s11559_s2 + $0xc] ss:$24 sps:$4 sm:$0xff]   ;;  %v7373_v36 = vld [vmem:[%s11559_s2 + $0x3fc] ss:$24 sps:$4 sm:$0xff]   ;;  %vm4850_vm6 = vcmask 531456   ;;  %s7212_s19 = smul.u32 2400, %s11722_s28 }
  0x2f   : > { %1768 = vmatprep.subr.bf16.mxu1 %v7279_v37  ;;  %v7368_v37 = vld [vmem:[%s11559_s2 + $0x8] ss:$24 sps:$4 sm:$0xff]  }
  0x30   : > { %s10656_s21 = scalar_lea.vmem %s11565_s8, %s7212_s19 }
  0x31   : > { %1726 = vmatpush2.bf16.msra.mxu0 %v7281_v38  ;;  %v7371_v38 = vld [vmem:[%s11559_s2 + $0x3f8] ss:$24 sps:$4 sm:$0xff]  }
  0x32   : > { %1769 = vmatpush2.bf16.msra.mxu1 %v7282_v39  ;;  %1727 = vmatprep.subr.bf16.mxu0 %v7283_v40  ;;  %v7376_v39 = vld [vmem:[%s11559_s2 + $0x2dc] ss:$24 sps:$4 sm:$0xff]   ;;  %v7379_v40 = vld [vmem:[%s11559_s2 + $0x3cc] ss:$24 sps:$4 sm:$0xff]  }
  0x33   : > { %1770 = vmatprep.subr.bf16.mxu1 %v7285_v41  ;;  %v7374_v41 = vld [vmem:[%s11559_s2 + $0x2d8] ss:$24 sps:$4 sm:$0xff]  }
  0x35   : > { %1728 = vmatpush2.bf16.msra.mxu0 %v7287_v42  ;;  %v7377_v42 = vld [vmem:[%s11559_s2 + $0x3c8] ss:$24 sps:$4 sm:$0xff]  }
  0x36   : > { %1771 = vmatpush2.bf16.msra.mxu1 %v7288_v43  ;;  %1729 = vmatprep.subr.bf16.mxu0 %v7289_v44  ;;  %v7382_v43 = vld [vmem:[%s11559_s2 + $0x2ac] ss:$24 sps:$4 sm:$0xff]   ;;  %v7385_v44 = vld [vmem:[%s11559_s2 + $0x39c] ss:$24 sps:$4 sm:$0xff]  }
  0x37   : > { %1772 = vmatprep.subr.bf16.mxu1 %v7291_v45  ;;  %v7380_v45 = vld [vmem:[%s11559_s2 + $0x2a8] ss:$24 sps:$4 sm:$0xff]  }
  0x39   : > { %1730 = vmatpush2.bf16.msra.mxu0 %v7293_v46  ;;  %v7383_v46 = vld [vmem:[%s11559_s2 + $0x398] ss:$24 sps:$4 sm:$0xff]  }
  0x3a   : > { %1773 = vmatpush2.bf16.msra.mxu1 %v7294_v47  ;;  %1731 = vmatprep.subr.bf16.mxu0 %v7295_v49  ;;  %v7388_v47 = vld [vmem:[%s11559_s2 + $0x27c] ss:$24 sps:$4 sm:$0xff]   ;;  %v7391_v49 = vld [vmem:[%s11559_s2 + $0x36c] ss:$24 sps:$4 sm:$0xff]  }
  0x3b   : > { %1774 = vmatprep.subr.bf16.mxu1 %v7297_v51  ;;  %v7386_v51 = vld [vmem:[%s11559_s2 + $0x278] ss:$24 sps:$4 sm:$0xff]  }
  0x3d   : > { %1732 = vmatpush2.bf16.msra.mxu0 %v7299_v52  ;;  %v7389_v52 = vld [vmem:[%s11559_s2 + $0x368] ss:$24 sps:$4 sm:$0xff]  }
  0x3e   : > { %1775 = vmatpush2.bf16.msra.mxu1 %v7300_v53  ;;  %1733 = vmatprep.subr.bf16.mxu0 %v7301_v54  ;;  %v7394_v53 = vld [vmem:[%s11559_s2 + $0x24c] ss:$24 sps:$4 sm:$0xff]   ;;  %v7397_v54 = vld [vmem:[%s11559_s2 + $0x33c] ss:$24 sps:$4 sm:$0xff]  }
  0x3f   : > { %1776 = vmatprep.subr.bf16.mxu1 %v7303_v55  ;;  %v7392_v55 = vld [vmem:[%s11559_s2 + $0x248] ss:$24 sps:$4 sm:$0xff]  }
  0x41   : > { %1734 = vmatpush2.bf16.msra.mxu0 %v7305_v56  ;;  %v7395_v56 = vld [vmem:[%s11559_s2 + $0x338] ss:$24 sps:$4 sm:$0xff]  }
  0x42   : > { %1777 = vmatpush2.bf16.msra.mxu1 %v7306_v57  ;;  %1735 = vmatprep.subr.bf16.mxu0 %v7307_v58  ;;  %v7400_v57 = vld [vmem:[%s11559_s2 + $0x21c] ss:$24 sps:$4 sm:$0xff]   ;;  %v7403_v58 = vld [vmem:[%s11559_s2 + $0x30c] ss:$24 sps:$4 sm:$0xff]  }
  0x43   : > { %1778 = vmatprep.subr.bf16.mxu1 %v7309_v59  ;;  %v7398_v59 = vld [vmem:[%s11559_s2 + $0x218] ss:$24 sps:$4 sm:$0xff]  }
  0x45   : > { %1736 = vmatpush2.bf16.msra.mxu0 %v7311_v60  ;;  %v7401_v60 = vld [vmem:[%s11559_s2 + $0x308] ss:$24 sps:$4 sm:$0xff]  }
  0x46   : > { %1779 = vmatpush2.bf16.msra.mxu1 %v7312_v61  ;;  %1737 = vmatprep.subr.bf16.mxu0 %v7313_v62  ;;  %v7406_v61 = vld [vmem:[%s11559_s2 + $0x1ec] ss:$24 sps:$4 sm:$0xff]   ;;  %v7409_v62 = vld [vmem:[%s11559_s2 + $0x5dc] ss:$24 sps:$4 sm:$0xff]  }
  0x47   : > { %1780 = vmatprep.subr.bf16.mxu1 %v7315_v63  ;;  %v7404_v63 = vld [vmem:[%s11559_s2 + $0x1e8] ss:$24 sps:$4 sm:$0xff]  }
  0x49   : > { %1738 = vmatpush2.bf16.msra.mxu0 %v7317_v0  ;;  %v7407_v0 = vld [vmem:[%s11559_s2 + $0x5d8] ss:$24 sps:$4 sm:$0xff]  }
  0x4a   : > { %1781 = vmatpush2.bf16.msra.mxu1 %v7318_v1  ;;  %6717 = vmatprep.subr.msk.bf16.mxu0 %vm1688_vm0, %v7325_v2  ;;  %v7412_v1 = vld [vmem:[%s11559_s2 + $0x1bc] ss:$24 sps:$4 sm:$0xff]   ;;  %v7415_v2 = vld [vmem:[%s11559_s2 + $0x5ac] ss:$24 sps:$4 sm:$0xff]  }
  0x4b   : > { %1836 = vmatprep.subr.bf16.mxu1 %v7329_v3  ;;  %v7410_v3 = vld [vmem:[%s11559_s2 + $0x1b8] ss:$24 sps:$4 sm:$0xff]  }
  0x4c   : > { %1740 = vmatmul.mubr.bf16.vlgmr.msra.gmra.mxu0 %v8294_v5 }
  0x4d   : > { %1783 = vmatmul.mubr.bf16.vlgmr.msra.gmra.mxu1 %v8297_v6  ;;  %1800 = vmatpush1.bf16.msra.mxu0 %v1690_v9  ;;  %v7416_v9 = vld [vmem:[%s11559_s2 + $0x188] ss:$24 sps:$4 sm:$0xff]  }
  0x4e   : > { %1837 = vmatpush1.bf16.msra.mxu1 %v7327_v7  ;;  %1801 = vmatprep.subr.bf16.mxu0 %v7333_v8  ;;  %v7418_v7 = vld [vmem:[%s11559_s2 + $0x18c] ss:$24 sps:$4 sm:$0xff]   ;;  %v7421_v8 = vld [vmem:[%s11559_s2 + $0x57c] ss:$24 sps:$4 sm:$0xff]  }
  0x4f   : > { %1838 = vmatprep.subr.bf16.mxu1 %v7336_v10  ;;  %1825 = vmatprep.mubr.bf16.mxu0 %v8017_v15  ;;  %v7419_v10 = vld [vmem:[%s11559_s2 + $0x578] ss:$24 sps:$4 sm:$0xff]  }
  0x50   : > { %1868 = vmatprep.mubr.bf16.mxu1 %v8229_v48 }
  0x51   : > { %1802 = vmatpush1.bf16.msra.mxu0 %v7331_v11  ;;  %v7424_v11 = vld [vmem:[%s11559_s2 + $0x54c] ss:$24 sps:$4 sm:$0xff]  }
  0x52   : > { %1839 = vmatpush1.bf16.msra.mxu1 %v7334_v12  ;;  %1803 = vmatprep.subr.bf16.mxu0 %v7339_v13  ;;  %v7425_v12 = vld [vmem:[%s11559_s2 + $0x6cc] ss:$24 sps:$4 sm:$0x3f]   ;;  %v7427_v13 = vld [vmem:[%s11559_s2 + $0x6c8] ss:$24 sps:$4 sm:$0x3f]  }
  0x53   : > { %1840 = vmatprep.subr.bf16.mxu1 %v7342_v14  ;;  %v7422_v14 = vld [vmem:[%s11559_s2 + $0x548] ss:$24 sps:$4 sm:$0xff]  }
  0x55   : > { %1804 = vmatpush1.bf16.msra.mxu0 %v7337_v16  ;;  %v7430_v16 = vld [vmem:[%s11559_s2 + $0x51c] ss:$24 sps:$4 sm:$0xff]  }
  0x56   : > { %1841 = vmatpush1.bf16.msra.mxu1 %v7340_v17  ;;  %1805 = vmatprep.subr.bf16.mxu0 %v7345_v18  ;;  %v1696_v17 = vsel %vm1688_vm0, %v7427_v13, 0  ;;  %v7433_v18 = vld [vmem:[%s11559_s2 + $0x69c] ss:$24 sps:$4 sm:$0xff]  }
  0x57   : > { %1842 = vmatprep.subr.bf16.mxu1 %v7348_v19  ;;  %v7428_v19 = vld [vmem:[%s11559_s2 + $0x518] ss:$24 sps:$4 sm:$0xff]   ;;  %v7520_v13 = vld [vmem:[%s11559_s2 + $0x254] ss:$24 sps:$4 sm:$0xff]  }
  0x59   : > { %1806 = vmatpush1.bf16.msra.mxu0 %v7343_v20  ;;  %v7431_v20 = vld [vmem:[%s11559_s2 + $0x698] ss:$24 sps:$4 sm:$0xff]  }
  0x5a   : > { %1843 = vmatpush1.bf16.msra.mxu1 %v7346_v21  ;;  %1807 = vmatprep.subr.bf16.mxu0 %v7351_v22  ;;  %v7436_v21 = vld [vmem:[%s11559_s2 + $0x4ec] ss:$24 sps:$4 sm:$0xff]   ;;  %v7434_v22 = vld [vmem:[%s11559_s2 + $0x4e8] ss:$24 sps:$4 sm:$0xff]  }
  0x5b   : > { %1844 = vmatprep.subr.bf16.mxu1 %v7354_v23  ;;  %v7437_v23 = vld [vmem:[%s11559_s2 + $0x668] ss:$24 sps:$4 sm:$0xff]  }
  0x5d   : > { %1808 = vmatpush1.bf16.msra.mxu0 %v7349_v24  ;;  %v7442_v24 = vld [vmem:[%s11559_s2 + $0x4bc] ss:$24 sps:$4 sm:$0xff]  }
  0x5e   : > { %1845 = vmatpush1.bf16.msra.mxu1 %v7352_v25  ;;  %1879 = vmatprep.subr.bf16.mxu0 %v7361_v27  ;;  %v7445_v25 = vld [vmem:[%s11559_s2 + $0x63c] ss:$24 sps:$4 sm:$0xff]   ;;  %v7443_v27 = vld [vmem:[%s11559_s2 + $0x638] ss:$24 sps:$4 sm:$0xff]  }
  0x5f   : > { %1846 = vmatprep.subr.bf16.mxu1 %v7358_v26  ;;  %v7440_v26 = vld [vmem:[%s11559_s2 + $0x4b8] ss:$24 sps:$4 sm:$0xff]  }
  0x60   : > { %6718 = vmatmul.mubr.msk.bf16.vlgmr.msra.gmra.mxu0 %vm1684_vm1, %v8363_v28 }
  0x61   : > { %1880 = vmatpush1.bf16.msra.mxu0 %v7359_v30  ;;  %1911 = vmatprep.mubr.bf16.mxu0 %v8235_v50  ;;  %v7451_v30 = vld [vmem:[%s11559_s2 + $0x60c] ss:$24 sps:$4 sm:$0xff]  }
  0x62   : > { %1847 = vmatpush1.bf16.msra.mxu1 %v7356_v29  ;;  %1881 = vmatprep.subr.bf16.mxu0 %v7367_v32  ;;  %v7448_v29 = vld [vmem:[%s11559_s2 + $0x48c] ss:$24 sps:$4 sm:$0xff]   ;;  %v7449_v32 = vld [vmem:[%s11559_s2 + $0x608] ss:$24 sps:$4 sm:$0xff]  }
  0x63   : > { %1848 = vmatprep.subr.bf16.mxu1 %v7364_v31  ;;  %v7446_v31 = vld [vmem:[%s11559_s2 + $0x488] ss:$24 sps:$4 sm:$0xff]  }
  0x65   : > { %1882 = vmatpush1.bf16.msra.mxu0 %v7365_v34  ;;  %v7457_v34 = vld [vmem:[%s11559_s2 + $0x464] ss:$24 sps:$4 sm:$0xff]  }
  0x66   : > { %1849 = vmatpush1.bf16.msra.mxu1 %v7362_v33  ;;  %1883 = vmatprep.subr.bf16.mxu0 %v7373_v36  ;;  %v7454_v33 = vld [vmem:[%s11559_s2 + $0x164] ss:$24 sps:$4 sm:$0xff]   ;;  %v7455_v36 = vld [vmem:[%s11559_s2 + $0x460] ss:$24 sps:$4 sm:$0xff]  }
  0x67   : > { %1850 = vmatprep.subr.bf16.mxu1 %v7370_v35  ;;  %v7452_v35 = vld [vmem:[%s11559_s2 + $0x160] ss:$24 sps:$4 sm:$0xff]  }
  0x69   : > { %1884 = vmatpush1.bf16.msra.mxu0 %v7371_v38  ;;  %v7463_v38 = vld [vmem:[%s11559_s2 + $0x434] ss:$24 sps:$4 sm:$0xff]  }
  0x6a   : > { %1851 = vmatpush1.bf16.msra.mxu1 %v7368_v37  ;;  %1885 = vmatprep.subr.bf16.mxu0 %v7379_v40  ;;  %v7460_v37 = vld [vmem:[%s11559_s2 + $0x134] ss:$24 sps:$4 sm:$0xff]   ;;  %v7461_v40 = vld [vmem:[%s11559_s2 + $0x430] ss:$24 sps:$4 sm:$0xff]  }
  0x6b   : > { %1852 = vmatprep.subr.bf16.mxu1 %v7376_v39  ;;  %v7458_v39 = vld [vmem:[%s11559_s2 + $0x130] ss:$24 sps:$4 sm:$0xff]  }
  0x6d   : > { %1886 = vmatpush1.bf16.msra.mxu0 %v7377_v42  ;;  %v7467_v42 = vld [vmem:[%s11559_s2 + $0x400] ss:$24 sps:$4 sm:$0xff]  }
  0x6e   : > { %1853 = vmatpush2.bf16.msra.mxu1 %v7374_v41  ;;  %1887 = vmatprep.subr.bf16.mxu0 %v7385_v44  ;;  %v7466_v41 = vld [vmem:[%s11559_s2 + $0x104] ss:$24 sps:$4 sm:$0xff]   ;;  %v7473_v44 = vld [vmem:[%s11559_s2 + $0x3d0] ss:$24 sps:$4 sm:$0xff]  }
  0x6f   : > { %1854 = vmatprep.subr.bf16.mxu1 %v7382_v43  ;;  %v7472_v43 = vld [vmem:[%s11559_s2 + $0xd4] ss:$24 sps:$4 sm:$0xff]  }
  0x71   : > { %1888 = vmatpush1.bf16.msra.mxu0 %v7383_v46  ;;  %v7481_v46 = vld [vmem:[%s11559_s2 + $0x3a4] ss:$24 sps:$4 sm:$0xff]  }
  0x72   : > { %1855 = vmatpush2.bf16.msra.mxu1 %v7380_v45  ;;  %1889 = vmatprep.subr.bf16.mxu0 %v7391_v49  ;;  %v7478_v45 = vld [vmem:[%s11559_s2 + $0xa4] ss:$24 sps:$4 sm:$0xff]   ;;  %v7479_v49 = vld [vmem:[%s11559_s2 + $0x3a0] ss:$24 sps:$4 sm:$0xff]  }
  0x73   : > { %1856 = vmatprep.subr.bf16.mxu1 %v7388_v47  ;;  %v7476_v47 = vld [vmem:[%s11559_s2 + $0xa0] ss:$24 sps:$4 sm:$0xff]  }
  0x75   : > { %1890 = vmatpush1.bf16.msra.mxu0 %v7389_v52  ;;  %v7487_v52 = vld [vmem:[%s11559_s2 + $0x374] ss:$24 sps:$4 sm:$0xff]  }
  0x76   : > { %1857 = vmatpush2.bf16.msra.mxu1 %v7386_v51  ;;  %1891 = vmatprep.subr.bf16.mxu0 %v7397_v54  ;;  %v7484_v51 = vld [vmem:[%s11559_s2 + $0x74] ss:$24 sps:$4 sm:$0xff]   ;;  %v7485_v54 = vld [vmem:[%s11559_s2 + $0x370] ss:$24 sps:$4 sm:$0xff]  }
  0x77   : > { %1858 = vmatprep.subr.bf16.mxu1 %v7394_v53  ;;  %v7482_v53 = vld [vmem:[%s11559_s2 + $0x70] ss:$24 sps:$4 sm:$0xff]  }
  0x79   : > { %1892 = vmatpush1.bf16.msra.mxu0 %v7395_v56  ;;  %v7493_v56 = vld [vmem:[%s11559_s2 + $0x344] ss:$24 sps:$4 sm:$0xff]  }
  0x7a   : > { %1859 = vmatpush2.bf16.msra.mxu1 %v7392_v55  ;;  %1893 = vmatprep.subr.bf16.mxu0 %v7403_v58  ;;  %v7490_v55 = vld [vmem:[%s11559_s2 + $0x44] ss:$24 sps:$4 sm:$0xff]   ;;  %v7491_v58 = vld [vmem:[%s11559_s2 + $0x340] ss:$24 sps:$4 sm:$0xff]  }
  0x7b   : > { %1860 = vmatprep.subr.bf16.mxu1 %v7400_v57  ;;  %v7488_v57 = vld [vmem:[%s11559_s2 + $0x40] ss:$24 sps:$4 sm:$0xff]  }
  0x7d   : > { %1894 = vmatpush1.bf16.msra.mxu0 %v7401_v60  ;;  %v7499_v60 = vld [vmem:[%s11559_s2 + $0x314] ss:$24 sps:$4 sm:$0xff]  }
  0x7e   : > { %1861 = vmatpush2.bf16.msra.mxu1 %v7398_v59  ;;  %1895 = vmatprep.subr.bf16.mxu0 %v7409_v62  ;;  %v7496_v59 = vld [vmem:[%s11559_s2 + $0x14] ss:$24 sps:$4 sm:$0xff]   ;;  %v7497_v62 = vld [vmem:[%s11559_s2 + $0x310] ss:$24 sps:$4 sm:$0xff]  }
  0x7f   : > { %1862 = vmatprep.subr.bf16.mxu1 %v7406_v61  ;;  %v7494_v61 = vld [vmem:[%s11559_s2 + $0x10] ss:$24 sps:$4 sm:$0xff]  }
  0x81   : > { %1896 = vmatpush2.bf16.msra.mxu0 %v7407_v0  ;;  %v7505_v0 = vld [vmem:[%s11559_s2 + $0x5e4] ss:$24 sps:$4 sm:$0xff]  }
  0x82   : > { %1863 = vmatpush2.bf16.msra.mxu1 %v7404_v63  ;;  %1897 = vmatprep.subr.bf16.mxu0 %v7415_v2  ;;  %v7502_v63 = vld [vmem:[%s11559_s2 + $0x2e4] ss:$24 sps:$4 sm:$0xff]   ;;  %v7503_v2 = vld [vmem:[%s11559_s2 + $0x5e0] ss:$24 sps:$4 sm:$0xff]  }
  0x83   : > { %1864 = vmatprep.subr.bf16.mxu1 %v7412_v1  ;;  %v7500_v1 = vld [vmem:[%s11559_s2 + $0x2e0] ss:$24 sps:$4 sm:$0xff]  }
  0x85   : > { %1898 = vmatpush2.bf16.msra.mxu0 %v7413_v4  ;;  %v7511_v4 = vld [vmem:[%s11559_s2 + $0x5b4] ss:$24 sps:$4 sm:$0xff]  }
  0x86   : > { %1865 = vmatpush2.bf16.msra.mxu1 %v7410_v3  ;;  %1899 = vmatprep.subr.bf16.mxu0 %v7421_v8  ;;  %v7508_v3 = vld [vmem:[%s11559_s2 + $0x2b4] ss:$24 sps:$4 sm:$0xff]   ;;  %v7509_v8 = vld [vmem:[%s11559_s2 + $0x5b0] ss:$24 sps:$4 sm:$0xff]  }
  0x87   : > { %1866 = vmatprep.subr.bf16.mxu1 %v7418_v7  ;;  %v7506_v7 = vld [vmem:[%s11559_s2 + $0x2b0] ss:$24 sps:$4 sm:$0xff]  }
  0x89   : > { %1900 = vmatpush2.bf16.msra.mxu0 %v7419_v10  ;;  %v7517_v10 = vld [vmem:[%s11559_s2 + $0x584] ss:$24 sps:$4 sm:$0xff]  }
  0x8a   : > { %1867 = vmatpush2.bf16.msra.mxu1 %v7416_v9  ;;  %1901 = vmatprep.subr.bf16.mxu0 %v7424_v11  ;;  %v7514_v9 = vld [vmem:[%s11559_s2 + $0x284] ss:$24 sps:$4 sm:$0xff]   ;;  %v7512_v11 = vld [vmem:[%s11559_s2 + $0x280] ss:$24 sps:$4 sm:$0xff]  }
  0x8b   : > { %6719 = vmatprep.subr.msk.bf16.mxu1 %vm1688_vm0, %v7425_v12  ;;  %v7515_v12 = vld [vmem:[%s11559_s2 + $0x580] ss:$24 sps:$4 sm:$0xff]  }
  0x8d   : > { %1869 = vmatmul.mubr.bf16.vlgmr.msra.gmra.mxu1 %v8294_v5  ;;  %1902 = vmatpush2.bf16.msra.mxu0 %v7422_v14  ;;  %v7439_v5 = vld [vmem:[%s11559_s2 + $0x66c] ss:$24 sps:$4 sm:$0xff]  }
  0x8e   : > { %1929 = vmatpush1.bf16.msra.mxu1 %v1696_v17  ;;  %1903 = vmatprep.subr.bf16.mxu0 %v7430_v16  ;;  %v7523_v14 = vld [vmem:[%s11559_s2 + $0x554] ss:$24 sps:$4 sm:$0xff]   ;;  %v7518_v16 = vld [vmem:[%s11559_s2 + $0x250] ss:$24 sps:$4 sm:$0xff]  }
  0x8f   : > { %1930 = vmatprep.subr.bf16.mxu1 %v7433_v18  ;;  %1954 = vmatprep.mubr.bf16.mxu1 %v8017_v15  ;;  %v7521_v17 = vld [vmem:[%s11559_s2 + $0x550] ss:$24 sps:$4 sm:$0xff]   ;;  %v7526_v18 = vld [vmem:[%s11559_s2 + $0x224] ss:$24 sps:$4 sm:$0xff]  }
  0x91   : > { %1904 = vmatpush2.bf16.msra.mxu0 %v7428_v19  ;;  %v7529_v19 = vld [vmem:[%s11559_s2 + $0x524] ss:$24 sps:$4 sm:$0xff]  }
  0x92   : > { %1931 = vmatpush1.bf16.msra.mxu1 %v7431_v20  ;;  %1905 = vmatprep.subr.bf16.mxu0 %v7436_v21  ;;  %v7524_v20 = vld [vmem:[%s11559_s2 + $0x220] ss:$24 sps:$4 sm:$0xff]  }
  0x93   : > { %1932 = vmatprep.subr.bf16.mxu1 %v7439_v5  ;;  %v7527_v21 = vld [vmem:[%s11559_s2 + $0x520] ss:$24 sps:$4 sm:$0xff]   ;;  %v7532_v5 = vld [vmem:[%s11559_s2 + $0x1f4] ss:$24 sps:$4 sm:$0xff]  }
  0x95   : > { %1906 = vmatpush2.bf16.msra.mxu0 %v7434_v22  ;;  %v7535_v22 = vld [vmem:[%s11559_s2 + $0x4f4] ss:$24 sps:$4 sm:$0xff]  }
  0x96   : > { %1933 = vmatpush1.bf16.msra.mxu1 %v7437_v23  ;;  %1907 = vmatprep.subr.bf16.mxu0 %v7442_v24  ;;  %v7530_v23 = vld [vmem:[%s11559_s2 + $0x1f0] ss:$24 sps:$4 sm:$0xff]  }
  0x97   : > { %1934 = vmatprep.subr.bf16.mxu1 %v7445_v25  ;;  %v7533_v24 = vld [vmem:[%s11559_s2 + $0x4f0] ss:$24 sps:$4 sm:$0xff]   ;;  %v7538_v25 = vld [vmem:[%s11559_s2 + $0x1c4] ss:$24 sps:$4 sm:$0xff]  }
  0x99   : > { %1908 = vmatpush2.bf16.msra.mxu0 %v7440_v26  ;;  %v7541_v26 = vld [vmem:[%s11559_s2 + $0x4c4] ss:$24 sps:$4 sm:$0xff]  }
  0x9a   : > { %1935 = vmatpush1.bf16.msra.mxu1 %v7443_v27  ;;  %1909 = vmatprep.subr.bf16.mxu0 %v7448_v29  ;;  %v7536_v27 = vld [vmem:[%s11559_s2 + $0x1c0] ss:$24 sps:$4 sm:$0xff]  }
  0x9b   : > { %1936 = vmatprep.subr.bf16.mxu1 %v7451_v30  ;;  %v7539_v29 = vld [vmem:[%s11559_s2 + $0x4c0] ss:$24 sps:$4 sm:$0xff]   ;;  %v7544_v30 = vld [vmem:[%s11559_s2 + $0x194] ss:$24 sps:$4 sm:$0xff]  }
  0x9d   : > { %1910 = vmatpush2.bf16.msra.mxu0 %v7446_v31  ;;  %v7547_v31 = vld [vmem:[%s11559_s2 + $0x494] ss:$24 sps:$4 sm:$0xff]  }
  0x9e   : > { %1937 = vmatpush1.bf16.msra.mxu1 %v7449_v32  ;;  %1965 = vmatprep.subr.bf16.mxu0 %v7454_v33  ;;  %v7542_v32 = vld [vmem:[%s11559_s2 + $0x190] ss:$24 sps:$4 sm:$0xff]  }
  0x9f   : > { %2008 = vmatprep.subr.bf16.mxu1 %v7457_v34  ;;  %v7545_v33 = vld [vmem:[%s11559_s2 + $0x490] ss:$24 sps:$4 sm:$0xff]   ;;  %v7548_v34 = vld [vmem:[%s11559_s2 + $0x6d4] ss:$24 sps:$4 sm:$0x3f]  }
  0xa0   : > { %1912 = vmatmul.mubr.bf16.vlgmr.msra.gmra.mxu0 %v8297_v6  ;;  %v7469_v6 = vld [vmem:[%s11559_s2 + $0x404] ss:$24 sps:$4 sm:$0xff]  }
  0xa1   : > { %6720 = vmatmul.mubr.msk.bf16.vlgmr.msra.gmra.mxu1 %vm1684_vm1, %v8363_v28  ;;  %1966 = vmatpush1.bf16.msra.mxu0 %v7452_v35  ;;  %v7464_v28 = vld [vmem:[%s11559_s2 + $0x100] ss:$24 sps:$4 sm:$0xff]   ;;  %v7552_v35 = vld [vmem:[%s11560_s3 + $0x11c] ss:$20 sps:$4 sm:$0xff]  }
  0xa2   : > { %2009 = vmatpush1.bf16.msra.mxu1 %v7455_v36  ;;  %1967 = vmatprep.subr.bf16.mxu0 %v7460_v37  ;;  %v7553_v36 = vld [vmem:[%s11559_s2 + $0x6d0] ss:$24 sps:$4 sm:$0x3f]   ;;  %v7550_v37 = vld [vmem:[%s11560_s3 + $0x118] ss:$20 sps:$4 sm:$0xff]  }
  0xa3   : > { %2010 = vmatprep.subr.bf16.mxu1 %v7463_v38  ;;  %1997 = vmatprep.mubr.bf16.mxu0 %v8229_v48  ;;  %v7475_v48 = vld [vmem:[%s11559_s2 + $0x3d4] ss:$24 sps:$4 sm:$0xff]   ;;  %v7556_v38 = vld [vmem:[%s11559_s2 + $0x6a4] ss:$24 sps:$4 sm:$0xff]  }
  0xa4   : > { %2040 = vmatprep.mubr.bf16.mxu1 %v8235_v50  ;;  %v7470_v50 = vld [vmem:[%s11559_s2 + $0xd0] ss:$24 sps:$4 sm:$0xff]  }
  0xa5   : > { %1968 = vmatpush1.bf16.msra.mxu0 %v7458_v39  ;;  %v7559_v39 = vld [vmem:[%s11560_s3 + $0xf4] ss:$20 sps:$4 sm:$0xff]  }
  0xa6   : > { %2011 = vmatpush1.bf16.msra.mxu1 %v7461_v40  ;;  %1969 = vmatprep.subr.bf16.mxu0 %v7466_v41  ;;  %v8780_v40 = vld [vmem:[%s8666_s10 + $0x4] ss:$8 sps:$4 sm:$0xff]   ;;  %v1702_v41 = vsel %vm1688_vm0, %v7553_v36, 0  ;;  %v7630_v36 = vld [vmem:[%s11560_s3 + $0x100] ss:$20 sps:$4 sm:$0xff]  }
  0xa7   : > { %2012 = vmatprep.subr.bf16.mxu1 %v7469_v6  ;;  %v7554_v6 = vld [vmem:[%s11559_s2 + $0x6a0] ss:$24 sps:$4 sm:$0xff]  }
  0xa9   : > { %1970 = vmatpush1.bf16.msra.mxu0 %v7464_v28  ;;  %v7557_v28 = vld [vmem:[%s11560_s3 + $0xf0] ss:$20 sps:$4 sm:$0xff]  }
  0xaa   : > { %2013 = vmatpush1.bf16.msra.mxu1 %v7467_v42  ;;  %1971 = vmatprep.subr.bf16.mxu0 %v7472_v43  ;;  %v7979_v42 = vld [vmem:[%s8217_s20] ss:$20 sps:$4 sm:$0xff]   ;;  %v7980_v43 = vld [vmem:[%s8217_s20 + $0x8] ss:$20 sps:$4 sm:$0xff]  }
  0xab   : > { %2014 = vmatprep.subr.bf16.mxu1 %v7475_v48  ;;  %v7562_v48 = vld [vmem:[%s11559_s2 + $0x674] ss:$24 sps:$4 sm:$0xff]  }
  0xad   : > { %1972 = vmatpush1.bf16.msra.mxu0 %v7470_v50  ;;  %v7565_v50 = vld [vmem:[%s11560_s3 + $0xcc] ss:$20 sps:$4 sm:$0xff]  }
  0xae   : > { %2015 = vmatpush1.bf16.msra.mxu1 %v7473_v44  ;;  %1973 = vmatprep.subr.bf16.mxu0 %v7478_v45  ;;  %v7560_v44 = vld [vmem:[%s11559_s2 + $0x670] ss:$24 sps:$4 sm:$0xff]  }
  0xaf   : > { %2016 = vmatprep.subr.bf16.mxu1 %v7481_v46  ;;  %v7563_v45 = vld [vmem:[%s11560_s3 + $0xc8] ss:$20 sps:$4 sm:$0xff]  }
  0xb0   : > { %v7568_v46 = vld [vmem:[%s11559_s2 + $0x644] ss:$24 sps:$4 sm:$0xff]  }
  0xb1   : > { %1974 = vmatpush1.bf16.msra.mxu0 %v7476_v47  ;;  %v7571_v47 = vld [vmem:[%s11560_s3 + $0xa4] ss:$20 sps:$4 sm:$0xff]  }
  0xb2   : > { %2017 = vmatpush1.bf16.msra.mxu1 %v7479_v49  ;;  %1975 = vmatprep.subr.bf16.mxu0 %v7484_v51  ;;  %v7566_v49 = vld [vmem:[%s11559_s2 + $0x640] ss:$24 sps:$4 sm:$0xff]  }
  0xb3   : > { %2018 = vmatprep.subr.bf16.mxu1 %v7487_v52  ;;  %v7569_v51 = vld [vmem:[%s11560_s3 + $0xa0] ss:$20 sps:$4 sm:$0xff]  }
  0xb4   : > { %v7574_v52 = vld [vmem:[%s11559_s2 + $0x614] ss:$24 sps:$4 sm:$0xff]  }
  0xb5   : > { %1976 = vmatpush1.bf16.msra.mxu0 %v7482_v53  ;;  %v7577_v53 = vld [vmem:[%s11560_s3 + $0x7c] ss:$20 sps:$4 sm:$0xff]  }
  0xb6   : > { %2019 = vmatpush1.bf16.msra.mxu1 %v7485_v54  ;;  %1977 = vmatprep.subr.bf16.mxu0 %v7490_v55  ;;  %v7572_v54 = vld [vmem:[%s11559_s2 + $0x610] ss:$24 sps:$4 sm:$0xff]   ;;  %v7575_v55 = vld [vmem:[%s11560_s3 + $0x78] ss:$20 sps:$4 sm:$0xff]  }
  0xb7   : > { %2020 = vmatprep.subr.bf16.mxu1 %v7493_v56  ;;  %v7580_v56 = vld [vmem:[%s11560_s3 + $0x54] ss:$20 sps:$4 sm:$0xff]  }
  0xb9   : > { %1978 = vmatpush1.bf16.msra.mxu0 %v7488_v57  ;;  %v7583_v57 = vld [vmem:[%s11560_s3 + $0x124] ss:$20 sps:$4 sm:$0xff]  }
  0xba   : > { %2021 = vmatpush1.bf16.msra.mxu1 %v7491_v58  ;;  %1979 = vmatprep.subr.bf16.mxu0 %v7496_v59  ;;  %v7578_v58 = vld [vmem:[%s11560_s3 + $0x50] ss:$20 sps:$4 sm:$0xff]   ;;  %v7581_v59 = vld [vmem:[%s11560_s3 + $0x120] ss:$20 sps:$4 sm:$0xff]  }
  0xbb   : > { %2022 = vmatprep.subr.bf16.mxu1 %v7499_v60  ;;  %v7586_v60 = vld [vmem:[%s11560_s3 + $0x2c] ss:$20 sps:$4 sm:$0xff]  }
  0xbd   : > { %1980 = vmatpush1.bf16.msra.mxu0 %v7494_v61  ;;  %v7589_v61 = vld [vmem:[%s11560_s3 + $0xfc] ss:$20 sps:$4 sm:$0xff]  }
  0xbe   : > { %2023 = vmatpush1.bf16.msra.mxu1 %v7497_v62  ;;  %1981 = vmatprep.subr.bf16.mxu0 %v7502_v63  ;;  %v7584_v62 = vld [vmem:[%s11560_s3 + $0x28] ss:$20 sps:$4 sm:$0xff]   ;;  %v7587_v63 = vld [vmem:[%s11560_s3 + $0xf8] ss:$20 sps:$4 sm:$0xff]  }
  0xbf   : > { %2024 = vmatprep.subr.bf16.mxu1 %v7505_v0  ;;  %v7981_v0 = vld [vmem:[%s8217_s20 + $0x10] ss:$20 sps:$4 sm:$0xff]  }
  0xc1   : > { %1982 = vmatpush2.bf16.msra.mxu0 %v7500_v1  ;;  %v7592_v1 = vld [vmem:[%s11560_s3 + $0x4] ss:$20 sps:$4 sm:$0xff]  }
  0xc2   : > { %2025 = vmatpush2.bf16.msra.mxu1 %v7503_v2  ;;  %1983 = vmatprep.subr.bf16.mxu0 %v7508_v3  ;;  %v7595_v2 = vld [vmem:[%s11560_s3 + $0xd4] ss:$20 sps:$4 sm:$0xff]  }
  0xc3   : > { %2026 = vmatprep.subr.bf16.mxu1 %v7511_v4  ;;  %v7590_v3 = vld [vmem:[%s11560_s3] ss:$20 sps:$4 sm:$0xff]   ;;  %v7593_v4 = vld [vmem:[%s11560_s3 + $0xd0] ss:$20 sps:$4 sm:$0xff]  }
  0xc5   : > { %1984 = vmatpush2.bf16.msra.mxu0 %v7506_v7  ;;  %v7598_v7 = vld [vmem:[%s11560_s3 + $0x1bc] ss:$20 sps:$4 sm:$0xff]  }
  0xc6   : > { %2027 = vmatpush2.bf16.msra.mxu1 %v7509_v8  ;;  %1985 = vmatprep.subr.bf16.mxu0 %v7514_v9  ;;  %v7601_v8 = vld [vmem:[%s11560_s3 + $0xac] ss:$20 sps:$4 sm:$0xff]  }
  0xc7   : > { %2028 = vmatprep.subr.bf16.mxu1 %v7517_v10  ;;  %v7596_v9 = vld [vmem:[%s11560_s3 + $0x1b8] ss:$20 sps:$4 sm:$0xff]   ;;  %v7599_v10 = vld [vmem:[%s11560_s3 + $0xa8] ss:$20 sps:$4 sm:$0xff]  }
  0xc9   : > { %1986 = vmatpush2.bf16.msra.mxu0 %v7512_v11  ;;  %v7604_v11 = vld [vmem:[%s11560_s3 + $0x194] ss:$20 sps:$4 sm:$0xff]  }
  0xca   : > { %2029 = vmatpush2.bf16.msra.mxu1 %v7515_v12  ;;  %1987 = vmatprep.subr.bf16.mxu0 %v7520_v13  ;;  %v7607_v12 = vld [vmem:[%s11560_s3 + $0x84] ss:$20 sps:$4 sm:$0xff]  }
  0xcb   : > { %2030 = vmatprep.subr.bf16.mxu1 %v7523_v14  ;;  %v7602_v13 = vld [vmem:[%s11560_s3 + $0x190] ss:$20 sps:$4 sm:$0xff]   ;;  %v7605_v14 = vld [vmem:[%s11560_s3 + $0x80] ss:$20 sps:$4 sm:$0xff]  }
  0xcd   : > { %1988 = vmatpush2.bf16.msra.mxu0 %v7518_v16  ;;  %v7610_v16 = vld [vmem:[%s11560_s3 + $0x16c] ss:$20 sps:$4 sm:$0xff]  }
  0xce   : > { %2031 = vmatpush2.bf16.msra.mxu1 %v7521_v17  ;;  %1989 = vmatprep.subr.bf16.mxu0 %v7526_v18  ;;  %v7613_v17 = vld [vmem:[%s11560_s3 + $0x5c] ss:$20 sps:$4 sm:$0xff]  }
  0xcf   : > { %2032 = vmatprep.subr.bf16.mxu1 %v7529_v19  ;;  %v7608_v18 = vld [vmem:[%s11560_s3 + $0x168] ss:$20 sps:$4 sm:$0xff]   ;;  %v7611_v19 = vld [vmem:[%s11560_s3 + $0x58] ss:$20 sps:$4 sm:$0xff]  }
  0xd1   : > { %1990 = vmatpush2.bf16.msra.mxu0 %v7524_v20  ;;  %v7616_v20 = vld [vmem:[%s11560_s3 + $0x144] ss:$20 sps:$4 sm:$0xff]  }
  0xd2   : > { %2033 = vmatpush2.bf16.msra.mxu1 %v7527_v21  ;;  %1991 = vmatprep.subr.bf16.mxu0 %v7532_v5  ;;  %v7619_v21 = vld [vmem:[%s11560_s3 + $0x34] ss:$20 sps:$4 sm:$0xff]  }
  0xd3   : > { %2034 = vmatprep.subr.bf16.mxu1 %v7535_v22  ;;  %v7614_v5 = vld [vmem:[%s11560_s3 + $0x140] ss:$20 sps:$4 sm:$0xff]   ;;  %v7617_v22 = vld [vmem:[%s11560_s3 + $0x30] ss:$20 sps:$4 sm:$0xff]  }
  0xd5   : > { %1992 = vmatpush2.bf16.msra.mxu0 %v7530_v23  ;;  %v7625_v23 = vld [vmem:[%s11560_s3 + $0xc] ss:$20 sps:$4 sm:$0xff]  }
  0xd6   : > { %2035 = vmatpush2.bf16.msra.mxu1 %v7533_v24  ;;  %1993 = vmatprep.subr.bf16.mxu0 %v7538_v25  ;;  %v8923_v24 = vld [vmem:[%s8666_s10] ss:$8 sps:$4 sm:$0xff]  }
  0xd7   : > { %2036 = vmatprep.subr.bf16.mxu1 %v7541_v26  ;;  %v7623_v25 = vld [vmem:[%s11560_s3 + $0x8] ss:$20 sps:$4 sm:$0xff]  }
  0xd8   : > { %v7626_v26 = vld [vmem:[%s11560_s3 + $0x128] ss:$20 sps:$4 sm:$0xff]  }
  0xd9   : > { %1994 = vmatpush2.bf16.msra.mxu0 %v7536_v27 }
  0xda   : > { %2037 = vmatpush2.bf16.msra.mxu1 %v7539_v29  ;;  %1995 = vmatprep.subr.bf16.mxu0 %v7544_v30  ;;  %v7629_v30 = vld [vmem:[%s11560_s3 + $0x1c4] ss:$20 sps:$4 sm:$0xff]  }
  0xdb   : > { %2038 = vmatprep.subr.bf16.mxu1 %v7547_v31 }
  0xdd   : > { %1996 = vmatpush2.bf16.msra.mxu0 %v7542_v32  ;;  %v8935_v32 = vld [vmem:[%s8666_s10 + $0x14] ss:$8 sps:$4 sm:$0xff]  }
  0xde   : > { %2039 = vmatpush2.bf16.msra.mxu1 %v7545_v33  ;;  %6721 = vmatprep.subr.msk.bf16.mxu0 %vm1688_vm0, %v7548_v34 }
  0xdf   : > { %2558 = vmatprep.subr.bf16.mxu1 %v7552_v35  ;;  %v7627_v35 = vld [vmem:[%s11560_s3 + $0x1c0] ss:$20 sps:$4 sm:$0xff]  }
  0xe0   : > { %1998 = vmatmul.mubr.bf16.vlgmr.msra.gmra.mxu0 %v7979_v42  ;;  %v7637_v42 = vld [vmem:[%s11560_s3 + $0xd8] ss:$20 sps:$4 sm:$0xff]  }
  0xe1   : > { %2041 = vmatmul.mubr.bf16.vlgmr.msra.gmra.mxu1 %v7980_v43  ;;  %2058 = vmatpush1.bf16.msra.mxu0 %v1702_v41  ;;  %v7640_v43 = vld [vmem:[%s11560_s3 + $0x174] ss:$20 sps:$4 sm:$0xff]  }
  0xe2   : > { %2559 = vmatpush1.bf16.msra.mxu1 %v7550_v37  ;;  %2059 = vmatprep.subr.bf16.mxu0 %v7556_v38 }
  0xe3   : > { %2560 = vmatprep.subr.bf16.mxu1 %v7559_v39  ;;  %2083 = vmatprep.mubr.bf16.mxu0 %v8017_v15  ;;  %v7636_v39 = vld [vmem:[%s11560_s3 + $0x19c] ss:$20 sps:$4 sm:$0xff]  }
  0xe4   : > { %6791 = vmatprep.mubr.msk.bf16.mxu1 %vm2545_vm2, %v8780_v40 }
  0xe5   : > { %2060 = vmatpush1.bf16.msra.mxu0 %v7554_v6  ;;  %v8954_v6 = vld [vmem:[%s8666_s10 + $0x10] ss:$8 sps:$4 sm:$0xff]  }
  0xe6   : > { %2561 = vmatpush1.bf16.msra.mxu1 %v7557_v28  ;;  %2061 = vmatprep.subr.bf16.mxu0 %v7562_v48  ;;  %v7634_v28 = vld [vmem:[%s11560_s3 + $0x198] ss:$20 sps:$4 sm:$0xff]  }
  0xe7   : > { %2562 = vmatprep.subr.bf16.mxu1 %v7565_v50  ;;  %v8968_v48 = vld [vmem:[%s8666_s10 + $0x24] ss:$8 sps:$4 sm:$0xff]  }
  0xe8   : > { %v7638_v50 = vld [vmem:[%s11560_s3 + $0x170] ss:$20 sps:$4 sm:$0xff]  }
  0xe9   : > { %2062 = vmatpush1.bf16.msra.mxu0 %v7560_v44  ;;  %v7641_v44 = vld [vmem:[%s11560_s3 + $0xb0] ss:$20 sps:$4 sm:$0xff]  }
  0xea   : > { %2563 = vmatpush1.bf16.msra.mxu1 %v7563_v45  ;;  %2063 = vmatprep.subr.bf16.mxu0 %v7568_v46  ;;  %v7647_v45 = vld [vmem:[%s11560_s3 + $0x14c] ss:$20 sps:$4 sm:$0xff]   ;;  %v2100_v46 = vld [vmem:[%s8666_s10 + $0x30] sm:$0x11] }
  0xeb   : > { %2564 = vmatprep.subr.bf16.mxu1 %v7571_v47  ;;  %v8986_v47 = vld [vmem:[%s8666_s10 + $0x20] ss:$8 sps:$4 sm:$0xff]  }
  0xed   : > { %2064 = vmatpush1.bf16.msra.mxu0 %v7566_v49  ;;  %v7645_v49 = vld [vmem:[%s11560_s3 + $0x148] ss:$20 sps:$4 sm:$0xff]  }
  0xee   : > { %2565 = vmatpush1.bf16.msra.mxu1 %v7569_v51  ;;  %2065 = vmatprep.subr.bf16.mxu0 %v7574_v52  ;;  %v7648_v51 = vld [vmem:[%s11560_s3 + $0x88] ss:$20 sps:$4 sm:$0xff]  }
  0xef   : > { %2566 = vmatprep.subr.bf16.mxu1 %v7577_v53  ;;  %v8997_v53 = vcombine.high %v2100_v46, %v2100_v46 }
  0xf1   : > { %2066 = vmatpush1.bf16.msra.mxu0 %v7572_v54  ;;  %v7660_v54 = vld [vmem:[%s11562_s5 + $0x154] ss:$24 sps:$4 sm:$0xff]  }
  0xf2   : > { %2567 = vmatpush1.bf16.msra.mxu1 %v7575_v55  ;;  %2629 = vmatprep.subr.bf16.mxu0 %v7583_v57  ;;  %v7649_v57 = vld [vmem:[%s11560_s3 + $0x60] ss:$20 sps:$4 sm:$0xff]  }
  0xf3   : > { %2568 = vmatprep.subr.bf16.mxu1 %v7580_v56 }
  0xf4   : > { %6722 = vmatmul.mubr.msk.bf16.vlgmr.msra.gmra.mxu0 %vm1684_vm1, %v7981_v0  ;;  %v7650_v0 = vld [vmem:[%s11560_s3 + $0x38] ss:$20 sps:$4 sm:$0xff]  }
  0xf5   : > { %2630 = vmatpush1.bf16.msra.mxu0 %v7581_v59  ;;  %6795 = vmatprep.mubr.msk.bf16.mxu0 %vm2545_vm2, %v8780_v40  ;;  %v7658_v59 = vld [vmem:[%s11562_s5 + $0x150] ss:$24 sps:$4 sm:$0xff]  }
  0xf6   : > { %2569 = vmatpush1.bf16.msra.mxu1 %v7578_v58  ;;  %2631 = vmatprep.subr.bf16.mxu0 %v7589_v61 }
  0xf7   : > { %2570 = vmatprep.subr.bf16.mxu1 %v7586_v60  ;;  %v7663_v60 = vld [vmem:[%s11562_s5 + $0x124] ss:$24 sps:$4 sm:$0xff]  }
  0xf9   : > { %2632 = vmatpush1.bf16.msra.mxu0 %v7587_v63 }
  0xfa   : > { %2571 = vmatpush1.bf16.msra.mxu1 %v7584_v62  ;;  %2633 = vmatprep.subr.bf16.mxu0 %v7595_v2  ;;  %v9020_v62 = vcombine.low %v2100_v46, %v2100_v46  ;;  %v7666_v2 = vld [vmem:[%s11562_s5 + $0xf4] ss:$24 sps:$4 sm:$0xff]   ;;  %v7709_v46 = vld [vmem:[%s11562_s5 + $0x330] ss:$24 sps:$4 sm:$0xff]  }
  0xfb   : > { %2572 = vmatprep.subr.bf16.mxu1 %v7592_v1  ;;  %v7661_v1 = vld [vmem:[%s11562_s5 + $0x120] ss:$24 sps:$4 sm:$0xff]  }
  0xfd   : > { %2634 = vmatpush1.bf16.msra.mxu0 %v7593_v4  ;;  %v7664_v4 = vld [vmem:[%s11562_s5 + $0xf0] ss:$24 sps:$4 sm:$0xff]  }
  0xfe   : > { %2573 = vmatpush1.bf16.msra.mxu1 %v7590_v3  ;;  %2635 = vmatprep.subr.bf16.mxu0 %v7601_v8  ;;  %v7651_v3 = vld [vmem:[%s11560_s3 + $0x10] ss:$20 sps:$4 sm:$0xff]   ;;  %v7654_v8 = vld [vmem:[%s11560_s3 + $0x1c8] ss:$20 sps:$4 sm:$0xff]  }
  0xff   : > { %2582 = vmatprep.subr.bf16.mxu1 %v7598_v7  ;;  %v7669_v7 = vld [vmem:[%s11562_s5 + $0xc4] ss:$24 sps:$4 sm:$0xff]  }
 0x101   : > { %2636 = vmatpush1.bf16.msra.mxu0 %v7599_v10  ;;  %v7655_v10 = vld [vmem:[%s11560_s3 + $0x1a0] ss:$20 sps:$4 sm:$0xff]  }
 0x102   : > { %2583 = vmatpush2.bf16.msra.mxu1 %v7596_v9  ;;  %2637 = vmatprep.subr.bf16.mxu0 %v7607_v12  ;;  %v7672_v9 = vld [vmem:[%s11562_s5 + $0x94] ss:$24 sps:$4 sm:$0xff]   ;;  %v7678_v12 = vld [vmem:[%s11562_s5 + $0x64] ss:$24 sps:$4 sm:$0xff]  }
 0x103   : > { %2584 = vmatprep.subr.bf16.mxu1 %v7604_v11  ;;  %v7670_v11 = vld [vmem:[%s11562_s5 + $0x90] ss:$24 sps:$4 sm:$0xff]  }
 0x105   : > { %2638 = vmatpush1.bf16.msra.mxu0 %v7605_v14  ;;  %v7676_v14 = vld [vmem:[%s11562_s5 + $0x60] ss:$24 sps:$4 sm:$0xff]  }
 0x106   : > { %2585 = vmatpush2.bf16.msra.mxu1 %v7602_v13  ;;  %2639 = vmatprep.subr.bf16.mxu0 %v7613_v17  ;;  %v7656_v13 = vld [vmem:[%s11560_s3 + $0x178] ss:$20 sps:$4 sm:$0xff]   ;;  %v7657_v17 = vld [vmem:[%s11560_s3 + $0x150] ss:$20 sps:$4 sm:$0xff]  }
 0x107   : > { %2586 = vmatprep.subr.bf16.mxu1 %v7610_v16  ;;  %v7684_v16 = vld [vmem:[%s11562_s5 + $0x34] ss:$24 sps:$4 sm:$0xff]  }
 0x109   : > { %2640 = vmatpush1.bf16.msra.mxu0 %v7611_v19  ;;  %v7682_v19 = vld [vmem:[%s11562_s5 + $0x30] ss:$24 sps:$4 sm:$0xff]  }
 0x10a   : > { %2587 = vmatpush2.bf16.msra.mxu1 %v7608_v18  ;;  %2641 = vmatprep.subr.bf16.mxu0 %v7619_v21  ;;  %v7675_v18 = vld [vmem:[%s11562_s5 + $0x454] ss:$24 sps:$4 sm:$0xff]   ;;  %v7673_v21 = vld [vmem:[%s11562_s5 + $0x450] ss:$24 sps:$4 sm:$0xff]  }
 0x10b   : > { %2588 = vmatprep.subr.bf16.mxu1 %v7616_v20  ;;  %v7690_v20 = vld [vmem:[%s11562_s5 + $0x4] ss:$24 sps:$4 sm:$0xff]  }
 0x10c   : > { %v1741_v27 = vpop.f32.mrf.mxu0 }
 0x10d   : > { %v1784_v29 = vpop.f32.mrf.mxu1  ;;  %2642 = vmatpush1.bf16.msra.mxu0 %v7617_v22  ;;  %v7688_v22 = vld [vmem:[%s11562_s5] ss:$24 sps:$4 sm:$0xff]  }
 0x10e   : > { %v1785_v31 = vadd.f32 %v1784_v29, %v1741_v27  ;;  %2589 = vmatpush2.bf16.msra.mxu1 %v7614_v5  ;;  %v8937_v33 = vpop.f32.mrf.mxu0  ;;  %2643 = vmatprep.subr.bf16.mxu0 %v7625_v23  ;;  %v7681_v5 = vld [vmem:[%s11562_s5 + $0x424] ss:$24 sps:$4 sm:$0xff]   ;;  %v7696_v23 = vld [vmem:[%s11562_s5 + $0x2d4] ss:$24 sps:$4 sm:$0xff]   ;;  %v7694_v27 = vld [vmem:[%s11562_s5 + $0x2d0] ss:$24 sps:$4 sm:$0xff]  }
 0x10f   : > { %v8939_v34 = vpop.f32.mrf.mxu1  ;;  %2700 = vmatprep.subr.bf16.mxu1 %v8017_v15  ;;  %v7685_v29 = vld [vmem:[%s11562_s5 + $0x3f0] ss:$24 sps:$4 sm:$0xff]  }
 0x110   : > { %v1745_v37 = vpop.f32.mrf.mxu0 }
 0x111   : > { %v1788_v38 = vpop.f32.mrf.mxu1  ;;  %2591 = vmatmul.mubr.bf16.vlgmr.msra.gmra.mxu1 %v8923_v24  ;;  %2644 = vmatpush1.bf16.msra.mxu0 %v7623_v25  ;;  %v7679_v25 = vld [vmem:[%s11562_s5 + $0x420] ss:$24 sps:$4 sm:$0xff]  }
 0x112   : > { %v1789_v41 = vadd.f32 %v1788_v38, %v1745_v37  ;;  %2701 = vmatpush1.bf16.msra.mxu1 %v7626_v26  ;;  %2653 = vmatprep.subr.bf16.mxu0 %v7629_v30  ;;  %v8994_v52 = vpop.f32.mrf.mxu0  ;;  %v7687_v26 = vld [vmem:[%s11562_s5 + $0x3f4] ss:$24 sps:$4 sm:$0xff]   ;;  %v7693_v30 = vld [vmem:[%s11562_s5 + $0x3c4] ss:$24 sps:$4 sm:$0xff]   ;;  %v7706_v37 = vld [vmem:[%s11562_s5 + $0x270] ss:$24 sps:$4 sm:$0xff]  }
 0x113   : > { %2702 = vmatprep.subr.bf16.mxu1 %v8017_v15  ;;  %6792 = vmatprep.mubr.msk.bf16.mxu1 %vm2545_vm2, %v8935_v32  ;;  %v7714_v38 = vld [vmem:[%s11562_s5 + $0x244] ss:$24 sps:$4 sm:$0xff]  }
 0x115   : > { %2654 = vmatpush2.bf16.msra.mxu0 %v7627_v35  ;;  %v7691_v35 = vld [vmem:[%s11562_s5 + $0x3c0] ss:$24 sps:$4 sm:$0xff]  }
 0x116   : > { %2703 = vmatpush1.bf16.msra.mxu1 %v7630_v36  ;;  %2655 = vmatprep.subr.bf16.mxu0 %v7636_v39  ;;  %v7699_v36 = vld [vmem:[%s11562_s5 + $0x394] ss:$24 sps:$4 sm:$0xff]   ;;  %v7697_v39 = vld [vmem:[%s11562_s5 + $0x390] ss:$24 sps:$4 sm:$0xff]  }
 0x117   : > { %2704 = vmatprep.subr.bf16.mxu1 %v8017_v15 }
 0x119   : > { %2601 = vmatmul.mubr.bf16.gmra.mxu1 %v8954_v6  ;;  %2656 = vmatpush2.bf16.msra.mxu0 %v7634_v28  ;;  %v7720_v28 = vld [vmem:[%s11562_s5 + $0x214] ss:$24 sps:$4 sm:$0xff]  }
 0x11a   : > { %2705 = vmatpush1.bf16.msra.mxu1 %v7637_v42  ;;  %2657 = vmatprep.subr.bf16.mxu0 %v7640_v43  ;;  %v9165_v42 = vpop.f32.mrf.mxu1  ;;  %v7703_v43 = vld [vmem:[%s11562_s5 + $0x360] ss:$24 sps:$4 sm:$0xff]  }
 0x11b   : > { %2706 = vmatprep.subr.bf16.mxu1 %v8017_v15  ;;  %6793 = vmatprep.mubr.msk.bf16.mxu1 %vm2545_vm2, %v8968_v48 }
 0x11d   : > { %2658 = vmatpush2.bf16.msra.mxu0 %v7638_v50  ;;  %v7711_v50 = vld [vmem:[%s11562_s5 + $0x334] ss:$24 sps:$4 sm:$0xff]  }
 0x11e   : > { %2707 = vmatpush1.bf16.msra.mxu1 %v7641_v44  ;;  %2659 = vmatprep.subr.bf16.mxu0 %v7647_v45  ;;  %v7718_v44 = vld [vmem:[%s11562_s5 + $0x210] ss:$24 sps:$4 sm:$0xff]   ;;  %v7726_v45 = vld [vmem:[%s11562_s5 + $0x1e4] ss:$24 sps:$4 sm:$0xff]  }
 0x11f   : > { %2708 = vmatprep.subr.bf16.mxu1 %v8017_v15 }
 0x120   : > { %v1827_v55 = vpop.f32.mrf.mxu0 }
 0x121   : > { %2611 = vmatmul.mubr.bf16.gmra.mxu1 %v8986_v47  ;;  %v9003_v56 = vadd.f32 %v1827_v55, %v1785_v31  ;;  %2660 = vmatpush2.bf16.msra.mxu0 %v7645_v49  ;;  %v7700_v31 = vld [vmem:[%s11562_s5 + $0x2a0] ss:$24 sps:$4 sm:$0xff]   ;;  %v7717_v49 = vld [vmem:[%s11562_s5 + $0x304] ss:$24 sps:$4 sm:$0xff]  }
 0x122   : > { %2709 = vmatpush1.bf16.msra.mxu1 %v7648_v51  ;;  %v9008_v58 = vpop.f32.mrf.mxu0  ;;  %6794 = vmatprep.mubr.msk.bf16.mxu1 %vm2545_vm2, %v8997_v53  ;;  %v7724_v51 = vld [vmem:[%s11562_s5 + $0x1e0] ss:$24 sps:$4 sm:$0xff]  }
 0x123   : > { %2710 = vmatprep.subr.bf16.mxu1 %v8017_v15  ;;  %4129 = vmatprep.subr.bf16.mxu0 %v7660_v54  ;;  %v7715_v54 = vld [vmem:[%s11562_s5 + $0x300] ss:$24 sps:$4 sm:$0xff]  }
 0x124   : > { %v1831_v61 = vpop.f32.mrf.mxu0  ;;  %2662 = vmatmul.mubr.bf16.vlgmr.msra.gmra.mxu0 %v8923_v24 }
 0x125   : > { %v9022_v63 = vadd.f32 %v1831_v61, %v1789_v41  ;;  %6796 = vmatprep.mubr.msk.bf16.mxu0 %vm2545_vm2, %v8935_v32  ;;  %4130 = vmatpush1.bf16.msra.mxu0 %v7658_v59  ;;  %v7705_v41 = vld [vmem:[%s11562_s5 + $0x364] ss:$24 sps:$4 sm:$0xff]   ;;  %v7730_v59 = vld [vmem:[%s11562_s5 + $0x1b0] ss:$24 sps:$4 sm:$0xff]  }
 0x126   : > { %2711 = vmatpush1.bf16.msra.mxu1 %v7649_v57  ;;  %4131 = vmatprep.subr.bf16.mxu0 %v7663_v60  ;;  %v7723_v57 = vld [vmem:[%s11562_s5 + $0x5d4] ss:$24 sps:$4 sm:$0xff]   ;;  %v7738_v60 = vld [vmem:[%s11562_s5 + $0x184] ss:$24 sps:$4 sm:$0xff]   ;;  %v7721_v61 = vld [vmem:[%s11562_s5 + $0x5d0] ss:$24 sps:$4 sm:$0xff]  }
 0x127   : > { %2712 = vmatprep.subr.bf16.mxu1 %v8017_v15 }
 0x129   : > { %2621 = vmatmul.mubr.bf16.gmra.mxu1 %v9020_v62  ;;  %4132 = vmatpush1.bf16.msra.mxu0 %v7661_v1  ;;  %v7729_v1 = vld [vmem:[%s11562_s5 + $0x5a4] ss:$24 sps:$4 sm:$0xff]  }
 0x12a   : > { %2713 = vmatpush1.bf16.msra.mxu1 %v7650_v0  ;;  %6799 = vmatprep.mubr.msk.bf16.mxu1 %vm2545_vm2, %v8780_v40  ;;  %v7667_v40 = vld [vmem:[%s11562_s5 + $0xc0] ss:$24 sps:$4 sm:$0xff]  }
 0x12b   : > { %2714 = vmatprep.subr.bf16.mxu1 %v8017_v15  ;;  %4133 = vmatprep.subr.bf16.mxu0 %v7666_v2  ;;  %v7736_v2 = vld [vmem:[%s11562_s5 + $0x180] ss:$24 sps:$4 sm:$0xff]  }
 0x12c   : > { %2672 = vmatmul.mubr.bf16.gmra.mxu0 %v8954_v6 }
 0x12d   : > { %6797 = vmatprep.mubr.msk.bf16.mxu0 %vm2545_vm2, %v8968_v48  ;;  %4134 = vmatpush1.bf16.msra.mxu0 %v7664_v4 }
 0x12e   : > { %2715 = vmatpush1.bf16.msra.mxu1 %v7651_v3  ;;  %4135 = vmatprep.subr.bf16.mxu0 %v7669_v7 }
 0x12f   : > { %2724 = vmatprep.subr.bf16.mxu1 %v8017_v15 }
 0x131   : > { %4136 = vmatpush1.bf16.msra.mxu0 %v7667_v40 }
 0x132   : > { %2725 = vmatpush2.bf16.msra.mxu1 %v7654_v8  ;;  %4137 = vmatprep.subr.bf16.mxu0 %v7672_v9  ;;  %v7727_v8 = vld [vmem:[%s11562_s5 + $0x5a0] ss:$24 sps:$4 sm:$0xff]  }
 0x133   : > { %2726 = vmatprep.subr.bf16.mxu1 %v8017_v15 }
 0x134   : > { %2682 = vmatmul.mubr.bf16.gmra.mxu0 %v8986_v47 }
 0x135   : > { %6798 = vmatprep.mubr.msk.bf16.mxu0 %vm2545_vm2, %v8997_v53  ;;  %4138 = vmatpush1.bf16.msra.mxu0 %v7670_v11 }
 0x136   : > { %2727 = vmatpush2.bf16.msra.mxu1 %v7655_v10  ;;  %4139 = vmatprep.subr.bf16.mxu0 %v7678_v12  ;;  %v7735_v10 = vld [vmem:[%s11562_s5 + $0x574] ss:$24 sps:$4 sm:$0xff]  }
 0x137   : > { %2728 = vmatprep.subr.bf16.mxu1 %v8017_v15 }
 0x139   : > { %4140 = vmatpush1.bf16.msra.mxu0 %v7676_v14  ;;  %v7733_v14 = vld [vmem:[%s11562_s5 + $0x570] ss:$24 sps:$4 sm:$0xff]  }
 0x13a   : > { %2729 = vmatpush2.bf16.msra.mxu1 %v7656_v13  ;;  %4141 = vmatprep.subr.bf16.mxu0 %v7684_v16 }
 0x13b   : > { %2730 = vmatprep.subr.bf16.mxu1 %v8017_v15 }
 0x13c   : > { %2692 = vmatmul.mubr.bf16.gmra.mxu0 %v9020_v62 }
 0x13d   : > { %4142 = vmatpush1.bf16.msra.mxu0 %v7682_v19  ;;  %v7739_v19 = vld [vmem:[%s11562_s5 + $0x540] ss:$24 sps:$4 sm:$0xff]  }
 0x13e   : > { %2731 = vmatpush2.bf16.msra.mxu1 %v7657_v17  ;;  %4143 = vmatprep.subr.bf16.mxu0 %v7690_v20  ;;  %v7741_v17 = vld [vmem:[%s11562_s5 + $0x544] ss:$24 sps:$4 sm:$0xff]   ;;  %v7744_v20 = vld [vmem:[%s11562_s5 + $0x514] ss:$24 sps:$4 sm:$0xff]  }
 0x13f   : > { %4200 = vmatprep.subr.bf16.mxu1 %v7675_v18 }
 0x141   : > { %2733 = vmatmul.mubr.bf16.vlgmr.msra.gmra.mxu1 %v8923_v24  ;;  %4144 = vmatpush1.bf16.msra.mxu0 %v7688_v22  ;;  %v7702_v24 = vld [vmem:[%s11562_s5 + $0x2a4] ss:$24 sps:$4 sm:$0xff]   ;;  %v7745_v22 = vld [vmem:[%s11562_s5 + $0x4e0] ss:$24 sps:$4 sm:$0xff]  }
 0x142   : > { %6800 = vmatprep.mubr.msk.bf16.mxu1 %vm2545_vm2, %v8935_v32  ;;  %4201 = vmatpush1.bf16.msra.mxu1 %v7673_v21  ;;  %v7708_v32 = vld [vmem:[%s11562_s5 + $0x274] ss:$24 sps:$4 sm:$0xff]   ;;  %v7742_v21 = vld [vmem:[%s11562_s5 + $0x510] ss:$24 sps:$4 sm:$0xff]  }
 0x143   : > { %4202 = vmatprep.subr.bf16.mxu1 %v7681_v5  ;;  %4145 = vmatprep.subr.bf16.mxu0 %v7696_v23  ;;  %v7747_v5 = vld [vmem:[%s11562_s5 + $0x4e4] ss:$24 sps:$4 sm:$0xff]   ;;  %v7750_v23 = vld [vmem:[%s11562_s5 + $0x4b4] ss:$24 sps:$4 sm:$0xff]  }
 0x145   : > { %4146 = vmatpush2.bf16.msra.mxu0 %v7694_v27  ;;  %v3029_v27 = vld [vmem:[%s11562_s5 + $0x690] sm:$0x33] }
 0x146   : > { %4203 = vmatpush1.bf16.msra.mxu1 %v7679_v25  ;;  %4147 = vmatprep.subr.bf16.mxu0 %v7702_v24  ;;  %v7748_v25 = vld [vmem:[%s11562_s5 + $0x4b0] ss:$24 sps:$4 sm:$0xff]   ;;  %v7751_v24 = vld [vmem:[%s11562_s5 + $0x480] ss:$24 sps:$4 sm:$0xff]  }
 0x147   : > { %4204 = vmatprep.subr.bf16.mxu1 %v7687_v26  ;;  %v7753_v26 = vld [vmem:[%s11562_s5 + $0x484] ss:$24 sps:$4 sm:$0xff]  }
 0x149   : > { %2741 = vmatmul.mubr.bf16.gmra.mxu1 %v8954_v6  ;;  %4148 = vmatpush2.bf16.msra.mxu0 %v7700_v31  ;;  %v7712_v6 = vld [vmem:[%s11562_s5 + $0x240] ss:$24 sps:$4 sm:$0xff]  }
 0x14a   : > { %6801 = vmatprep.mubr.msk.bf16.mxu1 %vm2545_vm2, %v8968_v48  ;;  %4205 = vmatpush1.bf16.msra.mxu1 %v7685_v29  ;;  %v7014_v29 = vcombine.high %v3029_v27, %v3029_v27 }
 0x14b   : > { %4206 = vmatprep.subr.bf16.mxu1 %v7693_v30  ;;  %4149 = vmatprep.subr.bf16.mxu0 %v7708_v32  ;;  %v7756_v30 = vld [vmem:[%s11562_s5 + $0x15c] ss:$24 sps:$4 sm:$0xff]  }
 0x14d   : > { %4150 = vmatpush2.bf16.msra.mxu0 %v7706_v37  ;;  %v1870_v48 = vpop.f32.mrf.mxu1 }
 0x14e   : > { %4207 = vmatpush1.bf16.msra.mxu1 %v7691_v35  ;;  %4151 = vmatprep.subr.bf16.mxu0 %v7714_v38 }
 0x14f   : > { %4208 = vmatprep.subr.bf16.mxu1 %v7699_v36 }
 0x151   : > { %2749 = vmatmul.mubr.bf16.gmra.mxu1 %v8986_v47  ;;  %4152 = vmatpush2.bf16.msra.mxu0 %v7712_v6  ;;  %v9185_v47 = vpop.f32.mrf.mxu1 }
 0x152   : > { %6802 = vmatprep.mubr.msk.bf16.mxu1 %vm2545_vm2, %v8997_v53  ;;  %4209 = vmatpush1.bf16.msra.mxu1 %v7697_v39  ;;  %v7732_v53 = vld [vmem:[%s11562_s5 + $0x1b4] ss:$24 sps:$4 sm:$0xff]  }
 0x153   : > { %4210 = vmatprep.subr.bf16.mxu1 %v7705_v41  ;;  %4153 = vmatprep.subr.bf16.mxu0 %v7720_v28  ;;  %v1874_v55 = vpop.f32.mrf.mxu1 }
 0x155   : > { %4154 = vmatpush2.bf16.msra.mxu0 %v7718_v44  ;;  %v9214_v0 = vpop.f32.mrf.mxu1 }
 0x156   : > { %4211 = vmatpush1.bf16.msra.mxu1 %v7703_v43  ;;  %4155 = vmatprep.subr.bf16.mxu0 %v7726_v45 }
 0x157   : > { %4212 = vmatprep.subr.bf16.mxu1 %v7711_v50 }
 0x159   : > { %2757 = vmatmul.mubr.bf16.gmra.mxu1 %v9020_v62  ;;  %4156 = vmatpush2.bf16.msra.mxu0 %v7724_v51  ;;  %v9212_v62 = vpop.f32.mrf.mxu0 }
 0x15a   : > { %4213 = vmatpush1.bf16.msra.mxu1 %v7709_v46  ;;  %4157 = vmatprep.subr.bf16.mxu0 %v7732_v53 }
 0x15b   : > { %4214 = vmatprep.subr.bf16.mxu1 %v7717_v49  ;;  %v2175_v49 = vlaneseq }
 0x15d   : > { %4158 = vmatpush2.bf16.msra.mxu0 %v7730_v59  ;;  %v9292_v51 = vshrl.u32 %v2175_v49, 7 }
 0x15e   : > { %4215 = vmatpush1.bf16.msra.mxu1 %v7715_v54  ;;  %4159 = vmatprep.subr.bf16.mxu0 %v7738_v60 }
 0x15f   : > { %4216 = vmatprep.subr.bf16.mxu1 %v7723_v57  ;;  %11629 = vst [vmem:[#allocation13_spill] sm:$0xff] %v9292_v51  ;;  %v11569_v53 = vsub.s32 1, %v9292_v51  ;;  %v11570_v57 = vsub.s32 0, %v9292_v51 }
 0x160   : > { %v1913_v3 = vpop.f32.mrf.mxu0 }
 0x161   : > { %v1956_v4 = vpop.f32.mrf.mxu1  ;;  %v1914_v7 = vadd.f32 %v1913_v3, %v1870_v48  ;;  %4160 = vmatpush2.bf16.msra.mxu0 %v7736_v2 }
 0x162   : > { %4217 = vmatpush2.bf16.msra.mxu1 %v7721_v61  ;;  %v9225_v40 = vpop.f32.mrf.mxu0  ;;  %7019 = vmatprep.subr.msk.bf16.mxu0 %vm4110_vm3, %v7014_v29 }
 0x163   : > { %11618 = vst [vmem:[#allocation2_spill] sm:$0xff] %v9225_v40  ;;  %v9227_v9 = vpop.f32.mrf.mxu1  ;;  %4218 = vmatprep.subr.bf16.mxu1 %v7729_v1  ;;  %v9232_v11 = vadd.f32 %v1956_v4, %v1914_v7 }
 0x164   : > { %11619 = vst [vmem:[#allocation3_spill] sm:$0xff] %v9227_v9  ;;  %v1917_v12 = vpop.f32.mrf.mxu0 }
 0x165   : > { %11620 = vst [vmem:[#allocation4_spill] sm:$0xff] %v9232_v11  ;;  %v1918_v13 = vadd.f32 %v1917_v12, %v1874_v55  ;;  %v1960_v16 = vpop.f32.mrf.mxu1  ;;  %v9300_v55 = vld [vmem:[%s11561_s4] sm:$0x1f] }
 0x166   : > { %4219 = vmatpush2.bf16.msra.mxu1 %v7727_v8  ;;  %v9276_v31 = vpop.f32.mrf.mxu0  ;;  %v9306_v60 = vrot.slane %v9300_v55, %v11569_v53  ;;  %v9311_v61 = vrot.slane %v9300_v55, %v11570_v57 }
 0x167   : > { %4220 = vmatprep.subr.bf16.mxu1 %v7735_v10  ;;  %v9240_v18 = vadd.f32 %v1960_v16, %v1918_v13  ;;  %v9278_v32 = vpop.f32.mrf.mxu1 }
 0x168   : > { %11622 = vst [vmem:[#allocation6_spill] sm:$0xff] %v9278_v32 }
 0x169   : > { %11621 = vst [vmem:[#allocation5_spill] sm:$0xff] %v9240_v18 }
 0x16a   : > { %4221 = vmatpush2.bf16.msra.mxu1 %v7733_v14  ;;  %v7013_v14 = vcombine.low %v3029_v27, %v3029_v27 }
 0x16b   : > { %4222 = vmatprep.subr.bf16.mxu1 %v7741_v17 }
 0x16e   : > { %4223 = vmatpush2.bf16.msra.mxu1 %v7739_v19 }
 0x16f   : > { %4224 = vmatprep.subr.bf16.mxu1 %v7744_v20 }
 0x172   : > { %4225 = vmatpush2.bf16.msra.mxu1 %v7742_v21 }
 0x173   : > { %4226 = vmatprep.subr.bf16.mxu1 %v7747_v5 }
 0x176   : > { %4227 = vmatpush2.bf16.msra.mxu1 %v7745_v22 }
 0x177   : > { %4228 = vmatprep.subr.bf16.mxu1 %v7750_v23 }
 0x17a   : > { %4229 = vmatpush2.bf16.msra.mxu1 %v7748_v25 }
 0x17b   : > { %4230 = vmatprep.subr.bf16.mxu1 %v7753_v26  ;;  %v4112_v26 = vsel %vm4110_vm3, %v7013_v14, 0 }
 0x17e   : > { %4231 = vmatpush2.bf16.msra.mxu1 %v7751_v24  ;;  %v7770_v24 = vld [vmem:[%s11562_s5 + $0x664] ss:$24 sps:$4 sm:$0xff]  }
 0x17f   : > { %4342 = vmatprep.subr.bf16.mxu1 %v7756_v30 }
 0x1a0   : > { %v1999_v35 = vpop.f32.mrf.mxu0 }
 0x1a1   : > { %v2042_v36 = vpop.f32.mrf.mxu1 }
 0x1a2   : > { %v2043_v37 = vadd.f32 %v2042_v36, %v1999_v35  ;;  %v9280_v38 = vpop.f32.mrf.mxu0  ;;  %v11568_v35 = vsub.s32 2, %v9292_v51 }
 0x1a3   : > { %11623 = vst [vmem:[#allocation7_spill] sm:$0xff] %v9280_v38  ;;  %v9282_v39 = vpop.f32.mrf.mxu1 }
 0x1a4   : > { %11624 = vst [vmem:[#allocation8_spill] sm:$0xff] %v9282_v39  ;;  %v2003_v41 = vpop.f32.mrf.mxu0 }
 0x1a5   : > { %v2046_v6 = vpop.f32.mrf.mxu1 }
 0x1a6   : > { %v2047_v28 = vadd.f32 %v2046_v6, %v2003_v41  ;;  %v9284_v43 = vpop.f32.mrf.mxu0  ;;  %v11567_v6 = vsub.s32 3, %v9292_v51 }
 0x1a7   : > { %11625 = vst [vmem:[#allocation9_spill] sm:$0xff] %v9284_v43  ;;  %v9295_v54 = vpop.f32.mrf.mxu1 }
 0x1a8   : > { %11630 = vst [vmem:[#allocation14_spill] sm:$0xff] %v9295_v54 }
 0x1b4   : > { %v2085_v48 = vpop.f32.mrf.mxu0 }
 0x1b5   : > { %v9286_v50 = vadd.f32 %v2085_v48, %v2043_v37 }
 0x1b6   : > { %v9288_v44 = vpop.f32.mrf.mxu0 }
 0x1b7   : > { %11626 = vst [vmem:[#allocation10_spill] sm:$0xff] %v9286_v50  ;;  %11627 = vst [vmem:[#allocation11_spill] sm:$0xff] %v9288_v44 }
 0x1b8   : > { %v2089_v45 = vpop.f32.mrf.mxu0 }
 0x1b9   : > { %v9290_v46 = vadd.f32 %v2089_v45, %v2047_v28  ;;  %v7768_v28 = vld [vmem:[%s11562_s5 + $0x660] ss:$24 sps:$4 sm:$0xff]   ;;  %v7776_v45 = vld [vmem:[%s11562_s5 + $0x634] ss:$24 sps:$4 sm:$0xff]  }
 0x1bb   : > { %11628 = vst [vmem:[#allocation12_spill] sm:$0xff] %v9290_v46 }
 0x1d1   : > { %v2592_v59 = vpop.f32.mrf.mxu1 }
 0x1d2   : > { %v2593_v7 = vadd.f32 %v2592_v59, %v9311_v61  ;;  %v9339_v59 = vpop.f32.mrf.mxu0 }
 0x1d3   : > { %v2594_v1 = vpop.f32.mrf.mxu1  ;;  %11631 = vst [vmem:[#allocation15_spill] sm:$0xff] %v9339_v59 }
 0x1d4   : > { %v2595_v3 = vadd.f32 %v2594_v1, %v9306_v60  ;;  %v2764_v19 = vmax.f32 %v2593_v7, 0.0 }
 0x1d5   : > { %v2596_v2 = vpop.f32.mrf.mxu1 }
 0x1d6   : > { %v2597_v4 = vadd.f32 %v2596_v2, %v9311_v61  ;;  %v2765_v16 = vmax.f32 %v2595_v3, 0.0 }
 0x1d7   : > { %v2598_v8 = vpop.f32.mrf.mxu1 }
 0x1d8   : > { %v2599_v10 = vadd.f32 %v2598_v8, %v9306_v60  ;;  %v2769_v12 = vmax.f32 %v2597_v4, 0.0  ;;  %v9347_v4 = vrot.slane %v9300_v55, %v11568_v35 }
 0x1d9   : > { %v2602_v13 = vpop.f32.mrf.mxu1 }
 0x1da   : > { %v2770_v17 = vmax.f32 %v2599_v10, 0.0  ;;  %v2603_v20 = vadd.f32 %v2602_v13, %v9311_v61  ;;  %v9321_v23 = vpack.c.bf16 %v2769_v12, %v2764_v19  ;;  %v9355_v10 = vrot.slane %v9300_v55, %v11567_v6  ;;  %v7774_v12 = vld [vmem:[%s11562_s5 + $0x630] ss:$24 sps:$4 sm:$0xff]  }
 0x1db   : > { %v2604_v21 = vpop.f32.mrf.mxu1 }
 0x1dc   : > { %v2605_v5 = vadd.f32 %v2604_v21, %v9306_v60  ;;  %v9319_v22 = vpack.c.bf16 %v2770_v17, %v2765_v16  ;;  %v2774_v29 = vmax.f32 %v2603_v20, 0.0  ;;  %v7782_v16 = vld [vmem:[%s11562_s5 + $0x604] ss:$24 sps:$4 sm:$0xff]  }
 0x1dd   : > { %v2606_v25 = vpop.f32.mrf.mxu1 }
 0x1de   : > { %v2607_v27 = vadd.f32 %v2606_v25, %v9311_v61  ;;  %4161 = vmatprep.mubr.bf16.mxu0 %v9319_v22  ;;  %v2775_v36 = vmax.f32 %v2605_v5, 0.0 }
 0x1df   : > { %v2608_v30 = vpop.f32.mrf.mxu1  ;;  %4162 = vmatmul.mubr.bf16.vlgmr.msra.gmra.mxu0 %v9321_v23 }
 0x1e0   : > { %v2779_v37 = vmax.f32 %v2607_v27, 0.0  ;;  %v2609_v41 = vadd.f32 %v2608_v30, %v9306_v60  ;;  %4280 = vmatpush1.bf16.msra.mxu0 %v4112_v26 }
 0x1e1   : > { %v2612_v48 = vpop.f32.mrf.mxu1  ;;  %4281 = vmatprep.subr.bf16.mxu0 %v7770_v24 }
 0x1e2   : > { %v2780_v49 = vmax.f32 %v2609_v41, 0.0  ;;  %v9341_v1 = vpack.c.bf16 %v2779_v37, %v2774_v29  ;;  %v2613_v2 = vadd.f32 %v2612_v48, %v9311_v61  ;;  %v7780_v29 = vld [vmem:[%s11562_s5 + $0x600] ss:$24 sps:$4 sm:$0xff]   ;;  %v7788_v37 = vld [vmem:[%s11562_s5 + $0x45c] ss:$24 sps:$4 sm:$0xff]  }
 0x1e3   : > { %v2614_v3 = vpop.f32.mrf.mxu1 }
 0x1e4   : > { %v2615_v7 = vadd.f32 %v2614_v3, %v9306_v60  ;;  %v9350_v8 = vpack.c.bf16 %v2780_v49, %v2775_v36  ;;  %4282 = vmatpush1.bf16.msra.mxu0 %v7768_v28  ;;  %v2663_v14 = vpop.f32.mrf.mxu0  ;;  %v2784_v19 = vmax.f32 %v2613_v2, 0.0 }
 0x1e5   : > { %v2616_v13 = vpop.f32.mrf.mxu1  ;;  %4283 = vmatprep.subr.bf16.mxu0 %v7776_v45  ;;  %v2664_v20 = vadd.f32 %v2663_v14, %v9347_v4 }
 0x1e6   : > { %v2617_v17 = vadd.f32 %v2616_v13, %v9311_v61  ;;  %4171 = vmatprep.mubr.bf16.mxu0 %v9350_v8  ;;  %v2665_v5 = vpop.f32.mrf.mxu0  ;;  %v2785_v25 = vmax.f32 %v2615_v7, 0.0 }
 0x1e7   : > { %v2618_v21 = vpop.f32.mrf.mxu1  ;;  %4172 = vmatmul.mubr.bf16.gmra.mxu0 %v9341_v1  ;;  %v2666_v27 = vadd.f32 %v2665_v5, %v9355_v10  ;;  %v2766_v45 = vmax.f32 %v2664_v20, 0.0 }
 0x1e8   : > { %v2789_v26 = vmax.f32 %v2617_v17, 0.0  ;;  %v2619_v24 = vadd.f32 %v2618_v21, %v9306_v60  ;;  %4284 = vmatpush1.bf16.msra.mxu0 %v7774_v12  ;;  %v2667_v30 = vpop.f32.mrf.mxu0 }
 0x1e9   : > { %v2622_v36 = vpop.f32.mrf.mxu1  ;;  %4285 = vmatprep.subr.bf16.mxu0 %v7782_v16  ;;  %v2668_v28 = vadd.f32 %v2667_v30, %v9347_v4  ;;  %v2767_v49 = vmax.f32 %v2666_v27, 0.0  ;;  %v7754_v30 = vld [vmem:[%s11562_s5 + $0x158] ss:$24 sps:$4 sm:$0xff]  }
 0x1ea   : > { %v2790_v41 = vmax.f32 %v2619_v24, 0.0  ;;  %v9376_v48 = vpack.c.bf16 %v2789_v26, %v2784_v19  ;;  %v2669_v2 = vpop.f32.mrf.mxu0  ;;  %v2623_v3 = vadd.f32 %v2622_v36, %v9311_v61 }
 0x1eb   : > { %v2624_v7 = vpop.f32.mrf.mxu1  ;;  %v2771_v12 = vmax.f32 %v2668_v28, 0.0  ;;  %v2670_v13 = vadd.f32 %v2669_v2, %v9355_v10 }
 0x1ec   : > { %v9380_v14 = vpack.c.bf16 %v2790_v41, %v2785_v25  ;;  %v2625_v16 = vadd.f32 %v2624_v7, %v9306_v60  ;;  %4286 = vmatpush1.bf16.msra.mxu0 %v7780_v29  ;;  %v2673_v17 = vpop.f32.mrf.mxu0  ;;  %v2794_v24 = vmax.f32 %v2623_v3, 0.0 }
 0x1ed   : > { %v2626_v21 = vpop.f32.mrf.mxu1  ;;  %4413 = vmatprep.subr.bf16.mxu0 %v7788_v37  ;;  %v2772_v5 = vmax.f32 %v2670_v13, 0.0  ;;  %v9384_v20 = vpack.c.bf16 %v2771_v12, %v2766_v45  ;;  %v2674_v61 = vadd.f32 %v2673_v17, %v9347_v4  ;;  %v7759_v37 = vld [vmem:[%s11562_s5 + $0x12c] ss:$24 sps:$4 sm:$0xff]   ;;  %v7757_v12 = vld [vmem:[%s11562_s5 + $0x128] ss:$24 sps:$4 sm:$0xff]  }
 0x1ee   : > { %4181 = vmatprep.mubr.bf16.mxu0 %v9380_v14  ;;  %v2795_v19 = vmax.f32 %v2625_v16, 0.0  ;;  %v2675_v26 = vpop.f32.mrf.mxu0  ;;  %v9402_v45 = vpack.c.bf16 %v2794_v24, %v2794_v24  ;;  %v7762_v16 = vld [vmem:[%s11562_s5 + $0xfc] ss:$24 sps:$4 sm:$0xff]   ;;  %v7760_v24 = vld [vmem:[%s11562_s5 + $0xf8] ss:$24 sps:$4 sm:$0xff]  }
 0x1ef   : > { %4182 = vmatmul.mubr.bf16.gmra.mxu0 %v9376_v48  ;;  %v2627_v25 = vpop.f32.mrf.mxu1  ;;  %v2676_v27 = vadd.f32 %v2675_v26, %v9355_v10  ;;  %v9391_v29 = vpack.c.bf16 %v2772_v5, %v2767_v49  ;;  %v2776_v28 = vmax.f32 %v2674_v61, 0.0 }
 0x1f0   : > { %v9389_v60 = vpack.c.bf16 %v2795_v19, %v2795_v19  ;;  %v2677_v36 = vpop.f32.mrf.mxu0 }
 0x1f1   : > { %v2678_v41 = vadd.f32 %v2677_v36, %v9347_v4  ;;  %4232 = vmatprep.mubr.bf16.mxu1 %v9391_v29  ;;  %v2777_v2 = vmax.f32 %v2676_v27, 0.0  ;;  %v7767_v27 = vld [vmem:[%s11562_s5 + $0xcc] ss:$24 sps:$4 sm:$0xff]  }
 0x1f2   : > { %4191 = vmatprep.mubr.bf16.mxu0 %v9389_v60  ;;  %v2679_v49 = vpop.f32.mrf.mxu0  ;;  %4233 = vmatmul.mubr.bf16.vlgmr.msra.gmra.mxu1 %v9384_v20 }
 0x1f3   : > { %v2781_v3 = vmax.f32 %v2678_v41, 0.0  ;;  %v2680_v7 = vadd.f32 %v2679_v49, %v9355_v10  ;;  %4343 = vmatpush1.bf16.msra.mxu1 %v7754_v30 }
 0x1f4   : > { %v2683_v13 = vpop.f32.mrf.mxu0  ;;  %4344 = vmatprep.subr.bf16.mxu1 %v7759_v37 }
 0x1f5   : > { %v2782_v17 = vmax.f32 %v2680_v7, 0.0  ;;  %v9412_v21 = vpack.c.bf16 %v2781_v3, %v2776_v28  ;;  %v2684_v5 = vadd.f32 %v2683_v13, %v9347_v4  ;;  %v11566_v3 = vsub.s32 4, %v9292_v51 }
 0x1f6   : > { %v2685_v19 = vpop.f32.mrf.mxu0 }
 0x1f7   : > { %4192 = vmatmul.mubr.bf16.gmra.mxu0 %v9402_v45  ;;  %v2686_v61 = vadd.f32 %v2685_v19, %v9355_v10  ;;  %4345 = vmatpush1.bf16.msra.mxu1 %v7757_v12  ;;  %v9417_v26 = vpack.c.bf16 %v2782_v17, %v2777_v2  ;;  %v2786_v36 = vmax.f32 %v2684_v5, 0.0  ;;  %v7765_v2 = vld [vmem:[%s11562_s5 + $0xc8] ss:$24 sps:$4 sm:$0xff]   ;;  %v7773_v12 = vld [vmem:[%s11562_s5 + $0x9c] ss:$24 sps:$4 sm:$0xff]   ;;  %v9443_v19 = vrot.slane %v9300_v55, %v11566_v3 }
 0x1f8   : > { %4303 = vmatprep.mubr.bf16.mxu0 %v8017_v15  ;;  %v2687_v25 = vpop.f32.mrf.mxu0  ;;  %4346 = vmatprep.subr.bf16.mxu1 %v7762_v16 }
 0x1f9   : > { %v2688_v30 = vadd.f32 %v2687_v25, %v9347_v4  ;;  %4242 = vmatprep.mubr.bf16.mxu1 %v9417_v26  ;;  %v2787_v41 = vmax.f32 %v2686_v61, 0.0 }
 0x1fa   : > { %v2689_v37 = vpop.f32.mrf.mxu0  ;;  %4243 = vmatmul.mubr.bf16.gmra.mxu1 %v9412_v21 }
 0x1fb   : > { %v2791_v28 = vmax.f32 %v2688_v30, 0.0  ;;  %v2690_v49 = vadd.f32 %v2689_v37, %v9355_v10  ;;  %4347 = vmatpush1.bf16.msra.mxu1 %v7760_v24  ;;  %v7771_v24 = vld [vmem:[%s11562_s5 + $0x98] ss:$24 sps:$4 sm:$0xff]  }
 0x1fc   : > { %4348 = vmatprep.subr.bf16.mxu1 %v7767_v27  ;;  %v2693_v7 = vpop.f32.mrf.mxu0 }
 0x1fd   : > { %v2792_v13 = vmax.f32 %v2690_v49, 0.0  ;;  %v9437_v16 = vpack.c.bf16 %v2791_v28, %v2786_v36  ;;  %v2694_v17 = vadd.f32 %v2693_v7, %v9347_v4  ;;  %v7779_v4 = vld [vmem:[%s11562_s5 + $0x6c] ss:$24 sps:$4 sm:$0xff]   ;;  %v7785_v7 = vld [vmem:[%s11562_s5 + $0x3c] ss:$24 sps:$4 sm:$0xff]  }
 0x1fe   : > { %v2695_v5 = vpop.f32.mrf.mxu0 }
 0x1ff   : > { %4349 = vmatpush1.bf16.msra.mxu1 %v7765_v2  ;;  %v9445_v61 = vpack.c.bf16 %v2792_v13, %v2787_v41  ;;  %v2696_v25 = vadd.f32 %v2695_v5, %v9355_v10  ;;  %v2796_v55 = vmax.f32 %v2694_v17, 0.0  ;;  %v7777_v10 = vld [vmem:[%s11562_s5 + $0x68] ss:$24 sps:$4 sm:$0xff]  }
 0x200   : > { %4350 = vmatprep.subr.bf16.mxu1 %v7773_v12  ;;  %v2697_v30 = vpop.f32.mrf.mxu0 }
 0x201   : > { %v2734_v27 = vpop.f32.mrf.mxu1  ;;  %4252 = vmatprep.mubr.bf16.mxu1 %v9445_v61  ;;  %v2797_v36 = vmax.f32 %v2696_v25, 0.0  ;;  %v9467_v13 = vpack.c.bf16 %v2796_v55, %v2796_v55  ;;  %v7791_v55 = vld [vmem:[%s11562_s5 + $0xc] ss:$24 sps:$4 sm:$0xff]  }
 0x202   : > { %4253 = vmatmul.mubr.bf16.gmra.mxu1 %v9437_v16  ;;  %v2698_v41 = vpop.f32.mrf.mxu0  ;;  %v2735_v28 = vadd.f32 %v2734_v27, %v9443_v19 }
 0x203   : > { %v2736_v37 = vpop.f32.mrf.mxu1  ;;  %v9457_v49 = vpack.c.bf16 %v2797_v36, %v2797_v36  ;;  %4351 = vmatpush1.bf16.msra.mxu1 %v7771_v24  ;;  %v7783_v24 = vld [vmem:[%s11562_s5 + $0x38] ss:$24 sps:$4 sm:$0xff]  }
 0x204   : > { %4352 = vmatprep.subr.bf16.mxu1 %v7779_v4  ;;  %v2768_v5 = vmax.f32 %v2735_v28, 0.0  ;;  %v7786_v4 = vld [vmem:[%s11562_s5 + $0x458] ss:$24 sps:$4 sm:$0xff]   ;;  %v7794_v37 = vld [vmem:[%s11562_s5 + $0x42c] ss:$24 sps:$4 sm:$0xff]  }
 0x205   : > { %v2737_v2 = vpop.f32.mrf.mxu1  ;;  %4262 = vmatprep.mubr.bf16.mxu1 %v9457_v49  ;;  %v7789_v28 = vld [vmem:[%s11562_s5 + $0x8] ss:$24 sps:$4 sm:$0xff]  }
 0x206   : > { %v2738_v12 = vadd.f32 %v2737_v2, %v9443_v19  ;;  %v7792_v2 = vld [vmem:[%s11562_s5 + $0x428] ss:$24 sps:$4 sm:$0xff]  }
 0x207   : > { %v2739_v17 = vpop.f32.mrf.mxu1  ;;  %4353 = vmatpush1.bf16.msra.mxu1 %v7777_v10 }
 0x208   : > { %v2773_v25 = vmax.f32 %v2738_v12, 0.0  ;;  %4354 = vmatprep.subr.bf16.mxu1 %v7785_v7  ;;  %v7797_v7 = vld [vmem:[%s11562_s5 + $0x2dc] ss:$24 sps:$4 sm:$0xff]  }
 0x209   : > { %v2742_v27 = vpop.f32.mrf.mxu1 }
 0x20a   : > { %v9475_v30 = vpack.c.bf16 %v2773_v25, %v2768_v5  ;;  %v2743_v36 = vadd.f32 %v2742_v27, %v9443_v19  ;;  %4263 = vmatmul.mubr.bf16.gmra.mxu1 %v9467_v13  ;;  %v7800_v5 = vld [vmem:[%s11562_s5 + $0x3fc] ss:$24 sps:$4 sm:$0xff]   ;;  %v7795_v27 = vld [vmem:[%s11562_s5 + $0x2d8] ss:$24 sps:$4 sm:$0xff]  }
 0x20b   : > { %v2744_v41 = vpop.f32.mrf.mxu1  ;;  %4355 = vmatpush1.bf16.msra.mxu1 %v7783_v24  ;;  %4374 = vmatprep.mubr.bf16.mxu1 %v9319_v22 }
 0x20c   : > { %7020 = vmatmul.mubr.msk.bf16.vlgmr.msra.gmra.mxu0 %vm4097_vm4, %v9475_v30  ;;  %v2778_v12 = vmax.f32 %v2743_v36, 0.0  ;;  %4356 = vmatprep.subr.bf16.mxu1 %v7791_v55  ;;  %v7798_v36 = vld [vmem:[%s11562_s5 + $0x3f8] ss:$24 sps:$4 sm:$0xff]   ;;  %v7803_v55 = vld [vmem:[%s11562_s5 + $0x2ac] ss:$24 sps:$4 sm:$0xff]  }
 0x20d   : > { %4414 = vmatpush1.bf16.msra.mxu0 %v7786_v4  ;;  %v2745_v10 = vpop.f32.mrf.mxu1  ;;  %4313 = vmatprep.mubr.bf16.mxu0 %v8017_v15 }
 0x20e   : > { %v2746_v17 = vadd.f32 %v2745_v10, %v9443_v19  ;;  %4415 = vmatprep.subr.bf16.mxu0 %v7794_v37 }
 0x20f   : > { %v2747_v25 = vpop.f32.mrf.mxu1  ;;  %4357 = vmatpush1.bf16.msra.mxu1 %v7789_v28  ;;  %v7806_v28 = vld [vmem:[%s11562_s5 + $0x3cc] ss:$24 sps:$4 sm:$0xff]  }
 0x210   : > { %v2783_v24 = vmax.f32 %v2746_v17, 0.0  ;;  %4358 = vmatprep.subr.bf16.mxu1 %v7797_v7  ;;  %v7809_v17 = vld [vmem:[%s11562_s5 + $0x27c] ss:$24 sps:$4 sm:$0xff]  }
 0x211   : > { %4416 = vmatpush1.bf16.msra.mxu0 %v7792_v2  ;;  %v2750_v4 = vpop.f32.mrf.mxu1  ;;  %v7801_v2 = vld [vmem:[%s11562_s5 + $0x2a8] ss:$24 sps:$4 sm:$0xff]  }
 0x212   : > { %v9511_v37 = vpack.c.bf16 %v2783_v24, %v2778_v12  ;;  %v2751_v41 = vadd.f32 %v2750_v4, %v9443_v19  ;;  %4417 = vmatprep.subr.bf16.mxu0 %v7800_v5  ;;  %v7804_v12 = vld [vmem:[%s11562_s5 + $0x3c8] ss:$24 sps:$4 sm:$0xff]   ;;  %v7812_v24 = vld [vmem:[%s11562_s5 + $0x39c] ss:$24 sps:$4 sm:$0xff]  }
 0x213   : > { %v2752_v10 = vpop.f32.mrf.mxu1  ;;  %4359 = vmatpush2.bf16.msra.mxu1 %v7795_v27 }
 0x214   : > { %7021 = vmatmul.mubr.msk.bf16.gmra.mxu0 %vm4097_vm4, %v9511_v37  ;;  %4360 = vmatprep.subr.bf16.mxu1 %v7803_v55  ;;  %v2788_v5 = vmax.f32 %v2751_v41, 0.0  ;;  %v7810_v55 = vld [vmem:[%s11562_s5 + $0x398] ss:$24 sps:$4 sm:$0xff]  }
 0x215   : > { %4418 = vmatpush1.bf16.msra.mxu0 %v7798_v36  ;;  %v2753_v7 = vpop.f32.mrf.mxu1  ;;  %4323 = vmatprep.mubr.bf16.mxu0 %v8017_v15  ;;  %v7807_v36 = vld [vmem:[%s11562_s5 + $0x278] ss:$24 sps:$4 sm:$0xff]  }
 0x216   : > { %v2754_v25 = vadd.f32 %v2753_v7, %v9443_v19  ;;  %4419 = vmatprep.subr.bf16.mxu0 %v7806_v28  ;;  %v7815_v28 = vld [vmem:[%s11562_s5 + $0x24c] ss:$24 sps:$4 sm:$0xff]  }
 0x217   : > { %v2755_v27 = vpop.f32.mrf.mxu1  ;;  %4361 = vmatpush2.bf16.msra.mxu1 %v7801_v2  ;;  %v7818_v7 = vld [vmem:[%s11562_s5 + $0x36c] ss:$24 sps:$4 sm:$0xff]  }
 0x218   : > { %v2793_v4 = vmax.f32 %v2754_v25, 0.0  ;;  %4362 = vmatprep.subr.bf16.mxu1 %v7809_v17  ;;  %v7813_v25 = vld [vmem:[%s11562_s5 + $0x248] ss:$24 sps:$4 sm:$0xff]   ;;  %v7824_v27 = vld [vmem:[%s11562_s5 + $0x33c] ss:$24 sps:$4 sm:$0xff]  }
 0x219   : > { %4420 = vmatpush1.bf16.msra.mxu0 %v7804_v12  ;;  %v2758_v41 = vpop.f32.mrf.mxu1 }
 0x21a   : > { %v9542_v10 = vpack.c.bf16 %v2793_v4, %v2788_v5  ;;  %4421 = vmatprep.subr.bf16.mxu0 %v7812_v24  ;;  %v2759_v2 = vadd.f32 %v2758_v41, %v9443_v19  ;;  %v7816_v19 = vld [vmem:[%s11562_s5 + $0x368] ss:$24 sps:$4 sm:$0xff]   ;;  %v7821_v5 = vld [vmem:[%s11562_s5 + $0x21c] ss:$24 sps:$4 sm:$0xff]   ;;  %v7822_v41 = vld [vmem:[%s11562_s5 + $0x338] ss:$24 sps:$4 sm:$0xff]  }
 0x21b   : > { %v2760_v12 = vpop.f32.mrf.mxu1  ;;  %4363 = vmatpush2.bf16.msra.mxu1 %v7807_v36 }
 0x21c   : > { %7022 = vmatmul.mubr.msk.bf16.gmra.mxu0 %vm4097_vm4, %v9542_v10  ;;  %v2798_v17 = vmax.f32 %v2759_v2, 0.0  ;;  %4364 = vmatprep.subr.bf16.mxu1 %v7815_v28  ;;  %v7827_v28 = vld [vmem:[%s11562_s5 + $0x1ec] ss:$24 sps:$4 sm:$0xff]   ;;  %v7828_v12 = vld [vmem:[%s11562_s5 + $0x308] ss:$24 sps:$4 sm:$0xff]  }
 0x21d   : > { %4422 = vmatpush1.bf16.msra.mxu0 %v7810_v55  ;;  %v2761_v24 = vpop.f32.mrf.mxu1  ;;  %4333 = vmatprep.mubr.bf16.mxu0 %v8017_v15  ;;  %v7819_v55 = vld [vmem:[%s11562_s5 + $0x218] ss:$24 sps:$4 sm:$0xff]   ;;  %v7830_v2 = vld [vmem:[%s11562_s5 + $0x30c] ss:$24 sps:$4 sm:$0xff]  }
 0x21e   : > { %4423 = vmatprep.subr.bf16.mxu0 %v7818_v7  ;;  %v9563_v36 = vpack.c.bf16 %v2798_v17, %v2798_v17  ;;  %v7825_v7 = vld [vmem:[%s11562_s5 + $0x1e8] ss:$24 sps:$4 sm:$0xff]   ;;  %v7833_v17 = vld [vmem:[%s11562_s5 + $0x1bc] ss:$24 sps:$4 sm:$0xff]   ;;  %v7839_v24 = vld [vmem:[%s11562_s5 + $0x18c] ss:$24 sps:$4 sm:$0xff]  }
 0x21f   : > { %v2762_v4 = vpop.f32.mrf.mxu1  ;;  %4365 = vmatpush2.bf16.msra.mxu1 %v7813_v25  ;;  %v7836_v25 = vld [vmem:[%s11562_s5 + $0x5dc] ss:$24 sps:$4 sm:$0xff]  }
 0x220   : > { %4366 = vmatprep.subr.bf16.mxu1 %v7821_v5  ;;  %v7834_v5 = vld [vmem:[%s11562_s5 + $0x5d8] ss:$24 sps:$4 sm:$0xff]  }
 0x221   : > { %4424 = vmatpush1.bf16.msra.mxu0 %v7816_v19  ;;  %v7831_v19 = vld [vmem:[%s11562_s5 + $0x1b8] ss:$24 sps:$4 sm:$0xff]  }
 0x222   : > { %4425 = vmatprep.subr.bf16.mxu0 %v7824_v27  ;;  %v7842_v27 = vld [vmem:[%s11562_s5 + $0x5ac] ss:$24 sps:$4 sm:$0xff]   ;;  %v3030_v4 = vld [vmem:[%s11562_s5 + $0x698] sm:$0x33] }
 0x223   : > { %4367 = vmatpush2.bf16.msra.mxu1 %v7819_v55  ;;  %v7837_v55 = vld [vmem:[%s11562_s5 + $0x188] ss:$24 sps:$4 sm:$0xff]  }
 0x224   : > { %7023 = vmatmul.mubr.msk.bf16.gmra.mxu0 %vm4097_vm4, %v9563_v36  ;;  %4368 = vmatprep.subr.bf16.mxu1 %v7827_v28  ;;  %v7016_v28 = vcombine.high %v3030_v4, %v3030_v4 }
 0x225   : > { %4426 = vmatpush1.bf16.msra.mxu0 %v7822_v41  ;;  %4445 = vmatprep.mubr.bf16.mxu0 %v9391_v29  ;;  %v7840_v41 = vld [vmem:[%s11562_s5 + $0x5a8] ss:$24 sps:$4 sm:$0xff]  }
 0x226   : > { %4427 = vmatprep.subr.bf16.mxu0 %v7830_v2  ;;  %v7015_v2 = vcombine.low %v3030_v4, %v3030_v4  ;;  %v7851_v4 = vld [vmem:[%s11562_s5 + $0x51c] ss:$24 sps:$4 sm:$0xff]  }
 0x227   : > { %4369 = vmatpush2.bf16.msra.mxu1 %v7825_v7  ;;  %v7845_v7 = vld [vmem:[%s11562_s5 + $0x57c] ss:$24 sps:$4 sm:$0xff]  }
 0x228   : > { %4370 = vmatprep.subr.bf16.mxu1 %v7833_v17  ;;  %v4118_v17 = vsel %vm4110_vm3, %v7015_v2, 0  ;;  %v7854_v2 = vld [vmem:[%s11562_s5 + $0x4ec] ss:$24 sps:$4 sm:$0xff]  }
 0x229   : > { %4428 = vmatpush1.bf16.msra.mxu0 %v7828_v12  ;;  %v7843_v12 = vld [vmem:[%s11562_s5 + $0x578] ss:$24 sps:$4 sm:$0xff]  }
 0x22a   : > { %4429 = vmatprep.subr.bf16.mxu0 %v7836_v25  ;;  %v7862_v25 = vld [vmem:[%s11562_s5 + $0x66c] ss:$24 sps:$4 sm:$0xff]  }
 0x22b   : > { %4371 = vmatpush2.bf16.msra.mxu1 %v7831_v19  ;;  %v7848_v19 = vld [vmem:[%s11562_s5 + $0x54c] ss:$24 sps:$4 sm:$0xff]  }
 0x22c   : > { %4372 = vmatprep.subr.bf16.mxu1 %v7839_v24  ;;  %v7846_v24 = vld [vmem:[%s11562_s5 + $0x548] ss:$24 sps:$4 sm:$0xff]  }
 0x22d   : > { %4430 = vmatpush2.bf16.msra.mxu0 %v7834_v5  ;;  %v7860_v5 = vld [vmem:[%s11562_s5 + $0x668] ss:$24 sps:$4 sm:$0xff]  }
 0x22e   : > { %4431 = vmatprep.subr.bf16.mxu0 %v7842_v27  ;;  %v7868_v27 = vld [vmem:[%s11562_s5 + $0x63c] ss:$24 sps:$4 sm:$0xff]  }
 0x22f   : > { %4373 = vmatpush2.bf16.msra.mxu1 %v7837_v55  ;;  %v7866_v55 = vld [vmem:[%s11562_s5 + $0x638] ss:$24 sps:$4 sm:$0xff]  }
 0x230   : > { %7024 = vmatprep.subr.msk.bf16.mxu1 %vm4110_vm3, %v7016_v28  ;;  %v7874_v28 = vld [vmem:[%s11562_s5 + $0x60c] ss:$24 sps:$4 sm:$0xff]  }
 0x231   : > { %4432 = vmatpush2.bf16.msra.mxu0 %v7840_v41  ;;  %v7849_v41 = vld [vmem:[%s11562_s5 + $0x518] ss:$24 sps:$4 sm:$0xff]  }
 0x232   : > { %4433 = vmatprep.subr.bf16.mxu0 %v7845_v7  ;;  %4375 = vmatmul.mubr.bf16.vlgmr.msra.gmra.mxu1 %v9321_v23  ;;  %v7872_v7 = vld [vmem:[%s11562_s5 + $0x608] ss:$24 sps:$4 sm:$0xff]  }
 0x233   : > { %4384 = vmatprep.mubr.bf16.mxu1 %v9350_v8  ;;  %4493 = vmatpush1.bf16.msra.mxu1 %v4118_v17  ;;  %v7880_v17 = vld [vmem:[%s11562_s5 + $0x464] ss:$24 sps:$4 sm:$0xff]  }
 0x234   : > { %4494 = vmatprep.subr.bf16.mxu1 %v7862_v25  ;;  %v7859_v25 = vld [vmem:[%s11562_s5 + $0x4bc] ss:$24 sps:$4 sm:$0xff]  }
 0x235   : > { %4434 = vmatpush2.bf16.msra.mxu0 %v7843_v12  ;;  %v7852_v12 = vld [vmem:[%s11562_s5 + $0x4e8] ss:$24 sps:$4 sm:$0xff]  }
 0x236   : > { %4435 = vmatprep.subr.bf16.mxu0 %v7848_v19  ;;  %v7857_v19 = vld [vmem:[%s11562_s5 + $0x4b8] ss:$24 sps:$4 sm:$0xff]  }
 0x237   : > { %4495 = vmatpush1.bf16.msra.mxu1 %v7860_v5  ;;  %v7865_v5 = vld [vmem:[%s11562_s5 + $0x48c] ss:$24 sps:$4 sm:$0xff]  }
 0x238   : > { %4496 = vmatprep.subr.bf16.mxu1 %v7868_v27  ;;  %v7871_v27 = vld [vmem:[%s11562_s5 + $0x164] ss:$24 sps:$4 sm:$0xff]  }
 0x239   : > { %4436 = vmatpush2.bf16.msra.mxu0 %v7846_v24  ;;  %v7863_v24 = vld [vmem:[%s11562_s5 + $0x488] ss:$24 sps:$4 sm:$0xff]  }
 0x23a   : > { %4437 = vmatprep.subr.bf16.mxu0 %v7851_v4  ;;  %4385 = vmatmul.mubr.bf16.gmra.mxu1 %v9341_v1  ;;  %v7869_v4 = vld [vmem:[%s11562_s5 + $0x160] ss:$24 sps:$4 sm:$0xff]  }
 0x23b   : > { %4394 = vmatprep.mubr.bf16.mxu1 %v9380_v14  ;;  %4497 = vmatpush1.bf16.msra.mxu1 %v7866_v55  ;;  %v7877_v55 = vld [vmem:[%s11562_s5 + $0x134] ss:$24 sps:$4 sm:$0xff]  }
 0x23c   : > { %4498 = vmatprep.subr.bf16.mxu1 %v7874_v28  ;;  %v7883_v28 = vld [vmem:[%s11562_s5 + $0x104] ss:$24 sps:$4 sm:$0xff]  }
 0x23d   : > { %4438 = vmatpush2.bf16.msra.mxu0 %v7849_v41  ;;  %v7875_v41 = vld [vmem:[%s11562_s5 + $0x130] ss:$24 sps:$4 sm:$0xff]  }
 0x23e   : > { %4439 = vmatprep.subr.bf16.mxu0 %v7854_v2  ;;  %v7878_v2 = vld [vmem:[%s11562_s5 + $0x460] ss:$24 sps:$4 sm:$0xff]  }
 0x23f   : > { %4499 = vmatpush1.bf16.msra.mxu1 %v7872_v7  ;;  %v7881_v7 = vld [vmem:[%s11562_s5 + $0x100] ss:$24 sps:$4 sm:$0xff]  }
 0x240   : > { %4626 = vmatprep.subr.bf16.mxu1 %v7880_v17  ;;  %v7889_v17 = vld [vmem:[%s11562_s5 + $0xd4] ss:$24 sps:$4 sm:$0xff]  }
 0x241   : > { %4440 = vmatpush2.bf16.msra.mxu0 %v7852_v12  ;;  %v7886_v12 = vld [vmem:[%s11562_s5 + $0x434] ss:$24 sps:$4 sm:$0xff]  }
 0x242   : > { %4441 = vmatprep.subr.bf16.mxu0 %v7859_v25  ;;  %4395 = vmatmul.mubr.bf16.gmra.mxu1 %v9376_v48  ;;  %v7884_v25 = vld [vmem:[%s11562_s5 + $0x430] ss:$24 sps:$4 sm:$0xff]  }
 0x243   : > { %4404 = vmatprep.mubr.bf16.mxu1 %v9389_v60 }
 0x245   : > { %4442 = vmatpush2.bf16.msra.mxu0 %v7857_v19  ;;  %v7887_v19 = vld [vmem:[%s11562_s5 + $0xd0] ss:$24 sps:$4 sm:$0xff]  }
 0x246   : > { %4443 = vmatprep.subr.bf16.mxu0 %v7865_v5  ;;  %v7892_v5 = vld [vmem:[%s11562_s5 + $0x404] ss:$24 sps:$4 sm:$0xff]  }
 0x249   : > { %4444 = vmatpush2.bf16.msra.mxu0 %v7863_v24  ;;  %v7895_v24 = vld [vmem:[%s11562_s5 + $0xa4] ss:$24 sps:$4 sm:$0xff]  }
 0x24a   : > { %4555 = vmatprep.subr.bf16.mxu0 %v7871_v27  ;;  %4405 = vmatmul.mubr.bf16.gmra.mxu1 %v9402_v45  ;;  %v7890_v27 = vld [vmem:[%s11562_s5 + $0x400] ss:$24 sps:$4 sm:$0xff]  }
 0x24b   : > { %4516 = vmatprep.mubr.bf16.mxu1 %v8017_v15 }
 0x24c   : > { %4446 = vmatmul.mubr.bf16.vlgmr.msra.gmra.mxu0 %v9384_v20 }
 0x24d   : > { %4455 = vmatprep.mubr.bf16.mxu0 %v9417_v26  ;;  %4556 = vmatpush1.bf16.msra.mxu0 %v7869_v4  ;;  %v7893_v4 = vld [vmem:[%s11562_s5 + $0xa0] ss:$24 sps:$4 sm:$0xff]  }
 0x24e   : > { %4557 = vmatprep.subr.bf16.mxu0 %v7877_v55  ;;  %v7898_v55 = vld [vmem:[%s11562_s5 + $0x3d4] ss:$24 sps:$4 sm:$0xff]  }
 0x251   : > { %4558 = vmatpush1.bf16.msra.mxu0 %v7875_v41  ;;  %v7901_v41 = vld [vmem:[%s11562_s5 + $0x74] ss:$24 sps:$4 sm:$0xff]  }
 0x252   : > { %4559 = vmatprep.subr.bf16.mxu0 %v7883_v28  ;;  %7025 = vmatmul.mubr.msk.bf16.vlgmr.msra.gmra.mxu1 %vm4097_vm4, %v9475_v30  ;;  %v7896_v28 = vld [vmem:[%s11562_s5 + $0x3d0] ss:$24 sps:$4 sm:$0xff]  }
 0x253   : > { %4627 = vmatpush1.bf16.msra.mxu1 %v7878_v2  ;;  %4526 = vmatprep.mubr.bf16.mxu1 %v8017_v15  ;;  %v7899_v2 = vld [vmem:[%s11562_s5 + $0x70] ss:$24 sps:$4 sm:$0xff]  }
 0x254   : > { %4456 = vmatmul.mubr.bf16.gmra.mxu0 %v9412_v21  ;;  %4628 = vmatprep.subr.bf16.mxu1 %v7886_v12  ;;  %v7907_v12 = vld [vmem:[%s11562_s5 + $0x44] ss:$24 sps:$4 sm:$0xff]  }
 0x255   : > { %4465 = vmatprep.mubr.bf16.mxu0 %v9445_v61  ;;  %4560 = vmatpush1.bf16.msra.mxu0 %v7881_v7  ;;  %v7904_v7 = vld [vmem:[%s11562_s5 + $0x3a4] ss:$24 sps:$4 sm:$0xff]  }
 0x256   : > { %4561 = vmatprep.subr.bf16.mxu0 %v7889_v17  ;;  %v7902_v17 = vld [vmem:[%s11562_s5 + $0x3a0] ss:$24 sps:$4 sm:$0xff]  }
 0x257   : > { %4629 = vmatpush1.bf16.msra.mxu1 %v7884_v25  ;;  %v7905_v25 = vld [vmem:[%s11562_s5 + $0x40] ss:$24 sps:$4 sm:$0xff]  }
 0x258   : > { %4630 = vmatprep.subr.bf16.mxu1 %v7892_v5  ;;  %v7913_v5 = vld [vmem:[%s11562_s5 + $0x14] ss:$24 sps:$4 sm:$0xff]  }
 0x259   : > { %4562 = vmatpush1.bf16.msra.mxu0 %v7887_v19  ;;  %v7910_v19 = vld [vmem:[%s11562_s5 + $0x374] ss:$24 sps:$4 sm:$0xff]  }
 0x25a   : > { %4563 = vmatprep.subr.bf16.mxu0 %v7895_v24  ;;  %7026 = vmatmul.mubr.msk.bf16.gmra.mxu1 %vm4097_vm4, %v9511_v37  ;;  %v7908_v24 = vld [vmem:[%s11562_s5 + $0x370] ss:$24 sps:$4 sm:$0xff]  }
 0x25b   : > { %4631 = vmatpush1.bf16.msra.mxu1 %v7890_v27  ;;  %4536 = vmatprep.mubr.bf16.mxu1 %v8017_v15  ;;  %v7911_v27 = vld [vmem:[%s11562_s5 + $0x10] ss:$24 sps:$4 sm:$0xff]  }
 0x25c   : > { %4466 = vmatmul.mubr.bf16.gmra.mxu0 %v9437_v16  ;;  %4632 = vmatprep.subr.bf16.mxu1 %v7898_v55  ;;  %v7919_v55 = vld [vmem:[%s11562_s5 + $0x2e4] ss:$24 sps:$4 sm:$0xff]  }
 0x25d   : > { %4475 = vmatprep.mubr.bf16.mxu0 %v9457_v49  ;;  %4564 = vmatpush1.bf16.msra.mxu0 %v7893_v4  ;;  %v7916_v4 = vld [vmem:[%s11562_s5 + $0x344] ss:$24 sps:$4 sm:$0xff]  }
 0x25e   : > { %4565 = vmatprep.subr.bf16.mxu0 %v7901_v41  ;;  %v7917_v41 = vld [vmem:[%s11562_s5 + $0x2e0] ss:$24 sps:$4 sm:$0xff]  }
 0x25f   : > { %4633 = vmatpush1.bf16.msra.mxu1 %v7896_v28  ;;  %v7922_v28 = vld [vmem:[%s11562_s5 + $0x314] ss:$24 sps:$4 sm:$0xff]  }
 0x260   : > { %4634 = vmatprep.subr.bf16.mxu1 %v7904_v7  ;;  %v7920_v7 = vld [vmem:[%s11562_s5 + $0x310] ss:$24 sps:$4 sm:$0xff]  }
 0x261   : > { %4566 = vmatpush1.bf16.msra.mxu0 %v7899_v2  ;;  %v7925_v2 = vld [vmem:[%s11562_s5 + $0x2b4] ss:$24 sps:$4 sm:$0xff]  }
 0x262   : > { %4567 = vmatprep.subr.bf16.mxu0 %v7907_v12  ;;  %7027 = vmatmul.mubr.msk.bf16.gmra.mxu1 %vm4097_vm4, %v9542_v10  ;;  %v7923_v12 = vld [vmem:[%s11562_s5 + $0x2b0] ss:$24 sps:$4 sm:$0xff]  }
 0x263   : > { %4635 = vmatpush1.bf16.msra.mxu1 %v7902_v17  ;;  %4546 = vmatprep.mubr.bf16.mxu1 %v8017_v15  ;;  %v7928_v17 = vld [vmem:[%s11562_s5 + $0x5e4] ss:$24 sps:$4 sm:$0xff]  }
 0x264   : > { %4476 = vmatmul.mubr.bf16.gmra.mxu0 %v9467_v13  ;;  %4636 = vmatprep.subr.bf16.mxu1 %v7910_v19  ;;  %v7929_v19 = vld [vmem:[%s11562_s5 + $0x280] ss:$24 sps:$4 sm:$0xff]  }
 0x265   : > { %4568 = vmatpush1.bf16.msra.mxu0 %v7905_v25  ;;  %4587 = vmatprep.mubr.bf16.mxu0 %v9319_v22  ;;  %v7914_v22 = vld [vmem:[%s11562_s5 + $0x340] ss:$24 sps:$4 sm:$0xff]   ;;  %v7931_v25 = vld [vmem:[%s11562_s5 + $0x284] ss:$24 sps:$4 sm:$0xff]  }
 0x266   : > { %4569 = vmatprep.subr.bf16.mxu0 %v7913_v5  ;;  %v7934_v5 = vld [vmem:[%s11562_s5 + $0x5b4] ss:$24 sps:$4 sm:$0xff]  }
 0x267   : > { %4637 = vmatpush1.bf16.msra.mxu1 %v7908_v24  ;;  %v7937_v24 = vld [vmem:[%s11562_s5 + $0x254] ss:$24 sps:$4 sm:$0xff]  }
 0x268   : > { %4638 = vmatprep.subr.bf16.mxu1 %v7916_v4  ;;  %v7935_v4 = vld [vmem:[%s11562_s5 + $0x250] ss:$24 sps:$4 sm:$0xff]  }
 0x269   : > { %4570 = vmatpush1.bf16.msra.mxu0 %v7911_v27  ;;  %v7932_v27 = vld [vmem:[%s11562_s5 + $0x5b0] ss:$24 sps:$4 sm:$0xff]  }
 0x26a   : > { %4571 = vmatprep.subr.bf16.mxu0 %v7919_v55  ;;  %7028 = vmatmul.mubr.msk.bf16.gmra.mxu1 %vm4097_vm4, %v9563_v36  ;;  %v7940_v55 = vld [vmem:[%s11562_s5 + $0x584] ss:$24 sps:$4 sm:$0xff]  }
 0x26b   : > { %4639 = vmatpush1.bf16.msra.mxu1 %v7914_v22  ;;  %4658 = vmatprep.mubr.bf16.mxu1 %v9391_v29  ;;  %v7926_v29 = vld [vmem:[%s11562_s5 + $0x5e0] ss:$24 sps:$4 sm:$0xff]   ;;  %v7943_v22 = vld [vmem:[%s11562_s5 + $0x224] ss:$24 sps:$4 sm:$0xff]  }
 0x26c   : > { %4640 = vmatprep.subr.bf16.mxu1 %v7922_v28  ;;  %v7941_v28 = vld [vmem:[%s11562_s5 + $0x220] ss:$24 sps:$4 sm:$0xff]  }
 0x26d   : > { %4572 = vmatpush2.bf16.msra.mxu0 %v7917_v41  ;;  %v7938_v41 = vld [vmem:[%s11562_s5 + $0x580] ss:$24 sps:$4 sm:$0xff]  }
 0x26e   : > { %4573 = vmatprep.subr.bf16.mxu0 %v7925_v2  ;;  %v7946_v2 = vld [vmem:[%s11562_s5 + $0x554] ss:$24 sps:$4 sm:$0xff]  }
 0x26f   : > { %4641 = vmatpush1.bf16.msra.mxu1 %v7920_v7  ;;  %v7949_v7 = vld [vmem:[%s11562_s5 + $0x1f4] ss:$24 sps:$4 sm:$0xff]  }
 0x270   : > { %4642 = vmatprep.subr.bf16.mxu1 %v7928_v17  ;;  %v7947_v17 = vld [vmem:[%s11562_s5 + $0x1f0] ss:$24 sps:$4 sm:$0xff]  }
 0x271   : > { %4574 = vmatpush2.bf16.msra.mxu0 %v7923_v12  ;;  %v7944_v12 = vld [vmem:[%s11562_s5 + $0x550] ss:$24 sps:$4 sm:$0xff]  }
 0x272   : > { %4575 = vmatprep.subr.bf16.mxu0 %v7931_v25  ;;  %v7952_v25 = vld [vmem:[%s11562_s5 + $0x524] ss:$24 sps:$4 sm:$0xff]  }
 0x273   : > { %4643 = vmatpush2.bf16.msra.mxu1 %v7926_v29  ;;  %v7955_v29 = vld [vmem:[%s11562_s5 + $0x1c4] ss:$24 sps:$4 sm:$0xff]  }
 0x274   : > { %4644 = vmatprep.subr.bf16.mxu1 %v7934_v5  ;;  %v7953_v5 = vld [vmem:[%s11562_s5 + $0x1c0] ss:$24 sps:$4 sm:$0xff]  }
 0x275   : > { %4576 = vmatpush2.bf16.msra.mxu0 %v7929_v19  ;;  %v7950_v19 = vld [vmem:[%s11562_s5 + $0x520] ss:$24 sps:$4 sm:$0xff]  }
 0x276   : > { %4577 = vmatprep.subr.bf16.mxu0 %v7937_v24  ;;  %v7958_v24 = vld [vmem:[%s11562_s5 + $0x4f4] ss:$24 sps:$4 sm:$0xff]  }
 0x277   : > { %4645 = vmatpush2.bf16.msra.mxu1 %v7932_v27  ;;  %v7961_v27 = vld [vmem:[%s11562_s5 + $0x194] ss:$24 sps:$4 sm:$0xff]  }
 0x278   : > { %4646 = vmatprep.subr.bf16.mxu1 %v7940_v55  ;;  %v7956_v55 = vld [vmem:[%s11562_s5 + $0x4f0] ss:$24 sps:$4 sm:$0xff]  }
 0x279   : > { %4578 = vmatpush2.bf16.msra.mxu0 %v7935_v4  ;;  %v3031_v4 = vld [vmem:[%s11562_s5 + $0x6a0] sm:$0x33] }
 0x27a   : > { %4579 = vmatprep.subr.bf16.mxu0 %v7943_v22  ;;  %v7959_v22 = vld [vmem:[%s11562_s5 + $0x190] ss:$24 sps:$4 sm:$0xff]  }
 0x27b   : > { %4647 = vmatpush2.bf16.msra.mxu1 %v7938_v41  ;;  %v7964_v41 = vld [vmem:[%s11562_s5 + $0x4c4] ss:$24 sps:$4 sm:$0xff]  }
 0x27c   : > { %4648 = vmatprep.subr.bf16.mxu1 %v7946_v2  ;;  %v7017_v2 = vcombine.low %v3031_v4, %v3031_v4 }
 0x27d   : > { %4580 = vmatpush2.bf16.msra.mxu0 %v7941_v28  ;;  %v7018_v28 = vcombine.high %v3031_v4, %v3031_v4 }
 0x27e   : > { %4581 = vmatprep.subr.bf16.mxu0 %v7949_v7  ;;  %v7962_v7 = vld [vmem:[%s11562_s5 + $0x4c0] ss:$24 sps:$4 sm:$0xff]  }
 0x27f   : > { %4649 = vmatpush2.bf16.msra.mxu1 %v7944_v12  ;;  %v7967_v12 = vld [vmem:[%s11562_s5 + $0x494] ss:$24 sps:$4 sm:$0xff]  }
 0x280   : > { %4650 = vmatprep.subr.bf16.mxu1 %v7952_v25  ;;  %v7972_v25 = vld [vmem:[%s11562_s5 + $0x674] ss:$24 sps:$4 sm:$0xff]  }
 0x281   : > { %4582 = vmatpush2.bf16.msra.mxu0 %v7947_v17  ;;  %v4124_v17 = vsel %vm4110_vm3, %v7017_v2, 0 }
 0x282   : > { %4583 = vmatprep.subr.bf16.mxu0 %v7955_v29  ;;  %v7965_v29 = vld [vmem:[%s11562_s5 + $0x490] ss:$24 sps:$4 sm:$0xff]  }
 0x283   : > { %4651 = vmatpush2.bf16.msra.mxu1 %v7950_v19  ;;  %v7970_v19 = vld [vmem:[%s11562_s5 + $0x670] ss:$24 sps:$4 sm:$0xff]  }
 0x284   : > { %4652 = vmatprep.subr.bf16.mxu1 %v7958_v24  ;;  %v7976_v24 = vld [vmem:[%s11562_s5 + $0x610] ss:$24 sps:$4 sm:$0xff]  }
 0x285   : > { %4584 = vmatpush2.bf16.msra.mxu0 %v7953_v5  ;;  %v7975_v5 = vld [vmem:[%s11562_s5 + $0x644] ss:$24 sps:$4 sm:$0xff]  }
 0x286   : > { %4585 = vmatprep.subr.bf16.mxu0 %v7961_v27 }
 0x287   : > { %4653 = vmatpush2.bf16.msra.mxu1 %v7956_v55 }
 0x288   : > { %4654 = vmatprep.subr.bf16.mxu1 %v7964_v41 }
 0x289   : > { %4586 = vmatpush2.bf16.msra.mxu0 %v7959_v22 }
 0x28a   : > { %7029 = vmatprep.subr.msk.bf16.mxu0 %vm4110_vm3, %v7018_v28 }
 0x28b   : > { %4655 = vmatpush2.bf16.msra.mxu1 %v7962_v7 }
 0x28c   : > { %4588 = vmatmul.mubr.bf16.vlgmr.msra.gmra.mxu0 %v9321_v23  ;;  %4656 = vmatprep.subr.bf16.mxu1 %v7967_v12  ;;  %v7973_v23 = vld [vmem:[%s11562_s5 + $0x640] ss:$24 sps:$4 sm:$0xff]  }
 0x28d   : > { %4597 = vmatprep.mubr.bf16.mxu0 %v9350_v8  ;;  %4706 = vmatpush1.bf16.msra.mxu0 %v4124_v17  ;;  %v7978_v8 = vld [vmem:[%s11562_s5 + $0x614] ss:$24 sps:$4 sm:$0xff]  }
 0x28e   : > { %4707 = vmatprep.subr.bf16.mxu0 %v7972_v25 }
 0x28f   : > { %4657 = vmatpush2.bf16.msra.mxu1 %v7965_v29 }
 0x291   : > { %4708 = vmatpush1.bf16.msra.mxu0 %v7970_v19 }
 0x292   : > { %4659 = vmatmul.mubr.bf16.vlgmr.msra.gmra.mxu1 %v9384_v20  ;;  %4709 = vmatprep.subr.bf16.mxu0 %v7975_v5 }
 0x293   : > { %4668 = vmatprep.mubr.bf16.mxu1 %v9417_v26 }
 0x294   : > { %4598 = vmatmul.mubr.bf16.gmra.mxu0 %v9341_v1 }
 0x295   : > { %4607 = vmatprep.mubr.bf16.mxu0 %v9380_v14  ;;  %4710 = vmatpush1.bf16.msra.mxu0 %v7973_v23 }
 0x296   : > { %4711 = vmatprep.subr.bf16.mxu0 %v7978_v8 }
 0x299   : > { %4712 = vmatpush1.bf16.msra.mxu0 %v7976_v24 }
 0x29a   : > { %4669 = vmatmul.mubr.bf16.gmra.mxu1 %v9412_v21 }
 0x29b   : > { %4678 = vmatprep.mubr.bf16.mxu1 %v9445_v61  ;;  %v11573_v61 = vmov 0.0  }
 0x29c   : > { %4608 = vmatmul.mubr.bf16.gmra.mxu0 %v9376_v48 }
 0x29d   : > { %4617 = vmatprep.mubr.bf16.mxu0 %v9389_v60 }
 0x29f   : > { %v9922_v20 = vpop.f32.mrf.mxu0 }
 0x2a1   : > { %v9924_v1 = vpop.f32.mrf.mxu0 }
 0x2a2   : > { %4679 = vmatmul.mubr.bf16.gmra.mxu1 %v9437_v16 }
 0x2a3   : > { %v9927_v14 = vpop.f32.mrf.mxu0  ;;  %4688 = vmatprep.mubr.bf16.mxu1 %v9457_v49 }
 0x2a4   : > { %4618 = vmatmul.mubr.bf16.gmra.mxu0 %v9402_v45 }
 0x2a5   : > { %v9931_v26 = vpop.f32.mrf.mxu0  ;;  %4729 = vmatprep.mubr.bf16.mxu0 %v8017_v15 }
 0x2a7   : > { %v9934_v21 = vpop.f32.mrf.mxu0 }
 0x2a9   : > { %v9936_v48 = vpop.f32.mrf.mxu0 }
 0x2aa   : > { %4689 = vmatmul.mubr.bf16.gmra.mxu1 %v9467_v13 }
 0x2ab   : > { %v9939_v60 = vpop.f32.mrf.mxu0  ;;  %5228 = vmatprep.mubr.f32.mxu1 %v11573_v61 }
 0x2ac   : > { %7030 = vmatmul.mubr.msk.bf16.vlgmr.msra.gmra.mxu0 %vm4097_vm4, %v9475_v30 }
 0x2ad   : > { %v9943_v16 = vpop.f32.mrf.mxu0  ;;  %4739 = vmatprep.mubr.bf16.mxu0 %v8017_v15 }
 0x2af   : > { %v4183_v45 = vpop.f32.mrf.mxu0 }
 0x2b1   : > { %v4185_v49 = vpop.f32.mrf.mxu0 }
 0x2b2   : > { %v9947_v4 = vpop.f32.mrf.mxu1 }
 0x2b3   : > { %v4187_v27 = vpop.f32.mrf.mxu0 }
 0x2b4   : > { %7031 = vmatmul.mubr.msk.bf16.gmra.mxu0 %vm4097_vm4, %v9511_v37  ;;  %v9951_v55 = vpop.f32.mrf.mxu1 }
 0x2b5   : > { %v4189_v13 = vpop.f32.mrf.mxu0  ;;  %4749 = vmatprep.mubr.bf16.mxu0 %v8017_v15 }
 0x2b6   : > { %v9954_v30 = vpop.f32.mrf.mxu1 }
 0x2b7   : > { %v4193_v22 = vpop.f32.mrf.mxu0 }
 0x2b8   : > { %v9956_v41 = vpop.f32.mrf.mxu1 }
 0x2b9   : > { %v4195_v28 = vpop.f32.mrf.mxu0 }
 0x2ba   : > { %v4244_v2 = vpop.f32.mrf.mxu1 }
 0x2bb   : > { %v4197_v7 = vpop.f32.mrf.mxu0 }
 0x2bc   : > { %7032 = vmatmul.mubr.msk.bf16.gmra.mxu0 %vm4097_vm4, %v9542_v10  ;;  %v4246_v12 = vpop.f32.mrf.mxu1 }
 0x2bd   : > { %v4198_v17 = vpop.f32.mrf.mxu0  ;;  %4759 = vmatprep.mubr.bf16.mxu0 %v8017_v15 }
 0x2be   : > { %v4248_v37 = vpop.f32.mrf.mxu1 }
 0x2c0   : > { %v4250_v25 = vpop.f32.mrf.mxu1 }
 0x2c2   : > { %v4254_v29 = vpop.f32.mrf.mxu1 }
 0x2c3   : > { %v4255_v32 = vadd.f32 %v4254_v29, %v4183_v45 }
 0x2c4   : > { %7033 = vmatmul.mubr.msk.bf16.gmra.mxu0 %vm4097_vm4, %v9563_v36  ;;  %v4256_v19 = vpop.f32.mrf.mxu1 }
 0x2c5   : > { %5084 = vmatprep.mubr.f32.mxu0 %v11573_v61 }
 0x2c6   : > { %v4258_v5 = vpop.f32.mrf.mxu1 }
 0x2c7   : > { %v4259_v11 = vadd.f32 %v4258_v5, %v4187_v27 }
 0x2c8   : > { %v4260_v23 = vpop.f32.mrf.mxu1 }
 0x2c9   : > { %v4261_v54 = vadd.f32 %v4260_v23, %v4189_v13 }
 0x2ca   : > { %v4264_v8 = vpop.f32.mrf.mxu1 }
 0x2cb   : > { %v4265_v39 = vadd.f32 %v4264_v8, %v4193_v22  ;;  %v10128_v8 = vld [vmem:[%s11563_s6 + $0xf0] sm:$0xff] }
 0x2cc   : > { %v9964_v24 = vpop.f32.mrf.mxu0  ;;  %v4266_v7 = vpop.f32.mrf.mxu1  ;;  %11642 = vst [vmem:[#allocation25_spill] sm:$0xff] %v10128_v8 }
 0x2cd   : > { %v4267_v59 = vadd.f32 %v4266_v7, %v4195_v28  ;;  %v4251_v28 = vadd.f32 %v4250_v25, %v9943_v16  ;;  %v10112_v25 = vld [vmem:[%s11563_s6 + $0x28] sm:$0xff] }
 0x2ce   : > { %v9966_v10 = vpop.f32.mrf.mxu0  ;;  %v4268_v17 = vpop.f32.mrf.mxu1  ;;  %11641 = vst [vmem:[#allocation24_spill] sm:$0xff] %v10112_v25 }
 0x2d0   : > { %v4309_v3 = vpop.f32.mrf.mxu0  ;;  %v4269_v15 = vpop.f32.mrf.mxu1 }
 0x2d1   : > { %v4257_v15 = vadd.f32 %v4256_v19, %v4185_v49  ;;  %v10070_v49 = vld [vmem:[%s11563_s6 + $0x18] sm:$0xff] }
 0x2d2   : > { %v4311_v6 = vpop.f32.mrf.mxu0  ;;  %11637 = vst [vmem:[#allocation20_spill] sm:$0xff] %v10070_v49 }
 0x2d4   : > { %v4315_v35 = vpop.f32.mrf.mxu0 }
 0x2d6   : > { %v4317_v53 = vpop.f32.mrf.mxu0 }
 0x2d8   : > { %v4319_v57 = vpop.f32.mrf.mxu0 }
 0x2da   : > { %v4321_v51 = vpop.f32.mrf.mxu0 }
 0x2dc   : > { %v4325_v36 = vpop.f32.mrf.mxu0 }
 0x2de   : > { %v4327_v50 = vpop.f32.mrf.mxu0 }
 0x2df   : > { %v4328_v13 = vadd.f32 %v4327_v50, %v4257_v15  ;;  %v4241_v50 = vadd.f32 %v9956_v41, %v9931_v26  ;;  %v10150_v15 = vld [vmem:[%s11563_s6 + $0xf8] sm:$0xff] }
 0x2e0   : > { %v4329_v46 = vpop.f32.mrf.mxu0  ;;  %11644 = vst [vmem:[#allocation27_spill] sm:$0xff] %v10150_v15 }
 0x2e1   : > { %v4330_v40 = vadd.f32 %v4329_v46, %v4259_v11  ;;  %v4245_v11 = vadd.f32 %v4244_v2, %v9934_v21 }
 0x2e2   : > { %v4331_v61 = vpop.f32.mrf.mxu0 }
 0x2e3   : > { %v4332_v9 = vadd.f32 %v4331_v61, %v4261_v54  ;;  %v4235_v54 = vadd.f32 %v9947_v4, %v9922_v20  ;;  %v10064_v61 = vld [vmem:[%s11563_s6 + $0xd8] sm:$0xff] }
 0x2e4   : > { %v4335_v44 = vpop.f32.mrf.mxu0  ;;  %11636 = vst [vmem:[#allocation19_spill] sm:$0xff] %v10064_v61 }
 0x2e5   : > { %v4336_v17 = vadd.f32 %v4335_v44, %v4265_v39  ;;  %v4247_v39 = vadd.f32 %v4246_v12, %v9936_v48  ;;  %v10044_v48 = vld [vmem:[%s11563_s6 + $0xd0] sm:$0xff] }
 0x2e6   : > { %v4337_v38 = vpop.f32.mrf.mxu0  ;;  %11635 = vst [vmem:[#allocation18_spill] sm:$0xff] %v10044_v48 }
 0x2e7   : > { %v4338_v43 = vadd.f32 %v4337_v38, %v4267_v59  ;;  %v4326_v38 = vadd.f32 %v4325_v36, %v4255_v32  ;;  %v4318_v46 = vadd.f32 %v4317_v53, %v4247_v39  ;;  %v4237_v32 = vadd.f32 %v9951_v55, %v9924_v1  ;;  %v10084_v55 = vld [vmem:[%s11563_s6 + $0xe0] sm:$0xff] }
 0x2e8   : > { %v4339_v18 = vpop.f32.mrf.mxu0  ;;  %v1791_v53 = vadd.f32 %v9165_v42, %v8994_v52  ;;  %v4306_v1 = vadd.f32 %v9964_v24, %v4235_v54  ;;  %11638 = vst [vmem:[#allocation21_spill] sm:$0xff] %v10084_v55  ;;  %v10134_v24 = vld [vmem:[%s11563_s6 + $0x30] sm:$0xff]  ;;  %v10174_v39 = vld [vmem:[%s11563_s6 + $0x100] sm:$0xff] }
 0x2e9   : > { %7034 = vmatprep.subr.msk.mxu0 %vm5001_vm5, %v4338_v43  ;;  %7192 = vmatprep.subr.msk.mxu1 %vm5001_vm5, %v4338_v43  ;;  %v4249_v18 = vadd.f32 %v4248_v37, %v9939_v60  ;;  %v4322_v43 = vadd.f32 %v4321_v51, %v4251_v28  ;;  %v4312_v51 = vadd.f32 %v4311_v6, %v4241_v50  ;;  %v10050_v60 = vld [vmem:[%s11563_s6 + $0x10] sm:$0xff]  ;;  %v10106_v37 = vld [vmem:[%s11563_s6 + $0xe8] sm:$0xff] }
 0x2ea   : > { %7035 = vmatpush1.msk.msra.mxu0 %vm5001_vm5, %v4336_v17  ;;  %7201 = vmatpush1.msk.msra.mxu1 %vm5001_vm5, %v4336_v17  ;;  %v4340_v22 = vpop.f32.mrf.mxu0  ;;  %v4308_v59 = vadd.f32 %v9966_v10, %v4237_v32  ;;  %v1787_v6 = vadd.f32 %v8939_v34, %v8937_v33  ;;  %v10003_v33 = vld [vmem:[%s11563_s6] sm:$0xff]  ;;  %11640 = vst [vmem:[#allocation23_spill] sm:$0xff] %v10106_v37  ;;  %11643 = vst [vmem:[#allocation26_spill] sm:$0xff] %v10134_v24 }
 0x2eb   : > { %5036 = vmatprep.subr.mxu0 %v4332_v9  ;;  %7193 = vmatprep.subr.mxu1 %v4332_v9  ;;  %v4320_v44 = vadd.f32 %v4319_v57, %v4249_v18  ;;  %v4239_v9 = vadd.f32 %v9954_v30, %v9927_v14  ;;  %v10008_v34 = vld [vmem:[%s11563_s6 + $0xc0] sm:$0xff]  ;;  %v10024_v14 = vld [vmem:[%s11563_s6 + $0xc8] sm:$0xff]  ;;  %v10156_v22 = vld [vmem:[%s11563_s6 + $0x38] sm:$0xff]  ;;  %11646 = vst [vmem:[#allocation29_spill] sm:$0xff] %v10174_v39 }
 0x2ec   : > { %5037 = vmatpush1.msra.mxu0 %v4330_v40  ;;  %7202 = vmatpush1.msra.mxu1 %v4330_v40  ;;  %v4316_v40 = vadd.f32 %v4315_v35, %v4245_v11  ;;  %v1830_v52 = vadd.f32 %v9008_v58, %v1787_v6  ;;  %11632 = vst [vmem:[#allocation16_spill] sm:$0xff] %v10008_v34  ;;  %11634 = vst [vmem:[#allocation17_spill] sm:$0xff] %v10024_v14  ;;  %v10090_v30 = vld [vmem:[%s11563_s6 + $0x20] sm:$0xff] }
 0x2ed   : > { %5038 = vmatprep.subr.mxu0 %v4328_v13  ;;  %7194 = vmatprep.subr.mxu1 %v4328_v13  ;;  %v4310_v57 = vadd.f32 %v4309_v3, %v4239_v9  ;;  %v1834_v3 = vadd.f32 %v9212_v62, %v1791_v53  ;;  %v11633_v62 = vmov 0.0   ;;  %11639 = vst [vmem:[#allocation22_spill] sm:$0xff] %v10090_v30  ;;  %11645 = vst [vmem:[#allocation28_spill] sm:$0xff] %v10156_v22  ;;  %v10196_v9 = vld [vmem:[%s11563_s6 + $0x108] sm:$0xff]  ;;  %v10216_v53 = vld [vmem:[%s11563_s6 + $0x110] sm:$0xff] }
 0x2ee   : > { %5039 = vmatpush1.msra.mxu0 %v4326_v38  ;;  %7203 = vmatpush1.msra.mxu1 %v4326_v38  ;;  %11648 = vst [vmem:[#allocation31_spill] sm:$0xff] %v10196_v9  ;;  %11650 = vst [vmem:[#allocation33_spill] sm:$0xff] %v10216_v53 }
 0x2ef   : > { %5040 = vmatprep.subr.mxu0 %v4322_v43  ;;  %7195 = vmatprep.subr.mxu1 %v4322_v43  ;;  %v10180_v43 = vld [vmem:[%s11563_s6 + $0x40] sm:$0xff] }
 0x2f0   : > { %5041 = vmatpush1.msra.mxu0 %v4320_v44  ;;  %7204 = vmatpush1.msra.mxu1 %v4320_v44  ;;  %11647 = vst [vmem:[#allocation30_spill] sm:$0xff] %v10180_v43 }
 0x2f1   : > { %5042 = vmatprep.subr.mxu0 %v4318_v46  ;;  %7196 = vmatprep.subr.mxu1 %v4318_v46 }
 0x2f2   : > { %5043 = vmatpush1.msra.mxu0 %v4316_v40  ;;  %7205 = vmatpush1.msra.mxu1 %v4316_v40  ;;  %v9987_v35 = vpop.f32.mrf.mxu1  ;;  %v10202_v40 = vld [vmem:[%s11563_s6 + $0x48] sm:$0xff] }
 0x2f3   : > { %5044 = vmatprep.subr.mxu0 %v4312_v51  ;;  %7197 = vmatprep.subr.mxu1 %v4312_v51  ;;  %11649 = vst [vmem:[#allocation32_spill] sm:$0xff] %v10202_v40 }
 0x2f4   : > { %5045 = vmatpush1.msra.mxu0 %v4310_v57  ;;  %7206 = vmatpush1.msra.mxu1 %v4310_v57  ;;  %v9993_v20 = vpop.f32.mrf.mxu1 }
 0x2f5   : > { %5046 = vmatprep.subr.mxu0 %v4308_v59  ;;  %7198 = vmatprep.subr.mxu1 %v4308_v59  ;;  %v10222_v59 = vld [vmem:[%s11563_s6 + $0x50] sm:$0xff] }
 0x2f6   : > { %5047 = vmatpush1.msra.mxu0 %v4306_v1  ;;  %7207 = vmatpush1.msra.mxu1 %v4306_v1  ;;  %v9996_v42 = vpop.f32.mrf.mxu1  ;;  %11651 = vst [vmem:[#allocation34_spill] sm:$0xff] %v10222_v59 }
 0x2f7   : > { %5048 = vmatprep.subr.mxu0 %v1834_v3  ;;  %7199 = vmatprep.subr.mxu1 %v1834_v3 }
 0x2f8   : > { %5049 = vmatpush1.msra.mxu0 %v9022_v63  ;;  %7208 = vmatpush1.msra.mxu1 %v9022_v63  ;;  %v10010_v58 = vpop.f32.mrf.mxu1 }
 0x2f9   : > { %5050 = vmatprep.subr.mxu0 %v1830_v52  ;;  %7200 = vmatprep.subr.mxu1 %v1830_v52 }
 0x2fa   : > { %5051 = vmatpush1.msra.mxu0 %v9003_v56  ;;  %7209 = vmatpush1.msra.mxu1 %v9003_v56  ;;  %v10014_v63 = vpop.f32.mrf.mxu1  ;;  %v10030_v56 = vld [vmem:[%s11563_s6 + $0x8] sm:$0xff] }
 0x2fb   : > { %7036 = vmatmul.mubr.msk.f32.vlgmr.msra.gmra.mxu0 %vm4850_vm6, %v10003_v33  ;;  %7060 = vmatmul.mubr.msk.f32.vlgmr.msra.gmra.mxu1 %vm4850_vm6, %v10008_v34 }
 0x2fc   : > { %5234 = vmatprep.mubr.f32.mxu1 %v11633_v62  ;;  %5090 = vmatprep.mubr.f32.mxu0 %v11633_v62  ;;  %v10032_v26 = vpop.f32.mrf.mxu1 }
 0x2fe   : > { %v10034_v21 = vpop.f32.mrf.mxu1 }
 0x2ff   : > { %7061 = vmatmul.mubr.msk.f32.gmra.mxu1 %vm4850_vm6, %v10024_v14  ;;  %7037 = vmatmul.mubr.msk.f32.gmra.mxu0 %vm4850_vm6, %v10030_v56 }
 0x300   : > { %5240 = vmatprep.mubr.f32.mxu1 %v11633_v62  ;;  %5096 = vmatprep.mubr.f32.mxu0 %v11633_v62  ;;  %v10052_v16 = vpop.f32.mrf.mxu1 }
 0x302   : > { %v10054_v45 = vpop.f32.mrf.mxu1 }
 0x303   : > { %7062 = vmatmul.mubr.msk.f32.gmra.mxu1 %vm4850_vm6, %v10044_v48  ;;  %7038 = vmatmul.mubr.msk.f32.gmra.mxu0 %vm4850_vm6, %v10050_v60  ;;  %v10265_v48 = vld [vmem:[%s11563_s6 + $0x128] sm:$0xff] }
 0x304   : > { %5246 = vmatprep.mubr.f32.mxu1 %v11633_v62  ;;  %5102 = vmatprep.mubr.f32.mxu0 %v11633_v62  ;;  %v10072_v27 = vpop.f32.mrf.mxu1  ;;  %11656 = vst [vmem:[#allocation39_spill] sm:$0xff] %v10265_v48 }
 0x306   : > { %v10074_v4 = vpop.f32.mrf.mxu1 }
 0x307   : > { %7063 = vmatmul.mubr.msk.f32.gmra.mxu1 %vm4850_vm6, %v10064_v61  ;;  %7039 = vmatmul.mubr.msk.f32.gmra.mxu0 %vm4850_vm6, %v10070_v49 }
 0x308   : > { %5252 = vmatprep.mubr.f32.mxu1 %v11633_v62  ;;  %5108 = vmatprep.mubr.f32.mxu0 %v11633_v62  ;;  %v10092_v41 = vpop.f32.mrf.mxu1 }
 0x30a   : > { %v10094_v2 = vpop.f32.mrf.mxu1 }
 0x30b   : > { %7064 = vmatmul.mubr.msk.f32.gmra.mxu1 %vm4850_vm6, %v10084_v55  ;;  %7040 = vmatmul.mubr.msk.f32.gmra.mxu0 %vm4850_vm6, %v10090_v30 }
 0x30c   : > { %v10100_v12 = vpop.f32.mrf.mxu0  ;;  %5258 = vmatprep.mubr.f32.mxu1 %v11633_v62  ;;  %5114 = vmatprep.mubr.f32.mxu0 %v11633_v62  ;;  %v10114_v29 = vpop.f32.mrf.mxu1 }
 0x30e   : > { %v10116_v19 = vpop.f32.mrf.mxu0  ;;  %v4410_v5 = vpop.f32.mrf.mxu1 }
 0x30f   : > { %7065 = vmatmul.mubr.msk.f32.gmra.mxu1 %vm4850_vm6, %v10106_v37  ;;  %7041 = vmatmul.mubr.msk.f32.gmra.mxu0 %vm4850_vm6, %v10112_v25  ;;  %v10232_v5 = vld [vmem:[%s11563_s6 + $0x118] sm:$0xff]  ;;  %v10254_v37 = vld [vmem:[%s11563_s6 + $0x60] sm:$0xff] }
 0x310   : > { %v10122_v23 = vpop.f32.mrf.mxu0  ;;  %5264 = vmatprep.mubr.f32.mxu1 %v11633_v62  ;;  %5120 = vmatprep.mubr.f32.mxu0 %v11633_v62  ;;  %v4411_v7 = vpop.f32.mrf.mxu1  ;;  %11652 = vst [vmem:[#allocation35_spill] sm:$0xff] %v10232_v5  ;;  %11655 = vst [vmem:[#allocation38_spill] sm:$0xff] %v10254_v37 }
 0x311   : > { %v10238_v7 = vld [vmem:[%s11563_s6 + $0x58] sm:$0xff] }
 0x312   : > { %v10136_v10 = vpop.f32.mrf.mxu0  ;;  %v10138_v36 = vpop.f32.mrf.mxu1  ;;  %11653 = vst [vmem:[#allocation36_spill] sm:$0xff] %v10238_v7 }
 0x313   : > { %7066 = vmatmul.mubr.msk.f32.gmra.mxu1 %vm4850_vm6, %v10128_v8  ;;  %7042 = vmatmul.mubr.msk.f32.gmra.mxu0 %vm4850_vm6, %v10134_v24  ;;  %v10248_v8 = vld [vmem:[%s11563_s6 + $0x120] sm:$0xff] }
 0x314   : > { %v10144_v17 = vpop.f32.mrf.mxu0  ;;  %5270 = vmatprep.mubr.f32.mxu1 %v11633_v62  ;;  %5126 = vmatprep.mubr.f32.mxu0 %v11633_v62  ;;  %v10158_v28 = vpop.f32.mrf.mxu1  ;;  %11654 = vst [vmem:[#allocation37_spill] sm:$0xff] %v10248_v8 }
 0x316   : > { %v10160_v13 = vpop.f32.mrf.mxu0  ;;  %v10162_v18 = vpop.f32.mrf.mxu1 }
 0x317   : > { %7067 = vmatmul.mubr.msk.f32.gmra.mxu1 %vm4850_vm6, %v10150_v15  ;;  %7043 = vmatmul.mubr.msk.f32.gmra.mxu0 %vm4850_vm6, %v10156_v22 }
 0x318   : > { %v10168_v38 = vpop.f32.mrf.mxu0  ;;  %5276 = vmatprep.mubr.f32.mxu1 %v11633_v62  ;;  %5132 = vmatprep.mubr.f32.mxu0 %v11633_v62  ;;  %v10182_v11 = vpop.f32.mrf.mxu1 }
 0x31a   : > { %v10184_v44 = vpop.f32.mrf.mxu0  ;;  %v10186_v50 = vpop.f32.mrf.mxu1 }
 0x31b   : > { %7068 = vmatmul.mubr.msk.f32.gmra.mxu1 %vm4850_vm6, %v10174_v39  ;;  %7044 = vmatmul.mubr.msk.f32.gmra.mxu0 %vm4850_vm6, %v10180_v43 }
 0x31c   : > { %v4467_v46 = vpop.f32.mrf.mxu0  ;;  %5282 = vmatprep.mubr.f32.mxu1 %v11633_v62  ;;  %5138 = vmatprep.mubr.f32.mxu0 %v11633_v62  ;;  %v10204_v32 = vpop.f32.mrf.mxu1 }
 0x31e   : > { %v4469_v51 = vpop.f32.mrf.mxu0  ;;  %v10206_v54 = vpop.f32.mrf.mxu1 }
 0x31f   : > { %7069 = vmatmul.mubr.msk.f32.gmra.mxu1 %vm4850_vm6, %v10196_v9  ;;  %7045 = vmatmul.mubr.msk.f32.gmra.mxu0 %vm4850_vm6, %v10202_v40 }
 0x320   : > { %v4471_v57 = vpop.f32.mrf.mxu0  ;;  %5288 = vmatprep.mubr.f32.mxu1 %v11633_v62  ;;  %5144 = vmatprep.mubr.f32.mxu0 %v11633_v62  ;;  %v4534_v1 = vpop.f32.mrf.mxu1 }
 0x322   : > { %v4473_v6 = vpop.f32.mrf.mxu0  ;;  %v4538_v3 = vpop.f32.mrf.mxu1 }
 0x323   : > { %7070 = vmatmul.mubr.msk.f32.gmra.mxu1 %vm4850_vm6, %v10216_v53  ;;  %7046 = vmatmul.mubr.msk.f32.gmra.mxu0 %vm4850_vm6, %v10222_v59  ;;  %v4474_v34 = vadd.f32 %v4473_v6, %v10092_v41  ;;  %v4470_v59 = vadd.f32 %v4469_v51, %v10072_v27  ;;  %v4811_v51 = vld [vmem:[%s11563_s6 + $0x158] sm:$0xff]  ;;  %v4813_v6 = vld [vmem:[%s11563_s6 + $0x168] sm:$0xff] }
 0x324   : > { %v4477_v52 = vpop.f32.mrf.mxu0  ;;  %5294 = vmatprep.mubr.f32.mxu1 %v11633_v62  ;;  %5150 = vmatprep.mubr.f32.mxu0 %v11633_v62  ;;  %v4540_v9 = vpop.f32.mrf.mxu1 }
 0x325   : > { %v4541_v27 = vadd.f32 %v4540_v9, %v4470_v59  ;;  %v10379_v9 = vld [vmem:[%s11563_s6 + $0x150] sm:$0xff]  ;;  %v10417_v59 = vld [vmem:[%s11563_s6 + $0xa0] sm:$0xff] }
 0x326   : > { %v4479_v53 = vpop.f32.mrf.mxu0  ;;  %v4542_v39 = vpop.f32.mrf.mxu1 }
 0x327   : > { %7071 = vmatmul.mubr.msk.f32.gmra.mxu1 %vm4850_vm6, %v10232_v5  ;;  %7047 = vmatmul.mubr.msk.f32.gmra.mxu0 %vm4850_vm6, %v10238_v7 }
 0x328   : > { %v4481_v15 = vpop.f32.mrf.mxu0  ;;  %5300 = vmatprep.mubr.f32.mxu1 %v11633_v62  ;;  %5156 = vmatprep.mubr.f32.mxu0 %v11633_v62  ;;  %v4544_v55 = vpop.f32.mrf.mxu1 }
 0x329   : > { %v4480_v15 = vadd.f32 %v4479_v53, %v10114_v29  ;;  %v4472_v53 = vadd.f32 %v4471_v57, %v10074_v4  ;;  %v4545_v40 = vadd.f32 %v4544_v55, %v4474_v34  ;;  %v4464_v34 = vadd.f32 %v10184_v44, %v10052_v16  ;;  %v4812_v57 = vld [vmem:[%s11563_s6 + $0x160] sm:$0xff] }
 0x32a   : > { %v4482_v5 = vpop.f32.mrf.mxu0  ;;  %v4548_v61 = vpop.f32.mrf.mxu1  ;;  %v4462_v55 = vadd.f32 %v10168_v38, %v10034_v21  ;;  %v10308_v21 = vld [vmem:[%s11563_s6 + $0x138] sm:$0xff]  ;;  %v4458_v16 = vadd.f32 %v10144_v17, %v10014_v63 }
 0x32b   : > { %7072 = vmatmul.mubr.msk.f32.gmra.mxu1 %vm4850_vm6, %v10248_v8  ;;  %7048 = vmatmul.mubr.msk.f32.gmra.mxu0 %vm4850_vm6, %v10254_v37  ;;  %v10271_v5 = vld [vmem:[%s11563_s6 + $0x68] sm:$0xff]  ;;  %v4478_v8 = vadd.f32 %v4477_v52, %v10094_v2  ;;  %v4543_v4 = vadd.f32 %v4542_v39, %v4472_v53  ;;  %11658 = vst [vmem:[#allocation41_spill] sm:$0xff] %v10308_v21  ;;  %v10326_v63 = vld [vmem:[%s11563_s6 + $0x78] sm:$0xff] }
 0x32c   : > { %5306 = vmatprep.mubr.f32.mxu1 %v11633_v62  ;;  %5162 = vmatprep.mubr.f32.mxu0 %v11633_v62  ;;  %v4550_v14 = vpop.f32.mrf.mxu1  ;;  %v4533_v38 = vadd.f32 %v10206_v54, %v4462_v55  ;;  %v4454_v39 = vadd.f32 %v10136_v10, %v10010_v58  ;;  %v4529_v44 = vadd.f32 %v10186_v50, %v4458_v16  ;;  %v10404_v54 = vld [vmem:[%s11563_s6 + $0x98] sm:$0xff]  ;;  %v10434_v52 = vld [vmem:[%s11563_s6 + $0xa8] sm:$0xff] }
 0x32d   : > { %v4551_v29 = vadd.f32 %v4550_v14, %v4480_v15  ;;  %v4549_v37 = vadd.f32 %v4548_v61, %v4478_v8  ;;  %v10286_v14 = vld [vmem:[%s11563_s6 + $0x130] sm:$0xff]  ;;  %v4468_v61 = vadd.f32 %v4467_v46, %v10054_v45  ;;  %v4535_v8 = vadd.f32 %v4534_v1, %v4464_v34  ;;  %v10373_v46 = vld [vmem:[%s11563_s6 + $0x88] sm:$0xff] }
 0x32e   : > { %v4552_v7 = vpop.f32.mrf.mxu1  ;;  %11657 = vst [vmem:[#allocation40_spill] sm:$0xff] %v10286_v14  ;;  %v10300_v45 = vld [vmem:[%s11563_s6 + $0x70] sm:$0xff]  ;;  %v1920_v58 = vadd.f32 %v9276_v31, %v9214_v0  ;;  %v4450_v10 = vadd.f32 %v10116_v19, %v9993_v20  ;;  %v4525_v17 = vadd.f32 %v10182_v11, %v4454_v39  ;;  %v11660_v0 = vld [vmem:[#allocation2_spill] sm:$0xff]  ;;  %v11664_v11 = vld [vmem:[#allocation5_spill] sm:$0xff] }
 0x32f   : > { %7073 = vmatmul.mubr.msk.f32.gmra.mxu1 %vm4850_vm6, %v10265_v48  ;;  %7049 = vmatmul.mubr.msk.f32.gmra.mxu0 %vm4850_vm6, %v10271_v5  ;;  %v4539_v2 = vadd.f32 %v4538_v3, %v4468_v61  ;;  %v1916_v31 = vadd.f32 %v11660_v0, %v9185_v47  ;;  %v10361_v47 = vld [vmem:[%s11563_s6 + $0x148] sm:$0xff]  ;;  %11668 = vst [vmem:[#allocation5_spill] sm:$0xff] %v10417_v59  ;;  %v4814_v15 = vld [vmem:[%s11563_s6 + $0x170] sm:$0xff] }
 0x330   : > { %7086 = vmatprep.subr.msk.mxu0 %vm5001_vm5, %v4551_v29  ;;  %5312 = vmatprep.mubr.f32.mxu1 %v11633_v62  ;;  %v4553_v41 = vpop.f32.mrf.mxu1  ;;  %v4521_v20 = vadd.f32 %v10158_v28, %v4450_v10  ;;  %11662 = vst [vmem:[#allocation2_spill] sm:$0xff] %v10361_v47  ;;  %v10453_v61 = vld [vmem:[%s11563_s6 + $0xb0] sm:$0xff] }
 0x331   : > { %7087 = vmatpush1.msk.msra.mxu0 %vm5001_vm5, %v4549_v37  ;;  %5168 = vmatprep.mubr.f32.mxu0 %v11633_v62  ;;  %v4460_v37 = vadd.f32 %v10160_v13, %v10032_v26  ;;  %v4452_v13 = vadd.f32 %v10122_v23, %v9996_v42  ;;  %v10337_v42 = vld [vmem:[%s11563_s6 + $0x140] sm:$0xff]  ;;  %v4448_v23 = vadd.f32 %v10100_v12, %v9987_v35  ;;  %v4815_v41 = vld [vmem:[%s11563_s6 + $0x178] sm:$0xff] }
 0x332   : > { %5401 = vmatprep.subr.mxu0 %v4545_v40  ;;  %11659 = vst [vmem:[#allocation42_spill] sm:$0xff] %v10337_v42  ;;  %v10354_v35 = vld [vmem:[%s11563_s6 + $0x80] sm:$0xff]  ;;  %v11666_v40 = vld [vmem:[#allocation4_spill] sm:$0xff]  ;;  %11670 = vst [vmem:[#allocation43_spill] sm:$0xff] %v10453_v61 }
 0x333   : > { %5402 = vmatpush1.msra.mxu0 %v4543_v4  ;;  %7074 = vmatmul.mubr.msk.f32.gmra.mxu1 %vm4850_vm6, %v10286_v14  ;;  %v4531_v26 = vadd.f32 %v10204_v32, %v4460_v37  ;;  %v4523_v50 = vadd.f32 %v10162_v18, %v4452_v13  ;;  %v4519_v19 = vadd.f32 %v10138_v36, %v4448_v23  ;;  %v11661_v12 = vld [vmem:[#allocation6_spill] sm:$0xff]  ;;  %v11663_v36 = vld [vmem:[#allocation3_spill] sm:$0xff]  ;;  %v10391_v32 = vld [vmem:[%s11563_s6 + $0x90] sm:$0xff] }
 0x334   : > { %5403 = vmatprep.subr.mxu0 %v4541_v27  ;;  %5318 = vmatprep.mubr.f32.mxu1 %v11633_v62  ;;  %v1963_v18 = vadd.f32 %v11661_v12, %v1920_v58  ;;  %v1959_v28 = vadd.f32 %v11663_v36, %v1916_v31  ;;  %11665 = vst [vmem:[#allocation6_spill] sm:$0xff] %v10379_v9  ;;  %11667 = vst [vmem:[#allocation3_spill] sm:$0xff] %v10404_v54  ;;  %v4817_v13 = vld [vmem:[%s11563_s6 + $0x188] sm:$0xff] }
 0x335   : > { %5404 = vmatpush1.msra.mxu0 %v4539_v2  ;;  %11669 = vst [vmem:[#allocation4_spill] sm:$0xff] %v10434_v52  ;;  %v10474_v2 = vld [vmem:[%s11563_s6 + $0xb8] sm:$0xff] }
 0x336   : > { %5405 = vmatprep.subr.mxu0 %v4535_v8  ;;  %7050 = vmatmul.mubr.msk.f32.gmra.mxu0 %vm4850_vm6, %v10300_v45  ;;  %11671 = vst [vmem:[#allocation44_spill] sm:$0xff] %v10474_v2  ;;  %v4816_v8 = vld [vmem:[%s11563_s6 + $0x180] sm:$0xff] }
 0x337   : > { %5406 = vmatpush1.msra.mxu0 %v4533_v38  ;;  %7075 = vmatmul.mubr.msk.f32.gmra.mxu1 %vm4850_vm6, %v10308_v21  ;;  %v11672_v21 = vld [vmem:[#allocation32_spill] sm:$0xff] }
 0x338   : > { %5407 = vmatprep.subr.mxu0 %v4531_v26  ;;  %5324 = vmatprep.mubr.f32.mxu1 %v11633_v62 }
 0x339   : > { %5408 = vmatpush1.msra.mxu0 %v4529_v44  ;;  %5174 = vmatprep.mubr.f32.mxu0 %v11633_v62 }
 0x33a   : > { %5409 = vmatprep.subr.mxu0 %v4525_v17  ;;  %7051 = vmatmul.mubr.msk.f32.gmra.mxu0 %vm4850_vm6, %v10326_v63 }
 0x33b   : > { %5410 = vmatpush1.msra.mxu0 %v4523_v50  ;;  %7076 = vmatmul.mubr.msk.f32.gmra.mxu1 %vm4850_vm6, %v10337_v42 }
 0x33c   : > { %5411 = vmatprep.subr.mxu0 %v4521_v20  ;;  %5330 = vmatprep.mubr.f32.mxu1 %v11633_v62 }
 0x33d   : > { %5412 = vmatpush1.msra.mxu0 %v4519_v19  ;;  %5180 = vmatprep.mubr.f32.mxu0 %v11633_v62 }
 0x33e   : > { %5413 = vmatprep.subr.mxu0 %v1963_v18  ;;  %7052 = vmatmul.mubr.msk.f32.gmra.mxu0 %vm4850_vm6, %v10354_v35 }
 0x33f   : > { %5414 = vmatpush1.msra.mxu0 %v11664_v11  ;;  %7077 = vmatmul.mubr.msk.f32.gmra.mxu1 %vm4850_vm6, %v10361_v47 }
 0x340   : > { %5415 = vmatprep.subr.mxu0 %v1959_v28  ;;  %5336 = vmatprep.mubr.f32.mxu1 %v11633_v62 }
 0x341   : > { %5416 = vmatpush1.msra.mxu0 %v11666_v40  ;;  %5186 = vmatprep.mubr.f32.mxu0 %v11633_v62 }
 0x342   : > { %7053 = vmatmul.mubr.msk.f32.gmra.mxu0 %vm4850_vm6, %v10373_v46 }
 0x343   : > { %7078 = vmatmul.mubr.msk.f32.gmra.mxu1 %vm4850_vm6, %v10379_v9  ;;  %5192 = vmatprep.mubr.f32.mxu0 %v11633_v62 }
 0x344   : > { %5342 = vmatprep.mubr.f32.mxu1 %v11633_v62 }
 0x346   : > { %7054 = vmatmul.mubr.msk.f32.gmra.mxu0 %vm4850_vm6, %v10391_v32 }
 0x347   : > { %7079 = vmatmul.mubr.msk.f32.gmra.mxu1 %vm4850_vm6, %v4811_v51  ;;  %5198 = vmatprep.mubr.f32.mxu0 %v11633_v62 }
 0x348   : > { %5348 = vmatprep.mubr.f32.mxu1 %v11633_v62 }
 0x34a   : > { %7055 = vmatmul.mubr.msk.f32.gmra.mxu0 %vm4850_vm6, %v10404_v54 }
 0x34b   : > { %7080 = vmatmul.mubr.msk.f32.gmra.mxu1 %vm4850_vm6, %v4812_v57  ;;  %5204 = vmatprep.mubr.f32.mxu0 %v11633_v62 }
 0x34c   : > { %v10419_v1 = vpop.f32.mrf.mxu0  ;;  %5354 = vmatprep.mubr.f32.mxu1 %v11633_v62 }
 0x34e   : > { %v10425_v3 = vpop.f32.mrf.mxu0  ;;  %7056 = vmatmul.mubr.msk.f32.gmra.mxu0 %vm4850_vm6, %v10417_v59 }
 0x34f   : > { %7081 = vmatmul.mubr.msk.f32.gmra.mxu1 %vm4850_vm6, %v4813_v6  ;;  %5210 = vmatprep.mubr.f32.mxu0 %v11633_v62 }
 0x350   : > { %v10436_v7 = vpop.f32.mrf.mxu0  ;;  %5360 = vmatprep.mubr.f32.mxu1 %v11633_v62 }
 0x352   : > { %v10442_v29 = vpop.f32.mrf.mxu0  ;;  %7057 = vmatmul.mubr.msk.f32.gmra.mxu0 %vm4850_vm6, %v10434_v52  ;;  %v10446_v53 = vpop.f32.mrf.mxu1 }
 0x353   : > { %7082 = vmatmul.mubr.msk.f32.gmra.mxu1 %vm4850_vm6, %v4814_v15  ;;  %5216 = vmatprep.mubr.f32.mxu0 %v11633_v62 }
 0x354   : > { %v10455_v4 = vpop.f32.mrf.mxu0  ;;  %5366 = vmatprep.mubr.f32.mxu1 %v11633_v62  ;;  %v10461_v34 = vpop.f32.mrf.mxu1 }
 0x356   : > { %v10463_v27 = vpop.f32.mrf.mxu0  ;;  %7058 = vmatmul.mubr.msk.f32.gmra.mxu0 %vm4850_vm6, %v10453_v61  ;;  %v10467_v55 = vpop.f32.mrf.mxu1  ;;  %v11673_v61 = vld [vmem:[#allocation34_spill] sm:$0xff] }
 0x357   : > { %7083 = vmatmul.mubr.msk.f32.gmra.mxu1 %vm4850_vm6, %v4815_v41  ;;  %5222 = vmatprep.mubr.f32.mxu0 %v11633_v62 }
 0x358   : > { %v10476_v37 = vpop.f32.mrf.mxu0  ;;  %5372 = vmatprep.mubr.f32.mxu1 %v11633_v62  ;;  %v10482_v16 = vpop.f32.mrf.mxu1 }
 0x35a   : > { %v10484_v38 = vpop.f32.mrf.mxu0  ;;  %7059 = vmatmul.mubr.msk.f32.gmra.mxu0 %vm4850_vm6, %v10474_v2  ;;  %v10488_v39 = vpop.f32.mrf.mxu1 }
 0x35b   : > { %7084 = vmatmul.mubr.msk.f32.gmra.mxu1 %vm4850_vm6, %v4816_v8  ;;  %5449 = vmatprep.mubr.f32.mxu0 %v11633_v62 }
 0x35c   : > { %v10492_v26 = vpop.f32.mrf.mxu0  ;;  %5378 = vmatprep.mubr.f32.mxu1 %v11633_v62  ;;  %v10498_v44 = vpop.f32.mrf.mxu1 }
 0x35e   : > { %v4611_v58 = vpop.f32.mrf.mxu0  ;;  %7088 = vmatmul.mubr.msk.f32.vlgmr.msra.gmra.mxu0 %vm4850_vm6, %v10003_v33  ;;  %v10502_v10 = vpop.f32.mrf.mxu1 }
 0x35f   : > { %7085 = vmatmul.mubr.msk.f32.gmra.mxu1 %vm4850_vm6, %v4817_v13  ;;  %5455 = vmatprep.mubr.f32.mxu0 %v11633_v62 }
 0x360   : > { %v4613_v17 = vpop.f32.mrf.mxu0  ;;  %5814 = vmatprep.mubr.f32.mxu1 %v11633_v62  ;;  %v10507_v23 = vpop.f32.mrf.mxu1 }
 0x362   : > { %v4615_v50 = vpop.f32.mrf.mxu0  ;;  %7089 = vmatmul.mubr.msk.f32.gmra.mxu0 %vm4850_vm6, %v10030_v56  ;;  %v4680_v0 = vpop.f32.mrf.mxu1 }
 0x363   : > { %5461 = vmatprep.mubr.f32.mxu0 %v11633_v62 }
 0x364   : > { %v4619_v31 = vpop.f32.mrf.mxu0  ;;  %v4682_v20 = vpop.f32.mrf.mxu1 }
 0x366   : > { %v4621_v19 = vpop.f32.mrf.mxu0  ;;  %7090 = vmatmul.mubr.msk.f32.gmra.mxu0 %vm4850_vm6, %v10050_v60  ;;  %v4684_v12 = vpop.f32.mrf.mxu1 }
 0x367   : > { %5467 = vmatprep.mubr.f32.mxu0 %v11633_v62 }
 0x368   : > { %v4623_v18 = vpop.f32.mrf.mxu0  ;;  %v4686_v36 = vpop.f32.mrf.mxu1 }
 0x36a   : > { %v4624_v28 = vpop.f32.mrf.mxu0  ;;  %7091 = vmatmul.mubr.msk.f32.gmra.mxu0 %vm4850_vm6, %v10070_v49  ;;  %v4690_v11 = vpop.f32.mrf.mxu1 }
 0x36b   : > { %5473 = vmatprep.mubr.f32.mxu0 %v11633_v62  ;;  %v4691_v2 = vadd.f32 %v4690_v11, %v4619_v31  ;;  %v11674_v31 = vld [vmem:[#allocation36_spill] sm:$0xff] }
 0x36c   : > { %v10518_v40 = vpop.f32.mrf.mxu0  ;;  %v4692_v51 = vpop.f32.mrf.mxu1 }
 0x36d   : > { %v4693_v48 = vadd.f32 %v4692_v51, %v4621_v19 }
 0x36e   : > { %v10520_v57 = vpop.f32.mrf.mxu0  ;;  %7092 = vmatmul.mubr.msk.f32.gmra.mxu0 %vm4850_vm6, %v10090_v30  ;;  %v4694_v6 = vpop.f32.mrf.mxu1  ;;  %v4683_v30 = vadd.f32 %v4682_v20, %v4611_v58  ;;  %v11686_v58 = vld [vmem:[#allocation22_spill] sm:$0xff]  ;;  %v11692_v20 = vld [vmem:[#allocation28_spill] sm:$0xff] }
 0x36f   : > { %5479 = vmatprep.mubr.f32.mxu0 %v11633_v62 }
 0x370   : > { %v10525_v15 = vpop.f32.mrf.mxu0  ;;  %v4695_v41 = vpop.f32.mrf.mxu1 }
 0x372   : > { %v4737_v8 = vpop.f32.mrf.mxu0  ;;  %7093 = vmatmul.mubr.msk.f32.gmra.mxu0 %vm4850_vm6, %v10112_v25 }
 0x373   : > { %5485 = vmatprep.mubr.f32.mxu0 %v11633_v62 }
 0x374   : > { %v4741_v13 = vpop.f32.mrf.mxu0 }
 0x376   : > { %v4743_v18 = vpop.f32.mrf.mxu0  ;;  %7094 = vmatmul.mubr.msk.f32.gmra.mxu0 %vm4850_vm6, %v10134_v24  ;;  %v4687_v24 = vadd.f32 %v4686_v36, %v4615_v50  ;;  %v10632_v50 = vld [vmem:[%s11564_s7] sm:$0x3f] }
 0x377   : > { %5491 = vmatprep.mubr.f32.mxu0 %v11633_v62 }
 0x378   : > { %v4745_v28 = vpop.f32.mrf.mxu0 }
 0x37a   : > { %v4747_v6 = vpop.f32.mrf.mxu0  ;;  %7095 = vmatmul.mubr.msk.f32.gmra.mxu0 %vm4850_vm6, %v10156_v22 }
 0x37b   : > { %5497 = vmatprep.mubr.f32.mxu0 %v11633_v62 }
 0x37c   : > { %v4751_v41 = vpop.f32.mrf.mxu0 }
 0x37e   : > { %v4753_v9 = vpop.f32.mrf.mxu0  ;;  %7096 = vmatmul.mubr.msk.f32.gmra.mxu0 %vm4850_vm6, %v10180_v43  ;;  %v4685_v43 = vadd.f32 %v4684_v12, %v4613_v17  ;;  %v11689_v17 = vld [vmem:[#allocation4_spill] sm:$0xff]  ;;  %v11693_v12 = vld [vmem:[#allocation13_spill] sm:$0xff] }
 0x37f   : > { %5503 = vmatprep.mubr.f32.mxu0 %v11633_v62  ;;  %v11694_v36 = vsub.s32 0, %v11693_v12 }
 0x380   : > { %v4755_v47 = vpop.f32.mrf.mxu0 }
 0x381   : > { %v4756_v49 = vadd.f32 %v4755_v47, %v4685_v43  ;;  %v4673_v43 = vadd.f32 %v10498_v44, %v10463_v27  ;;  %v11683_v44 = vld [vmem:[#allocation10_spill] sm:$0xff]  ;;  %v10644_v11 = vrot.slane %v10632_v50, %v11694_v36 }
 0x382   : > { %v4757_v42 = vpop.f32.mrf.mxu0  ;;  %7097 = vmatmul.mubr.msk.f32.gmra.mxu0 %vm4850_vm6, %v11672_v21  ;;  %v4681_v21 = vadd.f32 %v4680_v0, %v10492_v26  ;;  %v11682_v26 = vld [vmem:[#allocation12_spill] sm:$0xff]  ;;  %v11691_v0 = vld [vmem:[#allocation43_spill] sm:$0xff] }
 0x383   : > { %5509 = vmatprep.mubr.f32.mxu0 %v11633_v62  ;;  %v4758_v54 = vadd.f32 %v4757_v42, %v4687_v24  ;;  %v4675_v24 = vadd.f32 %v10502_v10, %v10476_v37  ;;  %v11688_v10 = vld [vmem:[#allocation24_spill] sm:$0xff] }
 0x384   : > { %v4761_v14 = vpop.f32.mrf.mxu0 }
 0x385   : > { %v4762_v25 = vadd.f32 %v4761_v14, %v4691_v2  ;;  %v4752_v14 = vadd.f32 %v4751_v41, %v4681_v21  ;;  %v4746_v47 = vadd.f32 %v4745_v28, %v4675_v24  ;;  %v11677_v2 = vld [vmem:[#allocation14_spill] sm:$0xff]  ;;  %v11699_v24 = vld [vmem:[#allocation32_spill] sm:$0xff] }
 0x386   : > { %v4763_v22 = vpop.f32.mrf.mxu0  ;;  %7098 = vmatmul.mubr.msk.f32.gmra.mxu0 %vm4850_vm6, %v11673_v61 }
 0x387   : > { %v4764_v52 = vadd.f32 %v4763_v22, %v4693_v48  ;;  %5515 = vmatprep.mubr.f32.mxu0 %v11633_v62  ;;  %v4677_v48 = vadd.f32 %v10507_v23, %v10484_v38  ;;  %v4754_v22 = vadd.f32 %v4753_v9, %v4683_v30  ;;  %v4667_v30 = vadd.f32 %v10482_v16, %v10442_v29  ;;  %v11676_v29 = vld [vmem:[#allocation9_spill] sm:$0xff]  ;;  %v11681_v38 = vld [vmem:[#allocation11_spill] sm:$0xff]  ;;  %v11690_v23 = vld [vmem:[#allocation26_spill] sm:$0xff] }
 0x388   : > { %v4765_v59 = vpop.f32.mrf.mxu0  ;;  %v4744_v9 = vadd.f32 %v4743_v18, %v4673_v43  ;;  %v2049_v37 = vadd.f32 %v11677_v2, %v11676_v29 }
 0x389   : > { %7138 = vmatprep.subr.msk.mxu1 %vm5001_vm5, %v4764_v52  ;;  %v4748_v42 = vadd.f32 %v4747_v6, %v4677_v48  ;;  %v11675_v59 = vld [vmem:[#allocation38_spill] sm:$0xff]  ;;  %v4738_v52 = vadd.f32 %v4737_v8, %v4667_v30  ;;  %v11698_v48 = vld [vmem:[#allocation16_spill] sm:$0xff] }
 0x38a   : > { %v4766_v19 = vpop.f32.mrf.mxu0  ;;  %7139 = vmatpush1.msk.msra.mxu1 %vm5001_vm5, %v4762_v25  ;;  %7099 = vmatmul.mubr.msk.f32.gmra.mxu0 %vm4850_vm6, %v11674_v31  ;;  %v4671_v25 = vadd.f32 %v10488_v39, %v10455_v4  ;;  %v4661_v4 = vadd.f32 %v10446_v53, %v10419_v1  ;;  %v11680_v53 = vld [vmem:[#allocation15_spill] sm:$0xff] }
 0x38b   : > { %5766 = vmatprep.subr.mxu1 %v4758_v54  ;;  %5521 = vmatprep.mubr.f32.mxu0 %v11633_v62  ;;  %v4663_v54 = vadd.f32 %v10461_v34, %v10425_v3  ;;  %v11678_v34 = vld [vmem:[#allocation7_spill] sm:$0xff]  ;;  %v2092_v16 = vadd.f32 %v11680_v53, %v2049_v37  ;;  %v11701_v37 = vld [vmem:[#allocation18_spill] sm:$0xff] }
 0x38c   : > { %5767 = vmatpush1.msra.mxu1 %v4756_v49  ;;  %v4665_v49 = vadd.f32 %v10467_v55, %v10436_v7  ;;  %v4742_v21 = vadd.f32 %v4741_v13, %v4671_v25  ;;  %v4732_v3 = vadd.f32 %v10518_v40, %v4661_v4  ;;  %v11679_v55 = vld [vmem:[#allocation8_spill] sm:$0xff]  ;;  %v11695_v40 = vsub.s32 1, %v11693_v12 }
 0x38d   : > { %5768 = vmatprep.subr.mxu1 %v4754_v22  ;;  %v4734_v7 = vadd.f32 %v10520_v57, %v4663_v54  ;;  %v2045_v1 = vadd.f32 %v11679_v55, %v11678_v34  ;;  %v11696_v57 = vld [vmem:[#allocation44_spill] sm:$0xff] }
 0x38e   : > { %5769 = vmatpush1.msra.mxu1 %v4752_v14  ;;  %7100 = vmatmul.mubr.msk.f32.gmra.mxu0 %vm4850_vm6, %v11675_v59  ;;  %v4736_v27 = vadd.f32 %v10525_v15, %v4665_v49  ;;  %v10649_v51 = vrot.slane %v10632_v50, %v11695_v40  ;;  %v11697_v15 = vld [vmem:[#allocation30_spill] sm:$0xff]  ;;  %v11700_v49 = vld [vmem:[#allocation17_spill] sm:$0xff] }
 0x38f   : > { %5770 = vmatprep.subr.mxu1 %v4748_v42  ;;  %5527 = vmatprep.mubr.f32.mxu0 %v11633_v62  ;;  %v2088_v39 = vadd.f32 %v11681_v38, %v2045_v1  ;;  %v11702_v38 = vld [vmem:[#allocation19_spill] sm:$0xff] }
 0x390   : > { %5771 = vmatpush1.msra.mxu1 %v4746_v47 }
 0x391   : > { %5772 = vmatprep.subr.mxu1 %v4744_v9 }
 0x392   : > { %5773 = vmatpush1.msra.mxu1 %v4742_v21  ;;  %7101 = vmatmul.mubr.msk.f32.gmra.mxu0 %vm4850_vm6, %v10271_v5 }
 0x393   : > { %5774 = vmatprep.subr.mxu1 %v4738_v52  ;;  %5533 = vmatprep.mubr.f32.mxu0 %v11633_v62 }
 0x394   : > { %5775 = vmatpush1.msra.mxu1 %v4736_v27 }
 0x395   : > { %5776 = vmatprep.subr.mxu1 %v4734_v7 }
 0x396   : > { %5777 = vmatpush1.msra.mxu1 %v4732_v3  ;;  %7102 = vmatmul.mubr.msk.f32.gmra.mxu0 %vm4850_vm6, %v10300_v45 }
 0x397   : > { %5778 = vmatprep.subr.mxu1 %v2092_v16  ;;  %5539 = vmatprep.mubr.f32.mxu0 %v11633_v62 }
 0x398   : > { %5779 = vmatpush1.msra.mxu1 %v11682_v26 }
 0x399   : > { %5780 = vmatprep.subr.mxu1 %v2088_v39 }
 0x39a   : > { %5781 = vmatpush1.msra.mxu1 %v11683_v44  ;;  %7103 = vmatmul.mubr.msk.f32.gmra.mxu0 %vm4850_vm6, %v10326_v63 }
 0x39b   : > { %7140 = vmatmul.mubr.msk.f32.vlgmr.msra.gmra.mxu1 %vm4850_vm6, %v10003_v33  ;;  %5545 = vmatprep.mubr.f32.mxu0 %v11633_v62  ;;  %v11684_v33 = vld [vmem:[#allocation20_spill] sm:$0xff] }
 0x39c   : > { %5820 = vmatprep.mubr.f32.mxu1 %v11633_v62 }
 0x39e   : > { %7104 = vmatmul.mubr.msk.f32.gmra.mxu0 %vm4850_vm6, %v10354_v35 }
 0x39f   : > { %7141 = vmatmul.mubr.msk.f32.gmra.mxu1 %vm4850_vm6, %v10030_v56  ;;  %5551 = vmatprep.mubr.f32.mxu0 %v11633_v62  ;;  %v11685_v56 = vld [vmem:[#allocation3_spill] sm:$0xff] }
 0x3a0   : > { %5826 = vmatprep.mubr.f32.mxu1 %v11633_v62 }
 0x3a2   : > { %7105 = vmatmul.mubr.msk.f32.gmra.mxu0 %vm4850_vm6, %v10373_v46 }
 0x3a3   : > { %7142 = vmatmul.mubr.msk.f32.gmra.mxu1 %vm4850_vm6, %v10050_v60  ;;  %5557 = vmatprep.mubr.f32.mxu0 %v11633_v62  ;;  %v11687_v60 = vld [vmem:[#allocation5_spill] sm:$0xff] }
 0x3a4   : > { %5832 = vmatprep.mubr.f32.mxu1 %v11633_v62 }
 0x3a6   : > { %7106 = vmatmul.mubr.msk.f32.gmra.mxu0 %vm4850_vm6, %v10391_v32 }
 0x3a7   : > { %7143 = vmatmul.mubr.msk.f32.gmra.mxu1 %vm4850_vm6, %v11684_v33  ;;  %5563 = vmatprep.mubr.f32.mxu0 %v11633_v62 }
 0x3a8   : > { %5838 = vmatprep.mubr.f32.mxu1 %v11633_v62 }
 0x3aa   : > { %7107 = vmatmul.mubr.msk.f32.gmra.mxu0 %vm4850_vm6, %v11685_v56 }
 0x3ab   : > { %7144 = vmatmul.mubr.msk.f32.gmra.mxu1 %vm4850_vm6, %v11686_v58  ;;  %5569 = vmatprep.mubr.f32.mxu0 %v11633_v62 }
 0x3ac   : > { %5844 = vmatprep.mubr.f32.mxu1 %v11633_v62 }
 0x3ae   : > { %7108 = vmatmul.mubr.msk.f32.gmra.mxu0 %vm4850_vm6, %v11687_v60 }
 0x3af   : > { %7145 = vmatmul.mubr.msk.f32.gmra.mxu1 %vm4850_vm6, %v11688_v10  ;;  %5575 = vmatprep.mubr.f32.mxu0 %v11633_v62 }
 0x3b0   : > { %5850 = vmatprep.mubr.f32.mxu1 %v11633_v62 }
 0x3b2   : > { %7109 = vmatmul.mubr.msk.f32.gmra.mxu0 %vm4850_vm6, %v11689_v17 }
 0x3b3   : > { %7146 = vmatmul.mubr.msk.f32.gmra.mxu1 %vm4850_vm6, %v11690_v23  ;;  %5581 = vmatprep.mubr.f32.mxu0 %v11633_v62 }
 0x3b4   : > { %5856 = vmatprep.mubr.f32.mxu1 %v11633_v62 }
 0x3b6   : > { %7110 = vmatmul.mubr.msk.f32.gmra.mxu0 %vm4850_vm6, %v11691_v0 }
 0x3b7   : > { %7147 = vmatmul.mubr.msk.f32.gmra.mxu1 %vm4850_vm6, %v11692_v20  ;;  %5587 = vmatprep.mubr.f32.mxu0 %v11633_v62  ;;  %v11703_v20 = vld [vmem:[#allocation21_spill] sm:$0xff] }
 0x3b8   : > { %5862 = vmatprep.mubr.f32.mxu1 %v11633_v62 }
 0x3ba   : > { %7111 = vmatmul.mubr.msk.f32.gmra.mxu0 %vm4850_vm6, %v11696_v57 }
 0x3bb   : > { %7148 = vmatmul.mubr.msk.f32.gmra.mxu1 %vm4850_vm6, %v11697_v15  ;;  %v5230_v8 = vpop.f32.mrf.mxu1  ;;  %5593 = vmatprep.mubr.f32.mxu0 %v11633_v62  ;;  %v5086_v13 = vpop.f32.mrf.mxu0 }
 0x3bc   : > { %5868 = vmatprep.mubr.f32.mxu1 %v11633_v62  ;;  %v5231_v18 = vadd.f32 %v5230_v8, %v10644_v11  ;;  %v5087_v28 = vadd.f32 %v5086_v13, %v10644_v11 }
 0x3bd   : > { %v5232_v6 = vpop.f32.mrf.mxu1  ;;  %v5088_v41 = vpop.f32.mrf.mxu0 }
 0x3be   : > { %6259 = vst [vmem:[%s10656_s21 + $0x480] sm:$0xff] %v5231_v18  ;;  %v5233_v19 = vadd.f32 %v5232_v6, %v10649_v51  ;;  %6115 = vst [vmem:[%s10656_s21] sm:$0xff] %v5087_v28  ;;  %7112 = vmatmul.mubr.msk.f32.gmra.mxu0 %vm4850_vm6, %v11698_v48  ;;  %v5089_v22 = vadd.f32 %v5088_v41, %v10649_v51  ;;  %v11704_v6 = vld [vmem:[#allocation23_spill] sm:$0xff] }
 0x3bf   : > { %7149 = vmatmul.mubr.msk.f32.gmra.mxu1 %vm4850_vm6, %v11699_v24  ;;  %v5236_v14 = vpop.f32.mrf.mxu1  ;;  %5599 = vmatprep.mubr.f32.mxu0 %v11633_v62  ;;  %v5092_v43 = vpop.f32.mrf.mxu0 }
 0x3c0   : > { %5874 = vmatprep.mubr.f32.mxu1 %v11633_v62  ;;  %6260 = vst [vmem:[%s10656_s21 + $0x488] sm:$0xff] %v5233_v19  ;;  %v5237_v42 = vadd.f32 %v5236_v14, %v10644_v11  ;;  %6116 = vst [vmem:[%s10656_s21 + $0x8] sm:$0xff] %v5089_v22  ;;  %v5093_v25 = vadd.f32 %v5092_v43, %v10644_v11 }
 0x3c1   : > { %v5238_v47 = vpop.f32.mrf.mxu1  ;;  %v5094_v30 = vpop.f32.mrf.mxu0 }
 0x3c2   : > { %6265 = vst [vmem:[%s10656_s21 + $0x4b0] sm:$0xff] %v5237_v42  ;;  %v5239_v9 = vadd.f32 %v5238_v47, %v10649_v51  ;;  %6121 = vst [vmem:[%s10656_s21 + $0x30] sm:$0xff] %v5093_v25  ;;  %7113 = vmatmul.mubr.msk.f32.gmra.mxu0 %vm4850_vm6, %v11700_v49  ;;  %v5095_v21 = vadd.f32 %v5094_v30, %v10649_v51  ;;  %v11705_v42 = vld [vmem:[#allocation25_spill] sm:$0xff] }
 0x3c3   : > { %7150 = vmatmul.mubr.msk.f32.gmra.mxu1 %vm4850_vm6, %v11673_v61  ;;  %v5242_v54 = vpop.f32.mrf.mxu1  ;;  %5605 = vmatprep.mubr.f32.mxu0 %v11633_v62  ;;  %v5098_v52 = vpop.f32.mrf.mxu0 }
 0x3c4   : > { %5880 = vmatprep.mubr.f32.mxu1 %v11633_v62  ;;  %6266 = vst [vmem:[%s10656_s21 + $0x4b8] sm:$0xff] %v5239_v9  ;;  %v5243_v4 = vadd.f32 %v5242_v54, %v10644_v11  ;;  %6122 = vst [vmem:[%s10656_s21 + $0x38] sm:$0xff] %v5095_v21  ;;  %v5099_v27 = vadd.f32 %v5098_v52, %v10644_v11  ;;  %v11706_v52 = vld [vmem:[#allocation27_spill] sm:$0xff] }
 0x3c5   : > { %v5244_v29 = vpop.f32.mrf.mxu1  ;;  %v5100_v2 = vpop.f32.mrf.mxu0 }
 0x3c6   : > { %6271 = vst [vmem:[%s10656_s21 + $0x4e0] sm:$0xff] %v5243_v4  ;;  %v5245_v61 = vadd.f32 %v5244_v29, %v10649_v51  ;;  %6127 = vst [vmem:[%s10656_s21 + $0x60] sm:$0xff] %v5099_v27  ;;  %7114 = vmatmul.mubr.msk.f32.gmra.mxu0 %vm4850_vm6, %v11701_v37  ;;  %v5101_v7 = vadd.f32 %v5100_v2, %v10649_v51 }
 0x3c7   : > { %7151 = vmatmul.mubr.msk.f32.gmra.mxu1 %vm4850_vm6, %v11674_v31  ;;  %v5248_v3 = vpop.f32.mrf.mxu1  ;;  %5611 = vmatprep.mubr.f32.mxu0 %v11633_v62  ;;  %v5104_v34 = vpop.f32.mrf.mxu0 }
 0x3c8   : > { %5886 = vmatprep.mubr.f32.mxu1 %v11633_v62  ;;  %6272 = vst [vmem:[%s10656_s21 + $0x4e8] sm:$0xff] %v5245_v61  ;;  %v5249_v55 = vadd.f32 %v5248_v3, %v10644_v11  ;;  %6128 = vst [vmem:[%s10656_s21 + $0x68] sm:$0xff] %v5101_v7  ;;  %v5105_v1 = vadd.f32 %v5104_v34, %v10644_v11  ;;  %v11707_v3 = vld [vmem:[#allocation29_spill] sm:$0xff] }
 0x3c9   : > { %v5250_v53 = vpop.f32.mrf.mxu1  ;;  %v5106_v16 = vpop.f32.mrf.mxu0 }
 0x3ca   : > { %6277 = vst [vmem:[%s10656_s21 + $0x510] sm:$0xff] %v5249_v55  ;;  %v5251_v31 = vadd.f32 %v5250_v53, %v10649_v51  ;;  %6133 = vst [vmem:[%s10656_s21 + $0x90] sm:$0xff] %v5105_v1  ;;  %7115 = vmatmul.mubr.msk.f32.gmra.mxu0 %vm4850_vm6, %v11702_v38  ;;  %v5107_v39 = vadd.f32 %v5106_v16, %v10649_v51 }
 0x3cb   : > { %7152 = vmatmul.mubr.msk.f32.gmra.mxu1 %vm4850_vm6, %v11675_v59  ;;  %v5254_v26 = vpop.f32.mrf.mxu1  ;;  %5617 = vmatprep.mubr.f32.mxu0 %v11633_v62  ;;  %v5110_v44 = vpop.f32.mrf.mxu0 }
 0x3cc   : > { %5892 = vmatprep.mubr.f32.mxu1 %v11633_v62  ;;  %6278 = vst [vmem:[%s10656_s21 + $0x518] sm:$0xff] %v5251_v31  ;;  %v5255_v33 = vadd.f32 %v5254_v26, %v10644_v11  ;;  %6134 = vst [vmem:[%s10656_s21 + $0x98] sm:$0xff] %v5107_v39  ;;  %v5111_v58 = vadd.f32 %v5110_v44, %v10644_v11  ;;  %v11708_v39 = vld [vmem:[#allocation31_spill] sm:$0xff] }
 0x3cd   : > { %v5256_v10 = vpop.f32.mrf.mxu1  ;;  %v5112_v23 = vpop.f32.mrf.mxu0 }
 0x3ce   : > { %6283 = vst [vmem:[%s10656_s21 + $0x540] sm:$0xff] %v5255_v33  ;;  %v5257_v59 = vadd.f32 %v5256_v10, %v10649_v51  ;;  %6139 = vst [vmem:[%s10656_s21 + $0xc0] sm:$0xff] %v5111_v58  ;;  %7116 = vmatmul.mubr.msk.f32.gmra.mxu0 %vm4850_vm6, %v11703_v20  ;;  %v5113_v36 = vadd.f32 %v5112_v23, %v10649_v51  ;;  %v11709_v20 = vld [vmem:[#allocation33_spill] sm:$0xff] }
 0x3cf   : > { %7153 = vmatmul.mubr.msk.f32.gmra.mxu1 %vm4850_vm6, %v10271_v5  ;;  %v5260_v40 = vpop.f32.mrf.mxu1  ;;  %5623 = vmatprep.mubr.f32.mxu0 %v11633_v62  ;;  %v5116_v15 = vpop.f32.mrf.mxu0 }
 0x3d0   : > { %5898 = vmatprep.mubr.f32.mxu1 %v11633_v62  ;;  %6284 = vst [vmem:[%s10656_s21 + $0x548] sm:$0xff] %v5257_v59  ;;  %v5261_v8 = vadd.f32 %v5260_v40, %v10644_v11  ;;  %6140 = vst [vmem:[%s10656_s21 + $0xc8] sm:$0xff] %v5113_v36  ;;  %v5117_v13 = vadd.f32 %v5116_v15, %v10644_v11 }
 0x3d1   : > { %v5262_v18 = vpop.f32.mrf.mxu1  ;;  %v5118_v28 = vpop.f32.mrf.mxu0 }
 0x3d2   : > { %6289 = vst [vmem:[%s10656_s21 + $0x570] sm:$0xff] %v5261_v8  ;;  %v5263_v5 = vadd.f32 %v5262_v18, %v10649_v51  ;;  %6145 = vst [vmem:[%s10656_s21 + $0xf0] sm:$0xff] %v5117_v13  ;;  %7117 = vmatmul.mubr.msk.f32.gmra.mxu0 %vm4850_vm6, %v11704_v6  ;;  %v5119_v41 = vadd.f32 %v5118_v28, %v10649_v51 }
 0x3d3   : > { %7154 = vmatmul.mubr.msk.f32.gmra.mxu1 %vm4850_vm6, %v10300_v45  ;;  %v5266_v19 = vpop.f32.mrf.mxu1  ;;  %5629 = vmatprep.mubr.f32.mxu0 %v11633_v62  ;;  %v5122_v48 = vpop.f32.mrf.mxu0 }
 0x3d4   : > { %5904 = vmatprep.mubr.f32.mxu1 %v11633_v62  ;;  %6290 = vst [vmem:[%s10656_s21 + $0x578] sm:$0xff] %v5263_v5  ;;  %v5267_v22 = vadd.f32 %v5266_v19, %v10644_v11  ;;  %6146 = vst [vmem:[%s10656_s21 + $0xf8] sm:$0xff] %v5119_v41  ;;  %v5123_v24 = vadd.f32 %v5122_v48, %v10644_v11  ;;  %v11710_v5 = vld [vmem:[#allocation35_spill] sm:$0xff] }
 0x3d5   : > { %v5268_v14 = vpop.f32.mrf.mxu1  ;;  %v5124_v43 = vpop.f32.mrf.mxu0 }
 0x3d6   : > { %6295 = vst [vmem:[%s10656_s21 + $0x5a0] sm:$0xff] %v5267_v22  ;;  %v5269_v45 = vadd.f32 %v5268_v14, %v10649_v51  ;;  %6151 = vst [vmem:[%s10656_s21 + $0x120] sm:$0xff] %v5123_v24  ;;  %7118 = vmatmul.mubr.msk.f32.gmra.mxu0 %vm4850_vm6, %v11705_v42  ;;  %v5125_v25 = vadd.f32 %v5124_v43, %v10649_v51  ;;  %v11711_v43 = vld [vmem:[#allocation37_spill] sm:$0xff] }
 0x3d7   : > { %7155 = vmatmul.mubr.msk.f32.gmra.mxu1 %vm4850_vm6, %v10326_v63  ;;  %v5272_v47 = vpop.f32.mrf.mxu1  ;;  %5635 = vmatprep.mubr.f32.mxu0 %v11633_v62  ;;  %v5128_v30 = vpop.f32.mrf.mxu0 }
 0x3d8   : > { %5910 = vmatprep.mubr.f32.mxu1 %v11633_v62  ;;  %6296 = vst [vmem:[%s10656_s21 + $0x5a8] sm:$0xff] %v5269_v45  ;;  %v5273_v9 = vadd.f32 %v5272_v47, %v10644_v11  ;;  %6152 = vst [vmem:[%s10656_s21 + $0x128] sm:$0xff] %v5125_v25  ;;  %v5129_v49 = vadd.f32 %v5128_v30, %v10644_v11 }
 0x3d9   : > { %v5274_v21 = vpop.f32.mrf.mxu1  ;;  %v5130_v54 = vpop.f32.mrf.mxu0 }
 0x3da   : > { %6301 = vst [vmem:[%s10656_s21 + $0x5d0] sm:$0xff] %v5273_v9  ;;  %v5275_v63 = vadd.f32 %v5274_v21, %v10649_v51  ;;  %6157 = vst [vmem:[%s10656_s21 + $0x150] sm:$0xff] %v5129_v49  ;;  %7119 = vmatmul.mubr.msk.f32.gmra.mxu0 %vm4850_vm6, %v11706_v52  ;;  %v5131_v4 = vadd.f32 %v5130_v54, %v10649_v51  ;;  %v11712_v21 = vld [vmem:[#allocation39_spill] sm:$0xff] }
 0x3db   : > { %7156 = vmatmul.mubr.msk.f32.gmra.mxu1 %vm4850_vm6, %v10354_v35  ;;  %v5278_v27 = vpop.f32.mrf.mxu1  ;;  %5641 = vmatprep.mubr.f32.mxu0 %v11633_v62  ;;  %v5134_v29 = vpop.f32.mrf.mxu0 }
 0x3dc   : > { %5916 = vmatprep.mubr.f32.mxu1 %v11633_v62  ;;  %6302 = vst [vmem:[%s10656_s21 + $0x5d8] sm:$0xff] %v5275_v63  ;;  %v5279_v2 = vadd.f32 %v5278_v27, %v10644_v11  ;;  %6158 = vst [vmem:[%s10656_s21 + $0x158] sm:$0xff] %v5131_v4  ;;  %v5135_v61 = vadd.f32 %v5134_v29, %v10644_v11 }
 0x3dd   : > { %v5280_v37 = vpop.f32.mrf.mxu1  ;;  %v5136_v7 = vpop.f32.mrf.mxu0 }
 0x3de   : > { %6307 = vst [vmem:[%s10656_s21 + $0x600] sm:$0xff] %v5279_v2  ;;  %v5281_v35 = vadd.f32 %v5280_v37, %v10649_v51  ;;  %6163 = vst [vmem:[%s10656_s21 + $0x180] sm:$0xff] %v5135_v61  ;;  %7120 = vmatmul.mubr.msk.f32.gmra.mxu0 %vm4850_vm6, %v11707_v3  ;;  %v5137_v34 = vadd.f32 %v5136_v7, %v10649_v51  ;;  %v11713_v2 = vld [vmem:[#allocation40_spill] sm:$0xff] }
 0x3df   : > { %7157 = vmatmul.mubr.msk.f32.gmra.mxu1 %vm4850_vm6, %v10373_v46  ;;  %v5284_v55 = vpop.f32.mrf.mxu1  ;;  %5647 = vmatprep.mubr.f32.mxu0 %v11633_v62  ;;  %v5140_v1 = vpop.f32.mrf.mxu0 }
 0x3e0   : > { %5922 = vmatprep.mubr.f32.mxu1 %v11633_v62  ;;  %6308 = vst [vmem:[%s10656_s21 + $0x608] sm:$0xff] %v5281_v35  ;;  %v5285_v53 = vadd.f32 %v5284_v55, %v10644_v11  ;;  %6164 = vst [vmem:[%s10656_s21 + $0x188] sm:$0xff] %v5137_v34  ;;  %v5141_v16 = vadd.f32 %v5140_v1, %v10644_v11  ;;  %v11714_v55 = vld [vmem:[#allocation41_spill] sm:$0xff]  ;;  %v7982_v1 = vld [vmem:[%s11563_s6 + $0xc0] sm:$0xff] }
 0x3e1   : > { %v5286_v31 = vpop.f32.mrf.mxu1  ;;  %v5142_v38 = vpop.f32.mrf.mxu0 }
 0x3e2   : > { %6313 = vst [vmem:[%s10656_s21 + $0x630] sm:$0xff] %v5285_v53  ;;  %v5287_v46 = vadd.f32 %v5286_v31, %v10649_v51  ;;  %6169 = vst [vmem:[%s10656_s21 + $0x1b0] sm:$0xff] %v5141_v16  ;;  %7121 = vmatmul.mubr.msk.f32.gmra.mxu0 %vm4850_vm6, %v11708_v39  ;;  %v5143_v26 = vadd.f32 %v5142_v38, %v10649_v51 }
 0x3e3   : > { %7158 = vmatmul.mubr.msk.f32.gmra.mxu1 %vm4850_vm6, %v10391_v32  ;;  %v5290_v44 = vpop.f32.mrf.mxu1  ;;  %5653 = vmatprep.mubr.f32.mxu0 %v11633_v62  ;;  %v5146_v33 = vpop.f32.mrf.mxu0 }
 0x3e4   : > { %5928 = vmatprep.mubr.f32.mxu1 %v11633_v62  ;;  %6314 = vst [vmem:[%s10656_s21 + $0x638] sm:$0xff] %v5287_v46  ;;  %v5291_v58 = vadd.f32 %v5290_v44, %v10644_v11  ;;  %6170 = vst [vmem:[%s10656_s21 + $0x1b8] sm:$0xff] %v5143_v26  ;;  %v5147_v10 = vadd.f32 %v5146_v33, %v10644_v11  ;;  %v11715_v33 = vld [vmem:[#allocation42_spill] sm:$0xff] }
 0x3e5   : > { %v5292_v23 = vpop.f32.mrf.mxu1  ;;  %v5148_v59 = vpop.f32.mrf.mxu0 }
 0x3e6   : > { %6319 = vst [vmem:[%s10656_s21 + $0x660] sm:$0xff] %v5291_v58  ;;  %v5293_v32 = vadd.f32 %v5292_v23, %v10649_v51  ;;  %6175 = vst [vmem:[%s10656_s21 + $0x1e0] sm:$0xff] %v5147_v10  ;;  %7122 = vmatmul.mubr.msk.f32.gmra.mxu0 %vm4850_vm6, %v11709_v20  ;;  %v5149_v36 = vadd.f32 %v5148_v59, %v10649_v51  ;;  %v7983_v58 = vld [vmem:[%s11563_s6 + $0xc8] sm:$0xff] }
 0x3e7   : > { %7159 = vmatmul.mubr.msk.f32.gmra.mxu1 %vm4850_vm6, %v11685_v56  ;;  %v5296_v40 = vpop.f32.mrf.mxu1  ;;  %5659 = vmatprep.mubr.f32.mxu0 %v11633_v62  ;;  %v5152_v15 = vpop.f32.mrf.mxu0 }
 0x3e8   : > { %5934 = vmatprep.mubr.f32.mxu1 %v11633_v62  ;;  %6320 = vst [vmem:[%s10656_s21 + $0x668] sm:$0xff] %v5293_v32  ;;  %v5297_v8 = vadd.f32 %v5296_v40, %v10644_v11  ;;  %6176 = vst [vmem:[%s10656_s21 + $0x1e8] sm:$0xff] %v5149_v36  ;;  %v5153_v13 = vadd.f32 %v5152_v15, %v10644_v11 }
 0x3e9   : > { %v5298_v18 = vpop.f32.mrf.mxu1  ;;  %v5154_v28 = vpop.f32.mrf.mxu0 }
 0x3ea   : > { %6325 = vst [vmem:[%s10656_s21 + $0x690] sm:$0xff] %v5297_v8  ;;  %v5299_v56 = vadd.f32 %v5298_v18, %v10649_v51  ;;  %6181 = vst [vmem:[%s10656_s21 + $0x210] sm:$0xff] %v5153_v13  ;;  %7123 = vmatmul.mubr.msk.f32.gmra.mxu0 %vm4850_vm6, %v11710_v5  ;;  %v5155_v6 = vadd.f32 %v5154_v28, %v10649_v51  ;;  %v11716_v8 = vld [vmem:[#allocation2_spill] sm:$0xff]  ;;  %v7984_v13 = vld [vmem:[%s11563_s6 + $0xd0] sm:$0xff] }
 0x3eb   : > { %7160 = vmatmul.mubr.msk.f32.gmra.mxu1 %vm4850_vm6, %v11687_v60  ;;  %v5302_v41 = vpop.f32.mrf.mxu1  ;;  %5665 = vmatprep.mubr.f32.mxu0 %v11633_v62  ;;  %v5158_v19 = vpop.f32.mrf.mxu0 }
 0x3ec   : > { %5940 = vmatprep.mubr.f32.mxu1 %v11633_v62  ;;  %6326 = vst [vmem:[%s10656_s21 + $0x698] sm:$0xff] %v5299_v56  ;;  %v5303_v48 = vadd.f32 %v5302_v41, %v10644_v11  ;;  %6182 = vst [vmem:[%s10656_s21 + $0x218] sm:$0xff] %v5155_v6  ;;  %v5159_v22 = vadd.f32 %v5158_v19, %v10644_v11 }
 0x3ed   : > { %v5304_v24 = vpop.f32.mrf.mxu1  ;;  %v5160_v14 = vpop.f32.mrf.mxu0 }
 0x3ee   : > { %6331 = vst [vmem:[%s10656_s21 + $0x6c0] sm:$0xff] %v5303_v48  ;;  %v5305_v60 = vadd.f32 %v5304_v24, %v10649_v51  ;;  %6187 = vst [vmem:[%s10656_s21 + $0x240] sm:$0xff] %v5159_v22  ;;  %7124 = vmatmul.mubr.msk.f32.gmra.mxu0 %vm4850_vm6, %v11711_v43  ;;  %v5161_v45 = vadd.f32 %v5160_v14, %v10649_v51  ;;  %v11717_v22 = vld [vmem:[#allocation6_spill] sm:$0xff]  ;;  %v7985_v24 = vld [vmem:[%s11563_s6 + $0xd8] sm:$0xff] }
 0x3ef   : > { %7161 = vmatmul.mubr.msk.f32.gmra.mxu1 %vm4850_vm6, %v11689_v17  ;;  %v5308_v42 = vpop.f32.mrf.mxu1  ;;  %5671 = vmatprep.mubr.f32.mxu0 %v11633_v62  ;;  %v5164_v25 = vpop.f32.mrf.mxu0 }
 0x3f0   : > { %5946 = vmatprep.mubr.f32.mxu1 %v11633_v62  ;;  %6332 = vst [vmem:[%s10656_s21 + $0x6c8] sm:$0xff] %v5305_v60  ;;  %v5309_v47 = vadd.f32 %v5308_v42, %v10644_v11  ;;  %6188 = vst [vmem:[%s10656_s21 + $0x248] sm:$0xff] %v5161_v45  ;;  %v5165_v30 = vadd.f32 %v5164_v25, %v10644_v11 }
 0x3f1   : > { %v5310_v9 = vpop.f32.mrf.mxu1  ;;  %v5166_v49 = vpop.f32.mrf.mxu0 }
 0x3f2   : > { %6337 = vst [vmem:[%s10656_s21 + $0x6f0] sm:$0xff] %v5309_v47  ;;  %v5311_v17 = vadd.f32 %v5310_v9, %v10649_v51  ;;  %6193 = vst [vmem:[%s10656_s21 + $0x270] sm:$0xff] %v5165_v30  ;;  %7125 = vmatmul.mubr.msk.f32.gmra.mxu0 %vm4850_vm6, %v11712_v21  ;;  %v5167_v54 = vadd.f32 %v5166_v49, %v10649_v51  ;;  %v10941_v9 = vld [vmem:[%s11563_s6 + $0x158] sm:$0xff]  ;;  %v7987_v49 = vld [vmem:[%s11563_s6 + $0xe0] sm:$0xff] }
 0x3f3   : > { %7162 = vmatmul.mubr.msk.f32.gmra.mxu1 %vm4850_vm6, %v11691_v0  ;;  %v5314_v63 = vpop.f32.mrf.mxu1  ;;  %5677 = vmatprep.mubr.f32.mxu0 %v11633_v62 }
 0x3f4   : > { %5952 = vmatprep.mubr.f32.mxu1 %v11633_v62  ;;  %6338 = vst [vmem:[%s10656_s21 + $0x6f8] sm:$0xff] %v5311_v17  ;;  %v5315_v52 = vadd.f32 %v5314_v63, %v10644_v11  ;;  %6194 = vst [vmem:[%s10656_s21 + $0x278] sm:$0xff] %v5167_v54 }
 0x3f5   : > { %v5316_v4 = vpop.f32.mrf.mxu1 }
 0x3f6   : > { %6343 = vst [vmem:[%s10656_s21 + $0x720] sm:$0xff] %v5315_v52  ;;  %v5317_v27 = vadd.f32 %v5316_v4, %v10649_v51  ;;  %v5170_v29 = vpop.f32.mrf.mxu0  ;;  %7126 = vmatmul.mubr.msk.f32.gmra.mxu0 %vm4850_vm6, %v11713_v2  ;;  %v10962_v2 = vld [vmem:[%s11563_s6 + $0x160] sm:$0xff] }
 0x3f7   : > { %7163 = vmatmul.mubr.msk.f32.gmra.mxu1 %vm4850_vm6, %v11696_v57  ;;  %v5320_v0 = vpop.f32.mrf.mxu1  ;;  %v5171_v61 = vadd.f32 %v5170_v29, %v10644_v11  ;;  %5683 = vmatprep.mubr.f32.mxu0 %v11633_v62 }
 0x3f8   : > { %5958 = vmatprep.mubr.f32.mxu1 %v11633_v62  ;;  %6344 = vst [vmem:[%s10656_s21 + $0x728] sm:$0xff] %v5317_v27  ;;  %v5321_v37 = vadd.f32 %v5320_v0, %v10644_v11  ;;  %v5172_v7 = vpop.f32.mrf.mxu0  ;;  %v7989_v0 = vld [vmem:[%s11563_s6 + $0xe8] sm:$0xff] }
 0x3f9   : > { %v5322_v35 = vpop.f32.mrf.mxu1  ;;  %6199 = vst [vmem:[%s10656_s21 + $0x2a0] sm:$0xff] %v5171_v61  ;;  %v5173_v3 = vadd.f32 %v5172_v7, %v10649_v51 }
 0x3fa   : > { %6349 = vst [vmem:[%s10656_s21 + $0x750] sm:$0xff] %v5321_v37  ;;  %v5323_v57 = vadd.f32 %v5322_v35, %v10649_v51  ;;  %v5176_v34 = vpop.f32.mrf.mxu0  ;;  %7127 = vmatmul.mubr.msk.f32.gmra.mxu0 %vm4850_vm6, %v11714_v55 }
 0x3fb   : > { %7164 = vmatmul.mubr.msk.f32.gmra.mxu1 %vm4850_vm6, %v7982_v1  ;;  %v5326_v53 = vpop.f32.mrf.mxu1  ;;  %6200 = vst [vmem:[%s10656_s21 + $0x2a8] sm:$0xff] %v5173_v3  ;;  %v5177_v16 = vadd.f32 %v5176_v34, %v10644_v11  ;;  %5689 = vmatprep.mubr.f32.mxu0 %v11633_v62  ;;  %v10983_v1 = vld [vmem:[%s11563_s6 + $0x168] sm:$0xff] }
 0x3fc   : > { %5964 = vmatprep.mubr.f32.mxu1 %v11633_v62  ;;  %6350 = vst [vmem:[%s10656_s21 + $0x758] sm:$0xff] %v5323_v57  ;;  %v5327_v31 = vadd.f32 %v5326_v53, %v10644_v11  ;;  %v5178_v38 = vpop.f32.mrf.mxu0  ;;  %v7991_v53 = vld [vmem:[%s11563_s6 + $0xf0] sm:$0xff] }
 0x3fd   : > { %v5328_v46 = vpop.f32.mrf.mxu1  ;;  %6205 = vst [vmem:[%s10656_s21 + $0x2d0] sm:$0xff] %v5177_v16  ;;  %v5179_v39 = vadd.f32 %v5178_v38, %v10649_v51 }
 0x3fe   : > { %6355 = vst [vmem:[%s10656_s21 + $0x780] sm:$0xff] %v5327_v31  ;;  %v5329_v26 = vadd.f32 %v5328_v46, %v10649_v51  ;;  %v5182_v44 = vpop.f32.mrf.mxu0  ;;  %7128 = vmatmul.mubr.msk.f32.gmra.mxu0 %vm4850_vm6, %v11715_v33 }
 0x3ff   : > { %7165 = vmatmul.mubr.msk.f32.gmra.mxu1 %vm4850_vm6, %v7983_v58  ;;  %v5332_v10 = vpop.f32.mrf.mxu1  ;;  %6206 = vst [vmem:[%s10656_s21 + $0x2d8] sm:$0xff] %v5179_v39  ;;  %v5183_v23 = vadd.f32 %v5182_v44, %v10644_v11  ;;  %5695 = vmatprep.mubr.f32.mxu0 %v11633_v62  ;;  %v11004_v58 = vld [vmem:[%s11563_s6 + $0x170] sm:$0xff] }
 0x400   : > { %5970 = vmatprep.mubr.f32.mxu1 %v11633_v62  ;;  %6356 = vst [vmem:[%s10656_s21 + $0x788] sm:$0xff] %v5329_v26  ;;  %v5333_v59 = vadd.f32 %v5332_v10, %v10644_v11  ;;  %v5184_v32 = vpop.f32.mrf.mxu0  ;;  %v7993_v10 = vld [vmem:[%s11563_s6 + $0xf8] sm:$0xff] }
 0x401   : > { %v5334_v20 = vpop.f32.mrf.mxu1  ;;  %6211 = vst [vmem:[%s10656_s21 + $0x300] sm:$0xff] %v5183_v23  ;;  %v5185_v36 = vadd.f32 %v5184_v32, %v10649_v51 }
 0x402   : > { %6361 = vst [vmem:[%s10656_s21 + $0x7b0] sm:$0xff] %v5333_v59  ;;  %v5335_v40 = vadd.f32 %v5334_v20, %v10649_v51  ;;  %v5188_v15 = vpop.f32.mrf.mxu0  ;;  %7129 = vmatmul.mubr.msk.f32.gmra.mxu0 %vm4850_vm6, %v11716_v8 }
 0x403   : > { %7166 = vmatmul.mubr.msk.f32.gmra.mxu1 %vm4850_vm6, %v7984_v13  ;;  %v5338_v18 = vpop.f32.mrf.mxu1  ;;  %6212 = vst [vmem:[%s10656_s21 + $0x308] sm:$0xff] %v5185_v36  ;;  %v5189_v28 = vadd.f32 %v5188_v15, %v10644_v11  ;;  %5701 = vmatprep.mubr.f32.mxu0 %v11633_v62  ;;  %v11025_v13 = vld [vmem:[%s11563_s6 + $0x178] sm:$0xff] }
 0x404   : > { %5976 = vmatprep.mubr.f32.mxu1 %v11633_v62  ;;  %6362 = vst [vmem:[%s10656_s21 + $0x7b8] sm:$0xff] %v5335_v40  ;;  %v5339_v56 = vadd.f32 %v5338_v18, %v10644_v11  ;;  %v5190_v5 = vpop.f32.mrf.mxu0  ;;  %v7995_v18 = vld [vmem:[%s11563_s6 + $0x100] sm:$0xff] }
 0x405   : > { %v5340_v6 = vpop.f32.mrf.mxu1  ;;  %6217 = vst [vmem:[%s10656_s21 + $0x330] sm:$0xff] %v5189_v28  ;;  %v5191_v41 = vadd.f32 %v5190_v5, %v10649_v51  ;;  %v11718_v5 = vsub.s32 2, %v11693_v12 }
 0x406   : > { %6367 = vst [vmem:[%s10656_s21 + $0x7e0] sm:$0xff] %v5339_v56  ;;  %v5341_v19 = vadd.f32 %v5340_v6, %v10649_v51  ;;  %v5194_v48 = vpop.f32.mrf.mxu0  ;;  %7130 = vmatmul.mubr.msk.f32.gmra.mxu0 %vm4850_vm6, %v11717_v22 }
 0x407   : > { %7167 = vmatmul.mubr.msk.f32.gmra.mxu1 %vm4850_vm6, %v7985_v24  ;;  %v5344_v14 = vpop.f32.mrf.mxu1  ;;  %6218 = vst [vmem:[%s10656_s21 + $0x338] sm:$0xff] %v5191_v41  ;;  %v5195_v60 = vadd.f32 %v5194_v48, %v10644_v11  ;;  %5707 = vmatprep.mubr.f32.mxu0 %v11633_v62  ;;  %v11039_v6 = vrot.slane %v10632_v50, %v11718_v5  ;;  %v11719_v24 = vsub.s32 3, %v11693_v12 }
 0x408   : > { %5982 = vmatprep.mubr.f32.mxu1 %v11633_v62  ;;  %6368 = vst [vmem:[%s10656_s21 + $0x7e8] sm:$0xff] %v5341_v19  ;;  %v5345_v43 = vadd.f32 %v5344_v14, %v10644_v11  ;;  %v5196_v45 = vpop.f32.mrf.mxu0 }
 0x409   : > { %v5346_v42 = vpop.f32.mrf.mxu1  ;;  %6223 = vst [vmem:[%s10656_s21 + $0x360] sm:$0xff] %v5195_v60  ;;  %v5197_v25 = vadd.f32 %v5196_v45, %v10649_v51  ;;  %v11049_v14 = vrot.slane %v10632_v50, %v11719_v24  ;;  %v11056_v45 = vld [vmem:[%s11563_s6 + $0x180] sm:$0xff] }
 0x40a   : > { %6373 = vst [vmem:[%s10656_s21 + $0x810] sm:$0xff] %v5345_v43  ;;  %v5347_v47 = vadd.f32 %v5346_v42, %v10649_v51  ;;  %v5200_v30 = vpop.f32.mrf.mxu0  ;;  %7131 = vmatmul.mubr.msk.f32.gmra.mxu0 %vm4850_vm6, %v10941_v9  ;;  %v7997_v42 = vld [vmem:[%s11563_s6 + $0x108] sm:$0xff] }
 0x40b   : > { %7168 = vmatmul.mubr.msk.f32.gmra.mxu1 %vm4850_vm6, %v7987_v49  ;;  %v5350_v17 = vpop.f32.mrf.mxu1  ;;  %6224 = vst [vmem:[%s10656_s21 + $0x368] sm:$0xff] %v5197_v25  ;;  %v5201_v21 = vadd.f32 %v5200_v30, %v10644_v11  ;;  %5713 = vmatprep.mubr.f32.mxu0 %v11633_v62 }
 0x40c   : > { %5988 = vmatprep.mubr.f32.mxu1 %v11633_v62  ;;  %6374 = vst [vmem:[%s10656_s21 + $0x818] sm:$0xff] %v5347_v47  ;;  %v5351_v54 = vadd.f32 %v5350_v17, %v10644_v11  ;;  %v5202_v63 = vpop.f32.mrf.mxu0 }
 0x40d   : > { %v5352_v52 = vpop.f32.mrf.mxu1  ;;  %6229 = vst [vmem:[%s10656_s21 + $0x390] sm:$0xff] %v5201_v21  ;;  %v5203_v4 = vadd.f32 %v5202_v63, %v10649_v51  ;;  %v11077_v63 = vld [vmem:[%s11563_s6 + $0x188] sm:$0xff] }
 0x40e   : > { %6379 = vst [vmem:[%s10656_s21 + $0x840] sm:$0xff] %v5351_v54  ;;  %v5353_v27 = vadd.f32 %v5352_v52, %v10649_v51  ;;  %v5206_v29 = vpop.f32.mrf.mxu0  ;;  %7132 = vmatmul.mubr.msk.f32.gmra.mxu0 %vm4850_vm6, %v10962_v2 }
 0x40f   : > { %7169 = vmatmul.mubr.msk.f32.gmra.mxu1 %vm4850_vm6, %v7989_v0  ;;  %v5356_v61 = vpop.f32.mrf.mxu1  ;;  %6230 = vst [vmem:[%s10656_s21 + $0x398] sm:$0xff] %v5203_v4  ;;  %v5207_v37 = vadd.f32 %v5206_v29, %v10644_v11  ;;  %5719 = vmatprep.mubr.f32.mxu0 %v11633_v62  ;;  %v8000_v29 = vld [vmem:[%s11563_s6 + $0x118] sm:$0xff] }
 0x410   : > { %5994 = vmatprep.mubr.f32.mxu1 %v11633_v62  ;;  %6380 = vst [vmem:[%s10656_s21 + $0x848] sm:$0xff] %v5353_v27  ;;  %v5357_v7 = vadd.f32 %v5356_v61, %v10644_v11  ;;  %v5208_v35 = vpop.f32.mrf.mxu0 }
 0x411   : > { %v5358_v3 = vpop.f32.mrf.mxu1  ;;  %6235 = vst [vmem:[%s10656_s21 + $0x3c0] sm:$0xff] %v5207_v37  ;;  %v5209_v57 = vadd.f32 %v5208_v35, %v10649_v51  ;;  %v8001_v35 = vld [vmem:[%s11563_s6 + $0x120] sm:$0xff] }
 0x412   : > { %6385 = vst [vmem:[%s10656_s21 + $0x870] sm:$0xff] %v5357_v7  ;;  %v5359_v34 = vadd.f32 %v5358_v3, %v10649_v51  ;;  %v5212_v55 = vpop.f32.mrf.mxu0  ;;  %7133 = vmatmul.mubr.msk.f32.gmra.mxu0 %vm4850_vm6, %v10983_v1 }
 0x413   : > { %7170 = vmatmul.mubr.msk.f32.gmra.mxu1 %vm4850_vm6, %v7991_v53  ;;  %v5362_v16 = vpop.f32.mrf.mxu1  ;;  %6236 = vst [vmem:[%s10656_s21 + $0x3c8] sm:$0xff] %v5209_v57  ;;  %v5213_v31 = vadd.f32 %v5212_v55, %v10644_v11  ;;  %5725 = vmatprep.mubr.f32.mxu0 %v11633_v62  ;;  %v8002_v53 = vld [vmem:[%s11563_s6 + $0x128] sm:$0xff] }
 0x414   : > { %6000 = vmatprep.mubr.f32.mxu1 %v11633_v62  ;;  %6386 = vst [vmem:[%s10656_s21 + $0x878] sm:$0xff] %v5359_v34  ;;  %v5363_v38 = vadd.f32 %v5362_v16, %v10644_v11  ;;  %v5214_v46 = vpop.f32.mrf.mxu0 }
 0x415   : > { %v5364_v39 = vpop.f32.mrf.mxu1  ;;  %6241 = vst [vmem:[%s10656_s21 + $0x3f0] sm:$0xff] %v5213_v31  ;;  %v5215_v26 = vadd.f32 %v5214_v46, %v10649_v51 }
 0x416   : > { %6391 = vst [vmem:[%s10656_s21 + $0x8a0] sm:$0xff] %v5363_v38  ;;  %v5365_v44 = vadd.f32 %v5364_v39, %v10649_v51  ;;  %v5218_v33 = vpop.f32.mrf.mxu0  ;;  %7134 = vmatmul.mubr.msk.f32.gmra.mxu0 %vm4850_vm6, %v11004_v58  ;;  %v8003_v39 = vld [vmem:[%s11563_s6 + $0x130] sm:$0xff] }
 0x417   : > { %7171 = vmatmul.mubr.msk.f32.gmra.mxu1 %vm4850_vm6, %v7993_v10  ;;  %v5368_v23 = vpop.f32.mrf.mxu1  ;;  %6242 = vst [vmem:[%s10656_s21 + $0x3f8] sm:$0xff] %v5215_v26  ;;  %v5219_v59 = vadd.f32 %v5218_v33, %v10644_v11  ;;  %5731 = vmatprep.mubr.f32.mxu0 %v11633_v62 }
 0x418   : > { %6006 = vmatprep.mubr.f32.mxu1 %v11633_v62  ;;  %6392 = vst [vmem:[%s10656_s21 + $0x8a8] sm:$0xff] %v5365_v44  ;;  %v5369_v32 = vadd.f32 %v5368_v23, %v10644_v11  ;;  %v5220_v20 = vpop.f32.mrf.mxu0  ;;  %v8004_v23 = vld [vmem:[%s11563_s6 + $0x138] sm:$0xff] }
 0x419   : > { %v5370_v36 = vpop.f32.mrf.mxu1  ;;  %6247 = vst [vmem:[%s10656_s21 + $0x420] sm:$0xff] %v5219_v59  ;;  %v5221_v40 = vadd.f32 %v5220_v20, %v10649_v51 }
 0x41a   : > { %6397 = vst [vmem:[%s10656_s21 + $0x8d0] sm:$0xff] %v5369_v32  ;;  %v5371_v15 = vadd.f32 %v5370_v36, %v10649_v51  ;;  %v5224_v8 = vpop.f32.mrf.mxu0  ;;  %7135 = vmatmul.mubr.msk.f32.gmra.mxu0 %vm4850_vm6, %v11025_v13 }
 0x41b   : > { %7172 = vmatmul.mubr.msk.f32.gmra.mxu1 %vm4850_vm6, %v7995_v18  ;;  %v5374_v28 = vpop.f32.mrf.mxu1  ;;  %6248 = vst [vmem:[%s10656_s21 + $0x428] sm:$0xff] %v5221_v40  ;;  %v5225_v56 = vadd.f32 %v5224_v8, %v10644_v11  ;;  %5737 = vmatprep.mubr.f32.mxu0 %v11633_v62  ;;  %v8005_v40 = vld [vmem:[%s11563_s6 + $0x140] sm:$0xff] }
 0x41c   : > { %6012 = vmatprep.mubr.f32.mxu1 %v11633_v62  ;;  %6398 = vst [vmem:[%s10656_s21 + $0x8d8] sm:$0xff] %v5371_v15  ;;  %v5375_v41 = vadd.f32 %v5374_v28, %v10644_v11  ;;  %v5226_v19 = vpop.f32.mrf.mxu0 }
 0x41d   : > { %v5376_v48 = vpop.f32.mrf.mxu1  ;;  %6253 = vst [vmem:[%s10656_s21 + $0x450] sm:$0xff] %v5225_v56  ;;  %v5227_v22 = vadd.f32 %v5226_v19, %v10649_v51  ;;  %v8006_v56 = vld [vmem:[%s11563_s6 + $0x148] sm:$0xff] }
 0x41e   : > { %6403 = vst [vmem:[%s10656_s21 + $0x900] sm:$0xff] %v5375_v41  ;;  %v5377_v60 = vadd.f32 %v5376_v48, %v10649_v51  ;;  %v5451_v43 = vpop.f32.mrf.mxu0  ;;  %7136 = vmatmul.mubr.msk.f32.gmra.mxu0 %vm4850_vm6, %v11056_v45 }
 0x41f   : > { %7173 = vmatmul.mubr.msk.f32.gmra.mxu1 %vm4850_vm6, %v7997_v42  ;;  %v5380_v50 = vpop.f32.mrf.mxu1  ;;  %6254 = vst [vmem:[%s10656_s21 + $0x458] sm:$0xff] %v5227_v22  ;;  %v5452_v25 = vadd.f32 %v5451_v43, %v11039_v6  ;;  %5743 = vmatprep.mubr.f32.mxu0 %v11633_v62  ;;  %v8007_v22 = vld [vmem:[%s11563_s6 + $0x150] sm:$0xff] }
 0x420   : > { %6018 = vmatprep.mubr.f32.mxu1 %v11633_v62  ;;  %6404 = vst [vmem:[%s10656_s21 + $0x908] sm:$0xff] %v5377_v60  ;;  %v5381_v47 = vadd.f32 %v5380_v50, %v10644_v11  ;;  %v5453_v30 = vpop.f32.mrf.mxu0  ;;  %v7999_v11 = vld [vmem:[%s11563_s6 + $0x110] sm:$0xff] }
 0x421   : > { %v5382_v49 = vpop.f32.mrf.mxu1  ;;  %6117 = vst [vmem:[%s10656_s21 + $0x10] sm:$0xff] %v5452_v25  ;;  %v5454_v17 = vadd.f32 %v5453_v30, %v11049_v14 }
 0x422   : > { %6409 = vst [vmem:[%s10656_s21 + $0x930] sm:$0xff] %v5381_v47  ;;  %v5383_v21 = vadd.f32 %v5382_v49, %v10649_v51  ;;  %v5457_v54 = vpop.f32.mrf.mxu0  ;;  %7137 = vmatmul.mubr.msk.f32.gmra.mxu0 %vm4850_vm6, %v11077_v63 }
 0x423   : > { %7174 = vmatmul.mubr.msk.f32.gmra.mxu1 %vm4850_vm6, %v7999_v11  ;;  %6118 = vst [vmem:[%s10656_s21 + $0x18] sm:$0xff] %v5454_v17  ;;  %v5458_v51 = vadd.f32 %v5457_v54, %v11039_v6 }
 0x424   : > { %6024 = vmatprep.mubr.f32.mxu1 %v11633_v62  ;;  %6410 = vst [vmem:[%s10656_s21 + $0x938] sm:$0xff] %v5383_v21  ;;  %v5459_v52 = vpop.f32.mrf.mxu0 }
 0x425   : > { %6123 = vst [vmem:[%s10656_s21 + $0x40] sm:$0xff] %v5458_v51  ;;  %v5460_v4 = vadd.f32 %v5459_v52, %v11049_v14 }
 0x426   : > { %v5463_v27 = vpop.f32.mrf.mxu0 }
 0x427   : > { %7175 = vmatmul.mubr.msk.f32.gmra.mxu1 %vm4850_vm6, %v8000_v29  ;;  %6124 = vst [vmem:[%s10656_s21 + $0x48] sm:$0xff] %v5460_v4  ;;  %v5464_v0 = vadd.f32 %v5463_v27, %v11039_v6  ;;  %v4842_v27 = vsub.s32 5, %v11693_v12 }
 0x428   : > { %6030 = vmatprep.mubr.f32.mxu1 %v11633_v62  ;;  %v5465_v61 = vpop.f32.mrf.mxu0 }
 0x429   : > { %6129 = vst [vmem:[%s10656_s21 + $0x70] sm:$0xff] %v5464_v0  ;;  %v5466_v37 = vadd.f32 %v5465_v61, %v11049_v14  ;;  %v8008_v0 = vld [vmem:[%s11564_s7] sm:$0x3f]  ;;  %v11720_v61 = vsub.s32 4, %v11693_v12 }
 0x42a   : > { %v5469_v7 = vpop.f32.mrf.mxu0 }
 0x42b   : > { %7176 = vmatmul.mubr.msk.f32.gmra.mxu1 %vm4850_vm6, %v8001_v35  ;;  %6130 = vst [vmem:[%s10656_s21 + $0x78] sm:$0xff] %v5466_v37  ;;  %v5470_v3 = vadd.f32 %v5469_v7, %v11039_v6  ;;  %v11202_v37 = vrot.slane %v8008_v0, %v11720_v61 }
 0x42c   : > { %6036 = vmatprep.mubr.f32.mxu1 %v11633_v62  ;;  %v5471_v57 = vpop.f32.mrf.mxu0 }
 0x42d   : > { %6135 = vst [vmem:[%s10656_s21 + $0xa0] sm:$0xff] %v5470_v3  ;;  %v5472_v34 = vadd.f32 %v5471_v57, %v11049_v14 }
 0x42e   : > { %v5475_v55 = vpop.f32.mrf.mxu0 }
 0x42f   : > { %7177 = vmatmul.mubr.msk.f32.gmra.mxu1 %vm4850_vm6, %v8002_v53  ;;  %6136 = vst [vmem:[%s10656_s21 + $0xa8] sm:$0xff] %v5472_v34  ;;  %v5476_v16 = vadd.f32 %v5475_v55, %v11039_v6 }
 0x430   : > { %6042 = vmatprep.mubr.f32.mxu1 %v11633_v62  ;;  %v5477_v31 = vpop.f32.mrf.mxu0 }
 0x431   : > { %6141 = vst [vmem:[%s10656_s21 + $0xd0] sm:$0xff] %v5476_v16  ;;  %v5478_v38 = vadd.f32 %v5477_v31, %v11049_v14 }
 0x432   : > { %v5481_v46 = vpop.f32.mrf.mxu0 }
 0x433   : > { %7178 = vmatmul.mubr.msk.f32.gmra.mxu1 %vm4850_vm6, %v8003_v39  ;;  %6142 = vst [vmem:[%s10656_s21 + $0xd8] sm:$0xff] %v5478_v38  ;;  %v5482_v26 = vadd.f32 %v5481_v46, %v11039_v6 }
 0x434   : > { %6048 = vmatprep.mubr.f32.mxu1 %v11633_v62  ;;  %v5483_v44 = vpop.f32.mrf.mxu0 }
 0x435   : > { %6147 = vst [vmem:[%s10656_s21 + $0x100] sm:$0xff] %v5482_v26  ;;  %v5484_v33 = vadd.f32 %v5483_v44, %v11049_v14 }
 0x436   : > { %v5487_v10 = vpop.f32.mrf.mxu0 }
 0x437   : > { %7179 = vmatmul.mubr.msk.f32.gmra.mxu1 %vm4850_vm6, %v8004_v23  ;;  %6148 = vst [vmem:[%s10656_s21 + $0x108] sm:$0xff] %v5484_v33  ;;  %v5488_v59 = vadd.f32 %v5487_v10, %v11039_v6 }
 0x438   : > { %6054 = vmatprep.mubr.f32.mxu1 %v11633_v62  ;;  %v5489_v32 = vpop.f32.mrf.mxu0 }
 0x439   : > { %6153 = vst [vmem:[%s10656_s21 + $0x130] sm:$0xff] %v5488_v59  ;;  %v5490_v20 = vadd.f32 %v5489_v32, %v11049_v14 }
 0x43a   : > { %v5493_v36 = vpop.f32.mrf.mxu0 }
 0x43b   : > { %7180 = vmatmul.mubr.msk.f32.gmra.mxu1 %vm4850_vm6, %v8005_v40  ;;  %6154 = vst [vmem:[%s10656_s21 + $0x138] sm:$0xff] %v5490_v20  ;;  %v5494_v15 = vadd.f32 %v5493_v36, %v11039_v6 }
 0x43c   : > { %6060 = vmatprep.mubr.f32.mxu1 %v11633_v62  ;;  %v5495_v8 = vpop.f32.mrf.mxu0 }
 0x43d   : > { %6159 = vst [vmem:[%s10656_s21 + $0x160] sm:$0xff] %v5494_v15  ;;  %v5496_v18 = vadd.f32 %v5495_v8, %v11049_v14 }
 0x43e   : > { %v5499_v28 = vpop.f32.mrf.mxu0 }
 0x43f   : > { %7181 = vmatmul.mubr.msk.f32.gmra.mxu1 %vm4850_vm6, %v8006_v56  ;;  %6160 = vst [vmem:[%s10656_s21 + $0x168] sm:$0xff] %v5496_v18  ;;  %v5500_v5 = vadd.f32 %v5499_v28, %v11039_v6 }
 0x440   : > { %6066 = vmatprep.mubr.f32.mxu1 %v11633_v62  ;;  %v5501_v41 = vpop.f32.mrf.mxu0 }
 0x441   : > { %6165 = vst [vmem:[%s10656_s21 + $0x190] sm:$0xff] %v5500_v5  ;;  %v5502_v19 = vadd.f32 %v5501_v41, %v11049_v14 }
 0x442   : > { %v5505_v48 = vpop.f32.mrf.mxu0 }
 0x443   : > { %7182 = vmatmul.mubr.msk.f32.gmra.mxu1 %vm4850_vm6, %v8007_v22  ;;  %6166 = vst [vmem:[%s10656_s21 + $0x198] sm:$0xff] %v5502_v19  ;;  %v5506_v24 = vadd.f32 %v5505_v48, %v11039_v6 }
 0x444   : > { %6072 = vmatprep.mubr.f32.mxu1 %v11633_v62  ;;  %v5507_v60 = vpop.f32.mrf.mxu0 }
 0x445   : > { %6171 = vst [vmem:[%s10656_s21 + $0x1c0] sm:$0xff] %v5506_v24  ;;  %v5508_v43 = vadd.f32 %v5507_v60, %v11049_v14 }
 0x446   : > { %v5511_v42 = vpop.f32.mrf.mxu0 }
 0x447   : > { %7183 = vmatmul.mubr.msk.f32.gmra.mxu1 %vm4850_vm6, %v10941_v9  ;;  %6172 = vst [vmem:[%s10656_s21 + $0x1c8] sm:$0xff] %v5508_v43  ;;  %v5512_v50 = vadd.f32 %v5511_v42, %v11039_v6 }
 0x448   : > { %6078 = vmatprep.mubr.f32.mxu1 %v11633_v62  ;;  %v5513_v25 = vpop.f32.mrf.mxu0 }
 0x449   : > { %6177 = vst [vmem:[%s10656_s21 + $0x1f0] sm:$0xff] %v5512_v50  ;;  %v5514_v47 = vadd.f32 %v5513_v25, %v11049_v14 }
 0x44a   : > { %v5517_v30 = vpop.f32.mrf.mxu0 }
 0x44b   : > { %7184 = vmatmul.mubr.msk.f32.gmra.mxu1 %vm4850_vm6, %v10962_v2  ;;  %6178 = vst [vmem:[%s10656_s21 + $0x1f8] sm:$0xff] %v5514_v47  ;;  %v5518_v49 = vadd.f32 %v5517_v30, %v11039_v6 }
 0x44c   : > { %6084 = vmatprep.mubr.f32.mxu1 %v11633_v62  ;;  %v5519_v9 = vpop.f32.mrf.mxu0 }
 0x44d   : > { %6183 = vst [vmem:[%s10656_s21 + $0x220] sm:$0xff] %v5518_v49  ;;  %v5520_v17 = vadd.f32 %v5519_v9, %v11049_v14 }
 0x44e   : > { %v5523_v21 = vpop.f32.mrf.mxu0 }
 0x44f   : > { %7185 = vmatmul.mubr.msk.f32.gmra.mxu1 %vm4850_vm6, %v10983_v1  ;;  %6184 = vst [vmem:[%s10656_s21 + $0x228] sm:$0xff] %v5520_v17  ;;  %v5524_v54 = vadd.f32 %v5523_v21, %v11039_v6 }
 0x450   : > { %6090 = vmatprep.mubr.f32.mxu1 %v11633_v62  ;;  %v5525_v2 = vpop.f32.mrf.mxu0 }
 0x451   : > { %6189 = vst [vmem:[%s10656_s21 + $0x250] sm:$0xff] %v5524_v54  ;;  %v5526_v11 = vadd.f32 %v5525_v2, %v11049_v14 }
 0x452   : > { %v5529_v51 = vpop.f32.mrf.mxu0 }
 0x453   : > { %7186 = vmatmul.mubr.msk.f32.gmra.mxu1 %vm4850_vm6, %v11004_v58  ;;  %6190 = vst [vmem:[%s10656_s21 + $0x258] sm:$0xff] %v5526_v11  ;;  %v5530_v52 = vadd.f32 %v5529_v51, %v11039_v6 }
 0x454   : > { %6096 = vmatprep.mubr.f32.mxu1 %v11633_v62  ;;  %v5531_v1 = vpop.f32.mrf.mxu0 }
 0x455   : > { %6195 = vst [vmem:[%s10656_s21 + $0x280] sm:$0xff] %v5530_v52  ;;  %v5532_v4 = vadd.f32 %v5531_v1, %v11049_v14 }
 0x456   : > { %v5535_v29 = vpop.f32.mrf.mxu0 }
 0x457   : > { %7187 = vmatmul.mubr.msk.f32.gmra.mxu1 %vm4850_vm6, %v11025_v13  ;;  %6196 = vst [vmem:[%s10656_s21 + $0x288] sm:$0xff] %v5532_v4  ;;  %v5536_v58 = vadd.f32 %v5535_v29, %v11039_v6  ;;  %v11206_v13 = vrot.slane %v8008_v0, %v4842_v27 }
 0x458   : > { %6102 = vmatprep.mubr.f32.mxu1 %v11633_v62  ;;  %v5537_v7 = vpop.f32.mrf.mxu0 }
 0x459   : > { %6201 = vst [vmem:[%s10656_s21 + $0x2b0] sm:$0xff] %v5536_v58  ;;  %v5538_v35 = vadd.f32 %v5537_v7, %v11049_v14 }
 0x45a   : > { %v5541_v3 = vpop.f32.mrf.mxu0 }
 0x45b   : > { %v5816_v57 = vpop.f32.mrf.mxu1  ;;  %7188 = vmatmul.mubr.msk.f32.gmra.mxu1 %vm4850_vm6, %v11056_v45  ;;  %6202 = vst [vmem:[%s10656_s21 + $0x2b8] sm:$0xff] %v5538_v35  ;;  %v5542_v34 = vadd.f32 %v5541_v3, %v11039_v6 }
 0x45c   : > { %v5817_v12 = vadd.f32 %v5816_v57, %v11202_v37  ;;  %6108 = vmatprep.mubr.f32.mxu1 %v11633_v62  ;;  %v5543_v55 = vpop.f32.mrf.mxu0 }
 0x45d   : > { %v5818_v53 = vpop.f32.mrf.mxu1  ;;  %6207 = vst [vmem:[%s10656_s21 + $0x2e0] sm:$0xff] %v5542_v34  ;;  %v5544_v16 = vadd.f32 %v5543_v55, %v11049_v14 }
 0x45e   : > { %6119 = vst [vmem:[%s10656_s21 + $0x20] sm:$0xff] %v5817_v12  ;;  %v5819_v31 = vadd.f32 %v5818_v53, %v11206_v13  ;;  %v5547_v45 = vpop.f32.mrf.mxu0 }
 0x45f   : > { %v5822_v38 = vpop.f32.mrf.mxu1  ;;  %7189 = vmatmul.mubr.msk.f32.gmra.mxu1 %vm4850_vm6, %v11077_v63  ;;  %6208 = vst [vmem:[%s10656_s21 + $0x2e8] sm:$0xff] %v5544_v16  ;;  %v5548_v62 = vadd.f32 %v5547_v45, %v11039_v6 }
 0x460   : > { %6120 = vst [vmem:[%s10656_s21 + $0x28] sm:$0xff] %v5819_v31  ;;  %v5823_v46 = vadd.f32 %v5822_v38, %v11202_v37  ;;  %v5549_v39 = vpop.f32.mrf.mxu0 }
 0x461   : > { %v5824_v26 = vpop.f32.mrf.mxu1  ;;  %6213 = vst [vmem:[%s10656_s21 + $0x310] sm:$0xff] %v5548_v62  ;;  %v5550_v44 = vadd.f32 %v5549_v39, %v11049_v14 }
 0x462   : > { %6125 = vst [vmem:[%s10656_s21 + $0x50] sm:$0xff] %v5823_v46  ;;  %v5825_v33 = vadd.f32 %v5824_v26, %v11206_v13  ;;  %v5553_v10 = vpop.f32.mrf.mxu0 }
 0x463   : > { %v5828_v63 = vpop.f32.mrf.mxu1  ;;  %6214 = vst [vmem:[%s10656_s21 + $0x318] sm:$0xff] %v5550_v44  ;;  %v5554_v23 = vadd.f32 %v5553_v10, %v11039_v6 }
 0x464   : > { %6126 = vst [vmem:[%s10656_s21 + $0x58] sm:$0xff] %v5825_v33  ;;  %v5829_v59 = vadd.f32 %v5828_v63, %v11202_v37  ;;  %v5555_v32 = vpop.f32.mrf.mxu0 }
 0x465   : > { %v5830_v20 = vpop.f32.mrf.mxu1  ;;  %6219 = vst [vmem:[%s10656_s21 + $0x340] sm:$0xff] %v5554_v23  ;;  %v5556_v36 = vadd.f32 %v5555_v32, %v11049_v14 }
 0x466   : > { %6131 = vst [vmem:[%s10656_s21 + $0x80] sm:$0xff] %v5829_v59  ;;  %v5831_v40 = vadd.f32 %v5830_v20, %v11206_v13  ;;  %v5559_v15 = vpop.f32.mrf.mxu0 }
 0x467   : > { %v5834_v8 = vpop.f32.mrf.mxu1  ;;  %6220 = vst [vmem:[%s10656_s21 + $0x348] sm:$0xff] %v5556_v36  ;;  %v5560_v18 = vadd.f32 %v5559_v15, %v11039_v6 }
 0x468   : > { %6132 = vst [vmem:[%s10656_s21 + $0x88] sm:$0xff] %v5831_v40  ;;  %v5835_v28 = vadd.f32 %v5834_v8, %v11202_v37  ;;  %v5561_v56 = vpop.f32.mrf.mxu0 }
 0x469   : > { %v5836_v5 = vpop.f32.mrf.mxu1  ;;  %6225 = vst [vmem:[%s10656_s21 + $0x370] sm:$0xff] %v5560_v18  ;;  %v5562_v41 = vadd.f32 %v5561_v56, %v11049_v14 }
 0x46a   : > { %6137 = vst [vmem:[%s10656_s21 + $0xb0] sm:$0xff] %v5835_v28  ;;  %v5837_v19 = vadd.f32 %v5836_v5, %v11206_v13  ;;  %v5565_v48 = vpop.f32.mrf.mxu0 }
 0x46b   : > { %v5840_v22 = vpop.f32.mrf.mxu1  ;;  %6226 = vst [vmem:[%s10656_s21 + $0x378] sm:$0xff] %v5562_v41  ;;  %v5566_v24 = vadd.f32 %v5565_v48, %v11039_v6 }
 0x46c   : > { %6138 = vst [vmem:[%s10656_s21 + $0xb8] sm:$0xff] %v5837_v19  ;;  %v5841_v60 = vadd.f32 %v5840_v22, %v11202_v37  ;;  %v5567_v43 = vpop.f32.mrf.mxu0 }
 0x46d   : > { %v5842_v42 = vpop.f32.mrf.mxu1  ;;  %6231 = vst [vmem:[%s10656_s21 + $0x3a0] sm:$0xff] %v5566_v24  ;;  %v5568_v50 = vadd.f32 %v5567_v43, %v11049_v14 }
 0x46e   : > { %6143 = vst [vmem:[%s10656_s21 + $0xe0] sm:$0xff] %v5841_v60  ;;  %v5843_v25 = vadd.f32 %v5842_v42, %v11206_v13  ;;  %v5571_v47 = vpop.f32.mrf.mxu0 }
 0x46f   : > { %v5846_v30 = vpop.f32.mrf.mxu1  ;;  %6232 = vst [vmem:[%s10656_s21 + $0x3a8] sm:$0xff] %v5568_v50  ;;  %v5572_v49 = vadd.f32 %v5571_v47, %v11039_v6 }
 0x470   : > { %6144 = vst [vmem:[%s10656_s21 + $0xe8] sm:$0xff] %v5843_v25  ;;  %v5847_v9 = vadd.f32 %v5846_v30, %v11202_v37  ;;  %v5573_v17 = vpop.f32.mrf.mxu0 }
 0x471   : > { %v5848_v21 = vpop.f32.mrf.mxu1  ;;  %6237 = vst [vmem:[%s10656_s21 + $0x3d0] sm:$0xff] %v5572_v49  ;;  %v5574_v54 = vadd.f32 %v5573_v17, %v11049_v14 }
 0x472   : > { %6149 = vst [vmem:[%s10656_s21 + $0x110] sm:$0xff] %v5847_v9  ;;  %v5849_v2 = vadd.f32 %v5848_v21, %v11206_v13  ;;  %v5577_v11 = vpop.f32.mrf.mxu0 }
 0x473   : > { %v5852_v51 = vpop.f32.mrf.mxu1  ;;  %6238 = vst [vmem:[%s10656_s21 + $0x3d8] sm:$0xff] %v5574_v54  ;;  %v5578_v52 = vadd.f32 %v5577_v11, %v11039_v6 }
 0x474   : > { %6150 = vst [vmem:[%s10656_s21 + $0x118] sm:$0xff] %v5849_v2  ;;  %v5853_v1 = vadd.f32 %v5852_v51, %v11202_v37  ;;  %v5579_v4 = vpop.f32.mrf.mxu0 }
 0x475   : > { %v5854_v27 = vpop.f32.mrf.mxu1  ;;  %6243 = vst [vmem:[%s10656_s21 + $0x400] sm:$0xff] %v5578_v52  ;;  %v5580_v29 = vadd.f32 %v5579_v4, %v11049_v14 }
 0x476   : > { %6155 = vst [vmem:[%s10656_s21 + $0x140] sm:$0xff] %v5853_v1  ;;  %v5855_v58 = vadd.f32 %v5854_v27, %v11206_v13  ;;  %v5583_v0 = vpop.f32.mrf.mxu0 }
 0x477   : > { %v5858_v61 = vpop.f32.mrf.mxu1  ;;  %6244 = vst [vmem:[%s10656_s21 + $0x408] sm:$0xff] %v5580_v29  ;;  %v5584_v7 = vadd.f32 %v5583_v0, %v11039_v6 }
 0x478   : > { %6156 = vst [vmem:[%s10656_s21 + $0x148] sm:$0xff] %v5855_v58  ;;  %v5859_v35 = vadd.f32 %v5858_v61, %v11202_v37  ;;  %v5585_v3 = vpop.f32.mrf.mxu0 }
 0x479   : > { %v5860_v57 = vpop.f32.mrf.mxu1  ;;  %6249 = vst [vmem:[%s10656_s21 + $0x430] sm:$0xff] %v5584_v7  ;;  %v5586_v34 = vadd.f32 %v5585_v3, %v11049_v14 }
 0x47a   : > { %6161 = vst [vmem:[%s10656_s21 + $0x170] sm:$0xff] %v5859_v35  ;;  %v5861_v12 = vadd.f32 %v5860_v57, %v11206_v13  ;;  %v5589_v55 = vpop.f32.mrf.mxu0 }
 0x47b   : > { %v5864_v53 = vpop.f32.mrf.mxu1  ;;  %6250 = vst [vmem:[%s10656_s21 + $0x438] sm:$0xff] %v5586_v34  ;;  %v5590_v16 = vadd.f32 %v5589_v55, %v11039_v6 }
 0x47c   : > { %6162 = vst [vmem:[%s10656_s21 + $0x178] sm:$0xff] %v5861_v12  ;;  %v5865_v31 = vadd.f32 %v5864_v53, %v11202_v37  ;;  %v5591_v45 = vpop.f32.mrf.mxu0 }
 0x47d   : > { %v5866_v38 = vpop.f32.mrf.mxu1  ;;  %6255 = vst [vmem:[%s10656_s21 + $0x460] sm:$0xff] %v5590_v16  ;;  %v5592_v62 = vadd.f32 %v5591_v45, %v11049_v14 }
 0x47e   : > { %6167 = vst [vmem:[%s10656_s21 + $0x1a0] sm:$0xff] %v5865_v31  ;;  %v5867_v46 = vadd.f32 %v5866_v38, %v11206_v13  ;;  %v5595_v39 = vpop.f32.mrf.mxu0 }
 0x47f   : > { %v5870_v26 = vpop.f32.mrf.mxu1  ;;  %6256 = vst [vmem:[%s10656_s21 + $0x468] sm:$0xff] %v5592_v62  ;;  %v5596_v44 = vadd.f32 %v5595_v39, %v11039_v6 }
 0x480   : > { %6168 = vst [vmem:[%s10656_s21 + $0x1a8] sm:$0xff] %v5867_v46  ;;  %v5871_v33 = vadd.f32 %v5870_v26, %v11202_v37  ;;  %v5597_v10 = vpop.f32.mrf.mxu0 }
 0x481   : > { %v5872_v63 = vpop.f32.mrf.mxu1  ;;  %6261 = vst [vmem:[%s10656_s21 + $0x490] sm:$0xff] %v5596_v44  ;;  %v5598_v23 = vadd.f32 %v5597_v10, %v11049_v14 }
 0x482   : > { %6173 = vst [vmem:[%s10656_s21 + $0x1d0] sm:$0xff] %v5871_v33  ;;  %v5873_v59 = vadd.f32 %v5872_v63, %v11206_v13  ;;  %v5601_v32 = vpop.f32.mrf.mxu0 }
 0x483   : > { %v5876_v20 = vpop.f32.mrf.mxu1  ;;  %6262 = vst [vmem:[%s10656_s21 + $0x498] sm:$0xff] %v5598_v23  ;;  %v5602_v36 = vadd.f32 %v5601_v32, %v11039_v6 }
 0x484   : > { %6174 = vst [vmem:[%s10656_s21 + $0x1d8] sm:$0xff] %v5873_v59  ;;  %v5877_v40 = vadd.f32 %v5876_v20, %v11202_v37  ;;  %v5603_v15 = vpop.f32.mrf.mxu0 }
 0x485   : > { %v5878_v8 = vpop.f32.mrf.mxu1  ;;  %6267 = vst [vmem:[%s10656_s21 + $0x4c0] sm:$0xff] %v5602_v36  ;;  %v5604_v18 = vadd.f32 %v5603_v15, %v11049_v14 }
 0x486   : > { %6179 = vst [vmem:[%s10656_s21 + $0x200] sm:$0xff] %v5877_v40  ;;  %v5879_v28 = vadd.f32 %v5878_v8, %v11206_v13  ;;  %v5607_v56 = vpop.f32.mrf.mxu0 }
 0x487   : > { %v5882_v5 = vpop.f32.mrf.mxu1  ;;  %6268 = vst [vmem:[%s10656_s21 + $0x4c8] sm:$0xff] %v5604_v18  ;;  %v5608_v41 = vadd.f32 %v5607_v56, %v11039_v6 }
 0x488   : > { %6180 = vst [vmem:[%s10656_s21 + $0x208] sm:$0xff] %v5879_v28  ;;  %v5883_v19 = vadd.f32 %v5882_v5, %v11202_v37  ;;  %v5609_v48 = vpop.f32.mrf.mxu0 }
 0x489   : > { %v5884_v22 = vpop.f32.mrf.mxu1  ;;  %6273 = vst [vmem:[%s10656_s21 + $0x4f0] sm:$0xff] %v5608_v41  ;;  %v5610_v24 = vadd.f32 %v5609_v48, %v11049_v14 }
 0x48a   : > { %6185 = vst [vmem:[%s10656_s21 + $0x230] sm:$0xff] %v5883_v19  ;;  %v5885_v60 = vadd.f32 %v5884_v22, %v11206_v13  ;;  %v5613_v43 = vpop.f32.mrf.mxu0 }
 0x48b   : > { %v5888_v42 = vpop.f32.mrf.mxu1  ;;  %6274 = vst [vmem:[%s10656_s21 + $0x4f8] sm:$0xff] %v5610_v24  ;;  %v5614_v50 = vadd.f32 %v5613_v43, %v11039_v6 }
 0x48c   : > { %6186 = vst [vmem:[%s10656_s21 + $0x238] sm:$0xff] %v5885_v60  ;;  %v5889_v25 = vadd.f32 %v5888_v42, %v11202_v37  ;;  %v5615_v47 = vpop.f32.mrf.mxu0 }
 0x48d   : > { %v5890_v30 = vpop.f32.mrf.mxu1  ;;  %6279 = vst [vmem:[%s10656_s21 + $0x520] sm:$0xff] %v5614_v50  ;;  %v5616_v49 = vadd.f32 %v5615_v47, %v11049_v14 }
 0x48e   : > { %6191 = vst [vmem:[%s10656_s21 + $0x260] sm:$0xff] %v5889_v25  ;;  %v5891_v9 = vadd.f32 %v5890_v30, %v11206_v13  ;;  %v5619_v17 = vpop.f32.mrf.mxu0 }
 0x48f   : > { %v5894_v21 = vpop.f32.mrf.mxu1  ;;  %6280 = vst [vmem:[%s10656_s21 + $0x528] sm:$0xff] %v5616_v49  ;;  %v5620_v54 = vadd.f32 %v5619_v17, %v11039_v6 }
 0x490   : > { %6192 = vst [vmem:[%s10656_s21 + $0x268] sm:$0xff] %v5891_v9  ;;  %v5895_v2 = vadd.f32 %v5894_v21, %v11202_v37  ;;  %v5621_v11 = vpop.f32.mrf.mxu0 }
 0x491   : > { %v5896_v51 = vpop.f32.mrf.mxu1  ;;  %6285 = vst [vmem:[%s10656_s21 + $0x550] sm:$0xff] %v5620_v54  ;;  %v5622_v52 = vadd.f32 %v5621_v11, %v11049_v14 }
 0x492   : > { %6197 = vst [vmem:[%s10656_s21 + $0x290] sm:$0xff] %v5895_v2  ;;  %v5897_v1 = vadd.f32 %v5896_v51, %v11206_v13  ;;  %v5625_v4 = vpop.f32.mrf.mxu0 }
 0x493   : > { %v5900_v27 = vpop.f32.mrf.mxu1  ;;  %6286 = vst [vmem:[%s10656_s21 + $0x558] sm:$0xff] %v5622_v52  ;;  %v5626_v29 = vadd.f32 %v5625_v4, %v11039_v6 }
 0x494   : > { %6198 = vst [vmem:[%s10656_s21 + $0x298] sm:$0xff] %v5897_v1  ;;  %v5901_v58 = vadd.f32 %v5900_v27, %v11202_v37  ;;  %v5627_v0 = vpop.f32.mrf.mxu0 }
 0x495   : > { %v5902_v61 = vpop.f32.mrf.mxu1  ;;  %6291 = vst [vmem:[%s10656_s21 + $0x580] sm:$0xff] %v5626_v29  ;;  %v5628_v7 = vadd.f32 %v5627_v0, %v11049_v14 }
 0x496   : > { %6203 = vst [vmem:[%s10656_s21 + $0x2c0] sm:$0xff] %v5901_v58  ;;  %v5903_v35 = vadd.f32 %v5902_v61, %v11206_v13  ;;  %v5631_v3 = vpop.f32.mrf.mxu0 }
 0x497   : > { %v5906_v57 = vpop.f32.mrf.mxu1  ;;  %6292 = vst [vmem:[%s10656_s21 + $0x588] sm:$0xff] %v5628_v7  ;;  %v5632_v34 = vadd.f32 %v5631_v3, %v11039_v6 }
 0x498   : > { %6204 = vst [vmem:[%s10656_s21 + $0x2c8] sm:$0xff] %v5903_v35  ;;  %v5907_v12 = vadd.f32 %v5906_v57, %v11202_v37  ;;  %v5633_v55 = vpop.f32.mrf.mxu0 }
 0x499   : > { %v5908_v53 = vpop.f32.mrf.mxu1  ;;  %6297 = vst [vmem:[%s10656_s21 + $0x5b0] sm:$0xff] %v5632_v34  ;;  %v5634_v16 = vadd.f32 %v5633_v55, %v11049_v14 }
 0x49a   : > { %6209 = vst [vmem:[%s10656_s21 + $0x2f0] sm:$0xff] %v5907_v12  ;;  %v5909_v31 = vadd.f32 %v5908_v53, %v11206_v13  ;;  %v5637_v45 = vpop.f32.mrf.mxu0 }
 0x49b   : > { %v5912_v38 = vpop.f32.mrf.mxu1  ;;  %6298 = vst [vmem:[%s10656_s21 + $0x5b8] sm:$0xff] %v5634_v16  ;;  %v5638_v62 = vadd.f32 %v5637_v45, %v11039_v6 }
 0x49c   : > { %6210 = vst [vmem:[%s10656_s21 + $0x2f8] sm:$0xff] %v5909_v31  ;;  %v5913_v46 = vadd.f32 %v5912_v38, %v11202_v37  ;;  %v5639_v39 = vpop.f32.mrf.mxu0 }
 0x49d   : > { %v5914_v26 = vpop.f32.mrf.mxu1  ;;  %6303 = vst [vmem:[%s10656_s21 + $0x5e0] sm:$0xff] %v5638_v62  ;;  %v5640_v44 = vadd.f32 %v5639_v39, %v11049_v14 }
 0x49e   : > { %6215 = vst [vmem:[%s10656_s21 + $0x320] sm:$0xff] %v5913_v46  ;;  %v5915_v33 = vadd.f32 %v5914_v26, %v11206_v13  ;;  %v5643_v10 = vpop.f32.mrf.mxu0 }
 0x49f   : > { %v5918_v63 = vpop.f32.mrf.mxu1  ;;  %6304 = vst [vmem:[%s10656_s21 + $0x5e8] sm:$0xff] %v5640_v44  ;;  %v5644_v23 = vadd.f32 %v5643_v10, %v11039_v6 }
 0x4a0   : > { %6216 = vst [vmem:[%s10656_s21 + $0x328] sm:$0xff] %v5915_v33  ;;  %v5919_v59 = vadd.f32 %v5918_v63, %v11202_v37  ;;  %v5645_v32 = vpop.f32.mrf.mxu0 }
 0x4a1   : > { %v5920_v20 = vpop.f32.mrf.mxu1  ;;  %6309 = vst [vmem:[%s10656_s21 + $0x610] sm:$0xff] %v5644_v23  ;;  %v5646_v36 = vadd.f32 %v5645_v32, %v11049_v14 }
 0x4a2   : > { %6221 = vst [vmem:[%s10656_s21 + $0x350] sm:$0xff] %v5919_v59  ;;  %v5921_v40 = vadd.f32 %v5920_v20, %v11206_v13  ;;  %v5649_v15 = vpop.f32.mrf.mxu0 }
 0x4a3   : > { %v5924_v8 = vpop.f32.mrf.mxu1  ;;  %6310 = vst [vmem:[%s10656_s21 + $0x618] sm:$0xff] %v5646_v36  ;;  %v5650_v18 = vadd.f32 %v5649_v15, %v11039_v6 }
 0x4a4   : > { %6222 = vst [vmem:[%s10656_s21 + $0x358] sm:$0xff] %v5921_v40  ;;  %v5925_v28 = vadd.f32 %v5924_v8, %v11202_v37  ;;  %v5651_v56 = vpop.f32.mrf.mxu0 }
 0x4a5   : > { %v5926_v5 = vpop.f32.mrf.mxu1  ;;  %6315 = vst [vmem:[%s10656_s21 + $0x640] sm:$0xff] %v5650_v18  ;;  %v5652_v41 = vadd.f32 %v5651_v56, %v11049_v14 }
 0x4a6   : > { %6227 = vst [vmem:[%s10656_s21 + $0x380] sm:$0xff] %v5925_v28  ;;  %v5927_v19 = vadd.f32 %v5926_v5, %v11206_v13  ;;  %v5655_v48 = vpop.f32.mrf.mxu0 }
 0x4a7   : > { %v5930_v22 = vpop.f32.mrf.mxu1  ;;  %6316 = vst [vmem:[%s10656_s21 + $0x648] sm:$0xff] %v5652_v41  ;;  %v5656_v24 = vadd.f32 %v5655_v48, %v11039_v6 }
 0x4a8   : > { %6228 = vst [vmem:[%s10656_s21 + $0x388] sm:$0xff] %v5927_v19  ;;  %v5931_v60 = vadd.f32 %v5930_v22, %v11202_v37  ;;  %v5657_v43 = vpop.f32.mrf.mxu0 }
 0x4a9   : > { %v5932_v42 = vpop.f32.mrf.mxu1  ;;  %6321 = vst [vmem:[%s10656_s21 + $0x670] sm:$0xff] %v5656_v24  ;;  %v5658_v50 = vadd.f32 %v5657_v43, %v11049_v14 }
 0x4aa   : > { %6233 = vst [vmem:[%s10656_s21 + $0x3b0] sm:$0xff] %v5931_v60  ;;  %v5933_v25 = vadd.f32 %v5932_v42, %v11206_v13  ;;  %v5661_v47 = vpop.f32.mrf.mxu0 }
 0x4ab   : > { %v5936_v30 = vpop.f32.mrf.mxu1  ;;  %6322 = vst [vmem:[%s10656_s21 + $0x678] sm:$0xff] %v5658_v50  ;;  %v5662_v49 = vadd.f32 %v5661_v47, %v11039_v6 }
 0x4ac   : > { %6234 = vst [vmem:[%s10656_s21 + $0x3b8] sm:$0xff] %v5933_v25  ;;  %v5937_v9 = vadd.f32 %v5936_v30, %v11202_v37  ;;  %v5663_v17 = vpop.f32.mrf.mxu0 }
 0x4ad   : > { %v5938_v21 = vpop.f32.mrf.mxu1  ;;  %6327 = vst [vmem:[%s10656_s21 + $0x6a0] sm:$0xff] %v5662_v49  ;;  %v5664_v54 = vadd.f32 %v5663_v17, %v11049_v14 }
 0x4ae   : > { %6239 = vst [vmem:[%s10656_s21 + $0x3e0] sm:$0xff] %v5937_v9  ;;  %v5939_v2 = vadd.f32 %v5938_v21, %v11206_v13  ;;  %v5667_v11 = vpop.f32.mrf.mxu0 }
 0x4af   : > { %v5942_v51 = vpop.f32.mrf.mxu1  ;;  %6328 = vst [vmem:[%s10656_s21 + $0x6a8] sm:$0xff] %v5664_v54  ;;  %v5668_v52 = vadd.f32 %v5667_v11, %v11039_v6 }
 0x4b0   : > { %6240 = vst [vmem:[%s10656_s21 + $0x3e8] sm:$0xff] %v5939_v2  ;;  %v5943_v1 = vadd.f32 %v5942_v51, %v11202_v37  ;;  %v5669_v4 = vpop.f32.mrf.mxu0 }
 0x4b1   : > { %v5944_v27 = vpop.f32.mrf.mxu1  ;;  %6333 = vst [vmem:[%s10656_s21 + $0x6d0] sm:$0xff] %v5668_v52  ;;  %v5670_v29 = vadd.f32 %v5669_v4, %v11049_v14 }
 0x4b2   : > { %6245 = vst [vmem:[%s10656_s21 + $0x410] sm:$0xff] %v5943_v1  ;;  %v5945_v58 = vadd.f32 %v5944_v27, %v11206_v13  ;;  %v5673_v0 = vpop.f32.mrf.mxu0 }
 0x4b3   : > { %v5948_v61 = vpop.f32.mrf.mxu1  ;;  %6334 = vst [vmem:[%s10656_s21 + $0x6d8] sm:$0xff] %v5670_v29  ;;  %v5674_v7 = vadd.f32 %v5673_v0, %v11039_v6 }
 0x4b4   : > { %6246 = vst [vmem:[%s10656_s21 + $0x418] sm:$0xff] %v5945_v58  ;;  %v5949_v35 = vadd.f32 %v5948_v61, %v11202_v37  ;;  %v5675_v3 = vpop.f32.mrf.mxu0 }
 0x4b5   : > { %v5950_v57 = vpop.f32.mrf.mxu1  ;;  %6339 = vst [vmem:[%s10656_s21 + $0x700] sm:$0xff] %v5674_v7  ;;  %v5676_v34 = vadd.f32 %v5675_v3, %v11049_v14 }
 0x4b6   : > { %6251 = vst [vmem:[%s10656_s21 + $0x440] sm:$0xff] %v5949_v35  ;;  %v5951_v12 = vadd.f32 %v5950_v57, %v11206_v13  ;;  %v5679_v55 = vpop.f32.mrf.mxu0 }
 0x4b7   : > { %v5954_v53 = vpop.f32.mrf.mxu1  ;;  %6340 = vst [vmem:[%s10656_s21 + $0x708] sm:$0xff] %v5676_v34  ;;  %v5680_v16 = vadd.f32 %v5679_v55, %v11039_v6 }
 0x4b8   : > { %6252 = vst [vmem:[%s10656_s21 + $0x448] sm:$0xff] %v5951_v12  ;;  %v5955_v31 = vadd.f32 %v5954_v53, %v11202_v37  ;;  %v5681_v45 = vpop.f32.mrf.mxu0 }
 0x4b9   : > { %v5956_v38 = vpop.f32.mrf.mxu1  ;;  %6345 = vst [vmem:[%s10656_s21 + $0x730] sm:$0xff] %v5680_v16  ;;  %v5682_v62 = vadd.f32 %v5681_v45, %v11049_v14 }
 0x4ba   : > { %6257 = vst [vmem:[%s10656_s21 + $0x470] sm:$0xff] %v5955_v31  ;;  %v5957_v46 = vadd.f32 %v5956_v38, %v11206_v13  ;;  %v5685_v39 = vpop.f32.mrf.mxu0 }
 0x4bb   : > { %v5960_v26 = vpop.f32.mrf.mxu1  ;;  %6346 = vst [vmem:[%s10656_s21 + $0x738] sm:$0xff] %v5682_v62  ;;  %v5686_v44 = vadd.f32 %v5685_v39, %v11039_v6 }
 0x4bc   : > { %6258 = vst [vmem:[%s10656_s21 + $0x478] sm:$0xff] %v5957_v46  ;;  %v5961_v33 = vadd.f32 %v5960_v26, %v11202_v37  ;;  %v5687_v10 = vpop.f32.mrf.mxu0 }
 0x4bd   : > { %v5962_v63 = vpop.f32.mrf.mxu1  ;;  %6351 = vst [vmem:[%s10656_s21 + $0x760] sm:$0xff] %v5686_v44  ;;  %v5688_v23 = vadd.f32 %v5687_v10, %v11049_v14 }
 0x4be   : > { %6263 = vst [vmem:[%s10656_s21 + $0x4a0] sm:$0xff] %v5961_v33  ;;  %v5963_v59 = vadd.f32 %v5962_v63, %v11206_v13  ;;  %v5691_v32 = vpop.f32.mrf.mxu0 }
 0x4bf   : > { %v5966_v20 = vpop.f32.mrf.mxu1  ;;  %6352 = vst [vmem:[%s10656_s21 + $0x768] sm:$0xff] %v5688_v23  ;;  %v5692_v36 = vadd.f32 %v5691_v32, %v11039_v6 }
 0x4c0   : > { %6264 = vst [vmem:[%s10656_s21 + $0x4a8] sm:$0xff] %v5963_v59  ;;  %v5967_v40 = vadd.f32 %v5966_v20, %v11202_v37  ;;  %v5693_v15 = vpop.f32.mrf.mxu0 }
 0x4c1   : > { %v5968_v8 = vpop.f32.mrf.mxu1  ;;  %6357 = vst [vmem:[%s10656_s21 + $0x790] sm:$0xff] %v5692_v36  ;;  %v5694_v18 = vadd.f32 %v5693_v15, %v11049_v14 }
 0x4c2   : > { %6269 = vst [vmem:[%s10656_s21 + $0x4d0] sm:$0xff] %v5967_v40  ;;  %v5969_v28 = vadd.f32 %v5968_v8, %v11206_v13  ;;  %v5697_v56 = vpop.f32.mrf.mxu0 }
 0x4c3   : > { %v5972_v5 = vpop.f32.mrf.mxu1  ;;  %6358 = vst [vmem:[%s10656_s21 + $0x798] sm:$0xff] %v5694_v18  ;;  %v5698_v41 = vadd.f32 %v5697_v56, %v11039_v6 }
 0x4c4   : > { %6270 = vst [vmem:[%s10656_s21 + $0x4d8] sm:$0xff] %v5969_v28  ;;  %v5973_v19 = vadd.f32 %v5972_v5, %v11202_v37  ;;  %v5699_v48 = vpop.f32.mrf.mxu0 }
 0x4c5   : > { %v5974_v22 = vpop.f32.mrf.mxu1  ;;  %6363 = vst [vmem:[%s10656_s21 + $0x7c0] sm:$0xff] %v5698_v41  ;;  %v5700_v24 = vadd.f32 %v5699_v48, %v11049_v14 }
 0x4c6   : > { %6275 = vst [vmem:[%s10656_s21 + $0x500] sm:$0xff] %v5973_v19  ;;  %v5975_v60 = vadd.f32 %v5974_v22, %v11206_v13  ;;  %v5703_v43 = vpop.f32.mrf.mxu0 }
 0x4c7   : > { %v5978_v42 = vpop.f32.mrf.mxu1  ;;  %6364 = vst [vmem:[%s10656_s21 + $0x7c8] sm:$0xff] %v5700_v24  ;;  %v5704_v50 = vadd.f32 %v5703_v43, %v11039_v6 }
 0x4c8   : > { %6276 = vst [vmem:[%s10656_s21 + $0x508] sm:$0xff] %v5975_v60  ;;  %v5979_v25 = vadd.f32 %v5978_v42, %v11202_v37  ;;  %v5705_v47 = vpop.f32.mrf.mxu0 }
 0x4c9   : > { %v5980_v30 = vpop.f32.mrf.mxu1  ;;  %6369 = vst [vmem:[%s10656_s21 + $0x7f0] sm:$0xff] %v5704_v50  ;;  %v5706_v49 = vadd.f32 %v5705_v47, %v11049_v14 }
 0x4ca   : > { %6281 = vst [vmem:[%s10656_s21 + $0x530] sm:$0xff] %v5979_v25  ;;  %v5981_v9 = vadd.f32 %v5980_v30, %v11206_v13  ;;  %v5709_v17 = vpop.f32.mrf.mxu0 }
 0x4cb   : > { %v5984_v21 = vpop.f32.mrf.mxu1  ;;  %6370 = vst [vmem:[%s10656_s21 + $0x7f8] sm:$0xff] %v5706_v49  ;;  %v5710_v54 = vadd.f32 %v5709_v17, %v11039_v6 }
 0x4cc   : > { %6282 = vst [vmem:[%s10656_s21 + $0x538] sm:$0xff] %v5981_v9  ;;  %v5985_v2 = vadd.f32 %v5984_v21, %v11202_v37  ;;  %v5711_v11 = vpop.f32.mrf.mxu0 }
 0x4cd   : > { %v5986_v51 = vpop.f32.mrf.mxu1  ;;  %6375 = vst [vmem:[%s10656_s21 + $0x820] sm:$0xff] %v5710_v54  ;;  %v5712_v52 = vadd.f32 %v5711_v11, %v11049_v14 }
 0x4ce   : > { %6287 = vst [vmem:[%s10656_s21 + $0x560] sm:$0xff] %v5985_v2  ;;  %v5987_v1 = vadd.f32 %v5986_v51, %v11206_v13  ;;  %v5715_v4 = vpop.f32.mrf.mxu0 }
 0x4cf   : > { %v5990_v27 = vpop.f32.mrf.mxu1  ;;  %6376 = vst [vmem:[%s10656_s21 + $0x828] sm:$0xff] %v5712_v52  ;;  %v5716_v29 = vadd.f32 %v5715_v4, %v11039_v6 }
 0x4d0   : > { %6288 = vst [vmem:[%s10656_s21 + $0x568] sm:$0xff] %v5987_v1  ;;  %v5991_v58 = vadd.f32 %v5990_v27, %v11202_v37  ;;  %v5717_v0 = vpop.f32.mrf.mxu0 }
 0x4d1   : > { %v5992_v61 = vpop.f32.mrf.mxu1  ;;  %6381 = vst [vmem:[%s10656_s21 + $0x850] sm:$0xff] %v5716_v29  ;;  %v5718_v7 = vadd.f32 %v5717_v0, %v11049_v14 }
 0x4d2   : > { %6293 = vst [vmem:[%s10656_s21 + $0x590] sm:$0xff] %v5991_v58  ;;  %v5993_v35 = vadd.f32 %v5992_v61, %v11206_v13  ;;  %v5721_v3 = vpop.f32.mrf.mxu0 }
 0x4d3   : > { %v5996_v57 = vpop.f32.mrf.mxu1  ;;  %6382 = vst [vmem:[%s10656_s21 + $0x858] sm:$0xff] %v5718_v7  ;;  %v5722_v34 = vadd.f32 %v5721_v3, %v11039_v6 }
 0x4d4   : > { %6294 = vst [vmem:[%s10656_s21 + $0x598] sm:$0xff] %v5993_v35  ;;  %v5997_v12 = vadd.f32 %v5996_v57, %v11202_v37  ;;  %v5723_v55 = vpop.f32.mrf.mxu0 }
 0x4d5   : > { %v5998_v53 = vpop.f32.mrf.mxu1  ;;  %6387 = vst [vmem:[%s10656_s21 + $0x880] sm:$0xff] %v5722_v34  ;;  %v5724_v16 = vadd.f32 %v5723_v55, %v11049_v14 }
 0x4d6   : > { %6299 = vst [vmem:[%s10656_s21 + $0x5c0] sm:$0xff] %v5997_v12  ;;  %v5999_v31 = vadd.f32 %v5998_v53, %v11206_v13  ;;  %v5727_v45 = vpop.f32.mrf.mxu0 }
 0x4d7   : > { %v6002_v38 = vpop.f32.mrf.mxu1  ;;  %6388 = vst [vmem:[%s10656_s21 + $0x888] sm:$0xff] %v5724_v16  ;;  %v5728_v62 = vadd.f32 %v5727_v45, %v11039_v6 }
 0x4d8   : > { %6300 = vst [vmem:[%s10656_s21 + $0x5c8] sm:$0xff] %v5999_v31  ;;  %v6003_v46 = vadd.f32 %v6002_v38, %v11202_v37  ;;  %v5729_v39 = vpop.f32.mrf.mxu0 }
 0x4d9   : > { %v6004_v26 = vpop.f32.mrf.mxu1  ;;  %6393 = vst [vmem:[%s10656_s21 + $0x8b0] sm:$0xff] %v5728_v62  ;;  %v5730_v44 = vadd.f32 %v5729_v39, %v11049_v14 }
 0x4da   : > { %6305 = vst [vmem:[%s10656_s21 + $0x5f0] sm:$0xff] %v6003_v46  ;;  %v6005_v33 = vadd.f32 %v6004_v26, %v11206_v13  ;;  %v5733_v10 = vpop.f32.mrf.mxu0 }
 0x4db   : > { %v6008_v63 = vpop.f32.mrf.mxu1  ;;  %6394 = vst [vmem:[%s10656_s21 + $0x8b8] sm:$0xff] %v5730_v44  ;;  %v5734_v23 = vadd.f32 %v5733_v10, %v11039_v6 }
 0x4dc   : > { %6306 = vst [vmem:[%s10656_s21 + $0x5f8] sm:$0xff] %v6005_v33  ;;  %v6009_v59 = vadd.f32 %v6008_v63, %v11202_v37  ;;  %v5735_v32 = vpop.f32.mrf.mxu0 }
 0x4dd   : > { %v6010_v20 = vpop.f32.mrf.mxu1  ;;  %6399 = vst [vmem:[%s10656_s21 + $0x8e0] sm:$0xff] %v5734_v23  ;;  %v5736_v36 = vadd.f32 %v5735_v32, %v11049_v14 }
 0x4de   : > { %6311 = vst [vmem:[%s10656_s21 + $0x620] sm:$0xff] %v6009_v59  ;;  %v6011_v40 = vadd.f32 %v6010_v20, %v11206_v13  ;;  %v5739_v15 = vpop.f32.mrf.mxu0 }
 0x4df   : > { %v6014_v8 = vpop.f32.mrf.mxu1  ;;  %6400 = vst [vmem:[%s10656_s21 + $0x8e8] sm:$0xff] %v5736_v36  ;;  %v5740_v18 = vadd.f32 %v5739_v15, %v11039_v6 }
 0x4e0   : > { %6312 = vst [vmem:[%s10656_s21 + $0x628] sm:$0xff] %v6011_v40  ;;  %v6015_v28 = vadd.f32 %v6014_v8, %v11202_v37  ;;  %v5741_v56 = vpop.f32.mrf.mxu0 }
 0x4e1   : > { %v6016_v5 = vpop.f32.mrf.mxu1  ;;  %6405 = vst [vmem:[%s10656_s21 + $0x910] sm:$0xff] %v5740_v18  ;;  %v5742_v41 = vadd.f32 %v5741_v56, %v11049_v14 }
 0x4e2   : > { %6317 = vst [vmem:[%s10656_s21 + $0x650] sm:$0xff] %v6015_v28  ;;  %v6017_v19 = vadd.f32 %v6016_v5, %v11206_v13  ;;  %v5745_v48 = vpop.f32.mrf.mxu0 }
 0x4e3   : > { %v6020_v22 = vpop.f32.mrf.mxu1  ;;  %6406 = vst [vmem:[%s10656_s21 + $0x918] sm:$0xff] %v5742_v41  ;;  %v5746_v24 = vadd.f32 %v5745_v48, %v11039_v6 }
 0x4e4   : > { %6318 = vst [vmem:[%s10656_s21 + $0x658] sm:$0xff] %v6017_v19  ;;  %v6021_v60 = vadd.f32 %v6020_v22, %v11202_v37  ;;  %v5747_v43 = vpop.f32.mrf.mxu0 }
 0x4e5   : > { %v6022_v42 = vpop.f32.mrf.mxu1  ;;  %6411 = vst [vmem:[%s10656_s21 + $0x940] sm:$0xff] %v5746_v24  ;;  %v5748_v50 = vadd.f32 %v5747_v43, %v11049_v14 }
 0x4e6   : > { %6323 = vst [vmem:[%s10656_s21 + $0x680] sm:$0xff] %v6021_v60  ;;  %v6023_v25 = vadd.f32 %v6022_v42, %v11206_v13 }
 0x4e7   : > { %v6026_v47 = vpop.f32.mrf.mxu1  ;;  %6412 = vst [vmem:[%s10656_s21 + $0x948] sm:$0xff] %v5748_v50 }
 0x4e8   : > { %6324 = vst [vmem:[%s10656_s21 + $0x688] sm:$0xff] %v6023_v25  ;;  %v6027_v6 = vadd.f32 %v6026_v47, %v11202_v37 }
 0x4e9   : > { %v6028_v30 = vpop.f32.mrf.mxu1 }
 0x4ea   : > { %6329 = vst [vmem:[%s10656_s21 + $0x6b0] sm:$0xff] %v6027_v6  ;;  %v6029_v49 = vadd.f32 %v6028_v30, %v11206_v13 }
 0x4eb   : > { %v6032_v9 = vpop.f32.mrf.mxu1 }
 0x4ec   : > { %6330 = vst [vmem:[%s10656_s21 + $0x6b8] sm:$0xff] %v6029_v49  ;;  %v6033_v14 = vadd.f32 %v6032_v9, %v11202_v37 }
 0x4ed   : > { %v6034_v17 = vpop.f32.mrf.mxu1 }
 0x4ee   : > { %6335 = vst [vmem:[%s10656_s21 + $0x6e0] sm:$0xff] %v6033_v14  ;;  %v6035_v21 = vadd.f32 %v6034_v17, %v11206_v13 }
 0x4ef   : > { %v6038_v54 = vpop.f32.mrf.mxu1 }
 0x4f0   : > { %6336 = vst [vmem:[%s10656_s21 + $0x6e8] sm:$0xff] %v6035_v21  ;;  %v6039_v2 = vadd.f32 %v6038_v54, %v11202_v37 }
 0x4f1   : > { %v6040_v11 = vpop.f32.mrf.mxu1 }
 0x4f2   : > { %6341 = vst [vmem:[%s10656_s21 + $0x710] sm:$0xff] %v6039_v2  ;;  %v6041_v51 = vadd.f32 %v6040_v11, %v11206_v13 }
 0x4f3   : > { %v6044_v52 = vpop.f32.mrf.mxu1 }
 0x4f4   : > { %6342 = vst [vmem:[%s10656_s21 + $0x718] sm:$0xff] %v6041_v51  ;;  %v6045_v1 = vadd.f32 %v6044_v52, %v11202_v37 }
 0x4f5   : > { %v6046_v4 = vpop.f32.mrf.mxu1 }
 0x4f6   : > { %6347 = vst [vmem:[%s10656_s21 + $0x740] sm:$0xff] %v6045_v1  ;;  %v6047_v27 = vadd.f32 %v6046_v4, %v11206_v13 }
 0x4f7   : > { %v6050_v29 = vpop.f32.mrf.mxu1 }
 0x4f8   : > { %6348 = vst [vmem:[%s10656_s21 + $0x748] sm:$0xff] %v6047_v27  ;;  %v6051_v58 = vadd.f32 %v6050_v29, %v11202_v37 }
 0x4f9   : > { %v6052_v0 = vpop.f32.mrf.mxu1 }
 0x4fa   : > { %6353 = vst [vmem:[%s10656_s21 + $0x770] sm:$0xff] %v6051_v58  ;;  %v6053_v61 = vadd.f32 %v6052_v0, %v11206_v13 }
 0x4fb   : > { %v6056_v7 = vpop.f32.mrf.mxu1 }
 0x4fc   : > { %6354 = vst [vmem:[%s10656_s21 + $0x778] sm:$0xff] %v6053_v61  ;;  %v6057_v35 = vadd.f32 %v6056_v7, %v11202_v37 }
 0x4fd   : > { %v6058_v3 = vpop.f32.mrf.mxu1 }
 0x4fe   : > { %6359 = vst [vmem:[%s10656_s21 + $0x7a0] sm:$0xff] %v6057_v35  ;;  %v6059_v57 = vadd.f32 %v6058_v3, %v11206_v13 }
 0x4ff   : > { %v6062_v34 = vpop.f32.mrf.mxu1 }
 0x500   : > { %6360 = vst [vmem:[%s10656_s21 + $0x7a8] sm:$0xff] %v6059_v57  ;;  %v6063_v12 = vadd.f32 %v6062_v34, %v11202_v37 }
 0x501   : > { %v6064_v55 = vpop.f32.mrf.mxu1 }
 0x502   : > { %6365 = vst [vmem:[%s10656_s21 + $0x7d0] sm:$0xff] %v6063_v12  ;;  %v6065_v53 = vadd.f32 %v6064_v55, %v11206_v13 }
 0x503   : > { %v6068_v16 = vpop.f32.mrf.mxu1 }
 0x504   : > { %6366 = vst [vmem:[%s10656_s21 + $0x7d8] sm:$0xff] %v6065_v53  ;;  %v6069_v31 = vadd.f32 %v6068_v16, %v11202_v37 }
 0x505   : > { %v6070_v45 = vpop.f32.mrf.mxu1 }
 0x506   : > { %6371 = vst [vmem:[%s10656_s21 + $0x800] sm:$0xff] %v6069_v31  ;;  %v6071_v38 = vadd.f32 %v6070_v45, %v11206_v13 }
 0x507   : > { %v6074_v62 = vpop.f32.mrf.mxu1 }
 0x508   : > { %6372 = vst [vmem:[%s10656_s21 + $0x808] sm:$0xff] %v6071_v38  ;;  %v6075_v46 = vadd.f32 %v6074_v62, %v11202_v37 }
 0x509   : > { %v6076_v39 = vpop.f32.mrf.mxu1 }
 0x50a   : > { %6377 = vst [vmem:[%s10656_s21 + $0x830] sm:$0xff] %v6075_v46  ;;  %v6077_v26 = vadd.f32 %v6076_v39, %v11206_v13 }
 0x50b   : > { %v6080_v44 = vpop.f32.mrf.mxu1 }
 0x50c   : > { %6378 = vst [vmem:[%s10656_s21 + $0x838] sm:$0xff] %v6077_v26  ;;  %v6081_v33 = vadd.f32 %v6080_v44, %v11202_v37 }
 0x50d   : > { %v6082_v10 = vpop.f32.mrf.mxu1 }
 0x50e   : > { %6383 = vst [vmem:[%s10656_s21 + $0x860] sm:$0xff] %v6081_v33  ;;  %v6083_v63 = vadd.f32 %v6082_v10, %v11206_v13 }
 0x50f   : > { %v6086_v23 = vpop.f32.mrf.mxu1 }
 0x510   : > { %6384 = vst [vmem:[%s10656_s21 + $0x868] sm:$0xff] %v6083_v63  ;;  %v6087_v59 = vadd.f32 %v6086_v23, %v11202_v37 }
 0x511   : > { %v6088_v32 = vpop.f32.mrf.mxu1 }
 0x512   : > { %6389 = vst [vmem:[%s10656_s21 + $0x890] sm:$0xff] %v6087_v59  ;;  %v6089_v20 = vadd.f32 %v6088_v32, %v11206_v13 }
 0x513   : > { %v6092_v36 = vpop.f32.mrf.mxu1 }
 0x514   : > { %6390 = vst [vmem:[%s10656_s21 + $0x898] sm:$0xff] %v6089_v20  ;;  %v6093_v40 = vadd.f32 %v6092_v36, %v11202_v37 }
 0x515   : > { %v6094_v15 = vpop.f32.mrf.mxu1 }
 0x516   : > { %6395 = vst [vmem:[%s10656_s21 + $0x8c0] sm:$0xff] %v6093_v40  ;;  %v6095_v8 = vadd.f32 %v6094_v15, %v11206_v13 }
 0x517   : > { %v6098_v18 = vpop.f32.mrf.mxu1 }
 0x518   : > { %6396 = vst [vmem:[%s10656_s21 + $0x8c8] sm:$0xff] %v6095_v8  ;;  %v6099_v28 = vadd.f32 %v6098_v18, %v11202_v37 }
 0x519   : > { %v6100_v56 = vpop.f32.mrf.mxu1 }
 0x51a   : > { %6401 = vst [vmem:[%s10656_s21 + $0x8f0] sm:$0xff] %v6099_v28  ;;  %v6101_v5 = vadd.f32 %v6100_v56, %v11206_v13 }
 0x51b   : > { %v6104_v41 = vpop.f32.mrf.mxu1 }
 0x51c   : > { %6402 = vst [vmem:[%s10656_s21 + $0x8f8] sm:$0xff] %v6101_v5  ;;  %v6105_v19 = vadd.f32 %v6104_v41, %v11202_v37 }
 0x51d   : > { %v6106_v48 = vpop.f32.mrf.mxu1 }
 0x51e   : > { %6407 = vst [vmem:[%s10656_s21 + $0x920] sm:$0xff] %v6105_v19  ;;  %v6107_v22 = vadd.f32 %v6106_v48, %v11206_v13 }
 0x51f   : > { %v6110_v24 = vpop.f32.mrf.mxu1 }
 0x520   : > { %6408 = vst [vmem:[%s10656_s21 + $0x928] sm:$0xff] %v6107_v22  ;;  %v6111_v60 = vadd.f32 %v6110_v24, %v11202_v37 }
 0x521   : > { %v6112_v43 = vpop.f32.mrf.mxu1 }
 0x522   : > { %6413 = vst [vmem:[%s10656_s21 + $0x950] sm:$0xff] %v6111_v60  ;;  %v6113_v42 = vadd.f32 %v6112_v43, %v11206_v13 }
 0x524   : > { %6414 = vst [vmem:[%s10656_s21 + $0x958] sm:$0xff] %v6113_v42 }
 0x525 PF: > { %s18_s27 = sadd.s32 1, %s8015_s27  }
 0x526   : > { %p15_p4 = scmp.ge.s32.totalorder %s18_s27, 4  }
 0x528   :  { %17 = sbr.rel (!%p15_p4) target bundleno = 1 (0x1), region = 85 }

</bundles_post_ra>
